<compile_context>
chip_gen: v6e
topology: v6e:2x2x1
jax: 0.10.0
libtpu: 0.0.40
codegen_flags: <defaults>
</compile_context>

<pallas_src>
import jax
import jax.numpy as jnp
from jax.experimental import pallas as pl
from jax.experimental.pallas import tpu as pltpu

IMG_DIM = 28 * 28
Z_DIM = 50
IN_DIM = IMG_DIM + Z_DIM          # 834
HIDDEN = 1024
BN_EPS = 1e-5
LRELU_SLOPE = 0.2


def _d_kernel(x_ref, w1_ref, w2_ref, w3_ref, pack_ref, o_ref):
    # packed per-feature vectors: row 0 = b1, row 1 = gamma, row 2 = beta,
    # row 3 = b3 broadcast across lanes.
    pk = pack_ref[...]                               # (4, 1024) f32
    b1 = pk[0:1, :]
    gamma = pk[1:2, :]
    beta = pk[2:3, :]
    b3 = pk[3:4, 0:1]                                # (1, 1)

    # ---- Linear 1 (bf16 MXU, f32 accumulate) + bias + LeakyReLU (f32) --------
    x = x_ref[0].astype(jnp.bfloat16)                # (B, 834) cast in-kernel
    h1 = jnp.dot(x, w1_ref[...], preferred_element_type=jnp.float32)  # (B,1024)
    h1 = h1 + b1
    h1 = jnp.where(h1 > 0, h1, LRELU_SLOPE * h1)

    # ---- Linear 2 (bf16 MXU, f32 accumulate) ---------------------------------
    # b2 intentionally dropped: BatchNorm's batch-mean subtraction cancels any
    # per-feature constant bias exactly (training-mode BN only).
    h2 = jnp.dot(h1.astype(jnp.bfloat16), w2_ref[...],
                 preferred_element_type=jnp.float32)                  # (B,1024)

    # ---- BatchNorm1d (training mode), one-pass statistics --------------------
    mean = jnp.mean(h2, axis=0, keepdims=True)                        # (1,1024)
    msq = jnp.mean(h2 * h2, axis=0, keepdims=True)                    # (1,1024)
    var = jnp.maximum(msq - mean * mean, 0.0)
    h2 = (h2 - mean) * jax.lax.rsqrt(var + BN_EPS)
    h2 = h2 * gamma + beta

    # ---- LeakyReLU -----------------------------------------------------------
    h2 = jnp.where(h2 > 0, h2, LRELU_SLOPE * h2)

    # ---- Linear 3 as lane-dense multiply + row reduce, then Sigmoid ----------
    logits = jnp.sum(h2 * w3_ref[...], axis=-1, keepdims=True) + b3   # (B, 1)
    o_ref[0] = jax.nn.sigmoid(logits)


def init_params(key):
    """Deterministic init matching PyTorch nn.Linear defaults:
    W, b ~ U(-1/sqrt(fan_in), 1/sqrt(fan_in)); BatchNorm gamma=1, beta=0."""
    k = jax.random.split(key, 6)

    def linear(kw, kb, fan_in, fan_out):
        bound = 1.0 / jnp.sqrt(fan_in)
        w = jax.random.uniform(kw, (fan_in, fan_out), jnp.float32, -bound, bound)
        b = jax.random.uniform(kb, (fan_out,), jnp.float32, -bound, bound)
        return w, b

    w1, b1 = linear(k[0], k[1], IN_DIM, HIDDEN)
    w2, b2 = linear(k[2], k[3], HIDDEN, HIDDEN)
    w3, b3 = linear(k[4], k[5], HIDDEN, 1)
    gamma = jnp.ones((HIDDEN,), jnp.float32)
    beta = jnp.zeros((HIDDEN,), jnp.float32)
    return (w1, b1, w2, b2, gamma, beta, w3, b3)


def prepare_params(params):
    """One-time weight prep (do NOT repeat per forward): cast W1/W2 to bf16,
    transpose w3 to a lane-dense (1, 1024), pack b1/gamma/beta/b3 into one
    (4, 1024) f32 array. b2 is dropped (cancelled by training-mode BN)."""
    w1, b1, w2, b2, gamma, beta, w3, b3 = params
    w1b = w1.astype(jnp.bfloat16)                                  # (834, 1024)
    w2b = w2.astype(jnp.bfloat16)                                  # (1024, 1024)
    w3t = w3.reshape(1, HIDDEN).astype(jnp.float32)                # (1, 1024)
    packed = jnp.stack(
        [b1, gamma, beta, jnp.broadcast_to(b3.reshape(1), (HIDDEN,))],
        axis=0).astype(jnp.float32)                                # (4, 1024)
    return (w1b, w2b, w3t, packed)


def d_forward(x, prepared):
    """x: (B, 834) or (G, B, 834) float32. G independent discriminator calls
    (e.g. D(real), D(fake)) are fused into one pallas_call: weights are DMA'd
    once and stay VMEM-resident across the group grid; BatchNorm statistics are
    computed per group (identical to calling the module once per group).
    Returns (B, 1) or (G, B, 1) float32 sigmoid probabilities."""
    squeeze = (x.ndim == 2)
    if squeeze:
        x = x[None]
    G, B, F = x.shape
    assert F == IN_DIM
    w1b, w2b, w3t, packed = prepared

    out = pl.pallas_call(
        _d_kernel,
        out_shape=jax.ShapeDtypeStruct((G, B, 1), jnp.float32),
        grid=(G,),
        in_specs=[
            pl.BlockSpec((1, B, IN_DIM), lambda g: (g, 0, 0)),      # x: per group
            pl.BlockSpec((IN_DIM, HIDDEN), lambda g: (0, 0)),       # W1: resident
            pl.BlockSpec((HIDDEN, HIDDEN), lambda g: (0, 0)),       # W2: resident
            pl.BlockSpec((1, HIDDEN), lambda g: (0, 0)),            # w3^T: resident
            pl.BlockSpec((4, HIDDEN), lambda g: (0, 0)),            # biases: resident
        ],
        out_specs=pl.BlockSpec((1, B, 1), lambda g: (g, 0, 0)),
        compiler_params=pltpu.CompilerParams(
            dimension_semantics=("parallel",)),
    )(x, w1b, w2b, w3t, packed)
    return out[0] if squeeze else out


def d_reference_f32(x, params):
    """Pure-JAX f32 reference matching the PyTorch module exactly (one call)."""
    w1, b1, w2, b2, gamma, beta, w3, b3 = params
    h = x @ w1 + b1
    h = jnp.where(h > 0, h, LRELU_SLOPE * h)
    h = h @ w2 + b2
    mean = jnp.mean(h, axis=0, keepdims=True)
    var = jnp.mean((h - mean) ** 2, axis=0, keepdims=True)
    h = (h - mean) / jnp.sqrt(var + BN_EPS) * gamma + beta
    h = jnp.where(h > 0, h, LRELU_SLOPE * h)
    return jax.nn.sigmoid(h @ w3 + b3)


def d_reference_prepared(x, prepared):
    """Pure-JAX reference mirroring the kernel's bf16-weight numerics (one call)."""
    w1b, w2b, w3t, packed = prepared
    h = jnp.dot(x.astype(jnp.bfloat16), w1b,
                preferred_element_type=jnp.float32) + packed[0:1]
    h = jnp.where(h > 0, h, LRELU_SLOPE * h)
    h = jnp.dot(h.astype(jnp.bfloat16), w2b, preferred_element_type=jnp.float32)
    mean = jnp.mean(h, axis=0, keepdims=True)
    msq = jnp.mean(h * h, axis=0, keepdims=True)
    var = jnp.maximum(msq - mean * mean, 0.0)
    h = (h - mean) * jax.lax.rsqrt(var + BN_EPS)
    h = h * packed[1:2] + packed[2:3]
    h = jnp.where(h > 0, h, LRELU_SLOPE * h)
    logits = jnp.sum(h * w3t, axis=-1, keepdims=True) + packed[3, 0]
    return jax.nn.sigmoid(logits)


if __name__ == "__main__":
    key = jax.random.PRNGKey(0)
    k_param, k_real, k_fake = jax.random.split(key, 3)

    params = init_params(k_param)
    prepared = prepare_params(params)

    B = 8   # small, sublane-aligned batch per group
    G = 2   # fused D(real), D(fake) -> weights DMA'd once for both
    x_real = jax.random.normal(k_real, (B, IN_DIM), jnp.float32)
    x_fake = jax.random.normal(k_fake, (B, IN_DIM), jnp.float32)
    x = jnp.stack([x_real, x_fake], axis=0)                     # (G, B, 834)

    out = jax.block_until_ready(d_forward(x, prepared))         # (G, B, 1)
    assert out.shape == (G, B, 1)

    ref_bf16 = jnp.stack([d_reference_prepared(x[g], prepared) for g in range(G)])
    ref_f32 = jnp.stack([d_reference_f32(x[g], params) for g in range(G)])

    # Tight check against a reference mirroring the kernel's bf16 numerics.
    assert jnp.allclose(out, ref_bf16, atol=2e-3, rtol=2e-3)
    # Looser check against exact f32 module semantics (bf16 weight rounding).
    assert jnp.allclose(out, ref_f32, atol=5e-2, rtol=5e-2)

    # Single-call (ungrouped) path also works and matches group 0.
    out_single = jax.block_until_ready(d_forward(x[0], prepared))
    assert out_single.shape == (B, 1)
    assert jnp.allclose(out_single, ref_bf16[0], atol=2e-3, rtol=2e-3)

    print("KERNEL_OK")
</pallas_src>

<mosaic_0001>
module attributes {stable_mosaic.version = 11 : i64} {
  func.func @_d_kernel(%arg0: i32, %arg1: memref<1x8x834xf32, #tpu.memory_space<vmem>>, %arg2: memref<834x1024xbf16, #tpu.memory_space<vmem>>, %arg3: memref<1024x1024xbf16, #tpu.memory_space<vmem>>, %arg4: memref<1x1024xf32, #tpu.memory_space<vmem>>, %arg5: memref<4x1024xf32, #tpu.memory_space<vmem>>, %arg6: memref<1x8x1xf32, #tpu.memory_space<vmem>>) attributes {dimension_semantics = [#tpu.dimension_semantics<parallel>], iteration_bounds = array<i64: 2>, scalar_prefetch = 0 : i64, scratch_operands = 0 : i64, tpu.core_type = #tpu.core_type<tc>, window_params = [{transform_indices = @transform_0, window_bounds = array<i64: 1, 8, 834>}, {pipeline_mode = #tpu.pipeline_mode<synchronous>, transform_indices = @transform_1, window_bounds = array<i64: 834, 1024>}, {pipeline_mode = #tpu.pipeline_mode<synchronous>, transform_indices = @transform_2, window_bounds = array<i64: 1024, 1024>}, {pipeline_mode = #tpu.pipeline_mode<synchronous>, transform_indices = @transform_3, window_bounds = array<i64: 1, 1024>}, {pipeline_mode = #tpu.pipeline_mode<synchronous>, transform_indices = @transform_4, window_bounds = array<i64: 4, 1024>}, {transform_indices = @transform_5, window_bounds = array<i64: 1, 8, 1>}]} {
    %c0 = arith.constant 0 : index
    %c0_0 = arith.constant 0 : index
    %0 = vector.load %arg5[%c0, %c0_0] : memref<4x1024xf32, #tpu.memory_space<vmem>>, vector<4x1024xf32>
    %1 = vector.extract_strided_slice %0 {offsets = [0, 0], sizes = [1, 1024], strides = [1, 1]} : vector<4x1024xf32> to vector<1x1024xf32>
    %2 = vector.extract_strided_slice %0 {offsets = [1, 0], sizes = [1, 1024], strides = [1, 1]} : vector<4x1024xf32> to vector<1x1024xf32>
    %3 = vector.extract_strided_slice %0 {offsets = [2, 0], sizes = [1, 1024], strides = [1, 1]} : vector<4x1024xf32> to vector<1x1024xf32>
    %4 = vector.extract_strided_slice %0 {offsets = [3, 0], sizes = [1, 1], strides = [1, 1]} : vector<4x1024xf32> to vector<1x1xf32>
    %c0_1 = arith.constant 0 : index
    %c0_2 = arith.constant 0 : index
    %c0_3 = arith.constant 0 : index
    %5 = vector.load %arg1[%c0_1, %c0_2, %c0_3] : memref<1x8x834xf32, #tpu.memory_space<vmem>>, vector<1x8x834xf32>
    %6 = vector.shape_cast %5 : vector<1x8x834xf32> to vector<8x834xf32>
    %7 = arith.truncf %6 : vector<8x834xf32> to vector<8x834xbf16>
    %c0_4 = arith.constant 0 : index
    %c0_5 = arith.constant 0 : index
    %8 = vector.load %arg2[%c0_4, %c0_5] : memref<834x1024xbf16, #tpu.memory_space<vmem>>, vector<834x1024xbf16>
    %cst = arith.constant dense<0.000000e+00> : vector<8x1024xf32>
    %9 = tpu.matmul %7, %8, %cst {dimension_numbers = #tpu.dot_dimension_numbers<[1], [0], [0], [1], [0, 0, 1, 1], [], []>} : vector<8x834xbf16>, vector<834x1024xbf16>, vector<8x1024xf32> -> vector<8x1024xf32>
    %10 = vector.broadcast %1 : vector<1x1024xf32> to vector<8x1024xf32>
    %11 = arith.addf %9, %10 : vector<8x1024xf32>
    %cst_6 = arith.constant 0.000000e+00 : f32
    %12 = vector.broadcast %cst_6 : f32 to vector<8x1024xf32>
    %13 = arith.cmpf ogt, %11, %12 : vector<8x1024xf32>
    %cst_7 = arith.constant 2.000000e-01 : f32
    %14 = vector.broadcast %cst_7 : f32 to vector<8x1024xf32>
    %15 = arith.mulf %14, %11 : vector<8x1024xf32>
    %16 = arith.select %13, %11, %15 : vector<8x1024xi1>, vector<8x1024xf32>
    %17 = arith.truncf %16 : vector<8x1024xf32> to vector<8x1024xbf16>
    %c0_8 = arith.constant 0 : index
    %c0_9 = arith.constant 0 : index
    %18 = vector.load %arg3[%c0_8, %c0_9] : memref<1024x1024xbf16, #tpu.memory_space<vmem>>, vector<1024x1024xbf16>
    %cst_10 = arith.constant dense<0.000000e+00> : vector<8x1024xf32>
    %19 = tpu.matmul %17, %18, %cst_10 {dimension_numbers = #tpu.dot_dimension_numbers<[1], [0], [0], [1], [0, 0, 1, 1], [], []>} : vector<8x1024xbf16>, vector<1024x1024xbf16>, vector<8x1024xf32> -> vector<8x1024xf32>
    %cst_11 = arith.constant dense<0.000000e+00> : vector<1024xf32>
    %20 = vector.multi_reduction <add>, %19, %cst_11 [0] : vector<8x1024xf32> to vector<1024xf32>
    %21 = vector.shape_cast %20 : vector<1024xf32> to vector<1x1024xf32>
    %cst_12 = arith.constant 8.000000e+00 : f32
    %22 = vector.broadcast %cst_12 : f32 to vector<1x1024xf32>
    %23 = arith.divf %21, %22 : vector<1x1024xf32>
    %24 = arith.mulf %19, %19 : vector<8x1024xf32>
    %cst_13 = arith.constant dense<0.000000e+00> : vector<1024xf32>
    %25 = vector.multi_reduction <add>, %24, %cst_13 [0] : vector<8x1024xf32> to vector<1024xf32>
    %26 = vector.shape_cast %25 : vector<1024xf32> to vector<1x1024xf32>
    %cst_14 = arith.constant 8.000000e+00 : f32
    %27 = vector.broadcast %cst_14 : f32 to vector<1x1024xf32>
    %28 = arith.divf %26, %27 : vector<1x1024xf32>
    %29 = arith.mulf %23, %23 : vector<1x1024xf32>
    %30 = arith.subf %28, %29 : vector<1x1024xf32>
    %cst_15 = arith.constant 0.000000e+00 : f32
    %31 = vector.broadcast %cst_15 : f32 to vector<1x1024xf32>
    %32 = arith.maximumf %30, %31 : vector<1x1024xf32>
    %33 = vector.broadcast %23 : vector<1x1024xf32> to vector<8x1024xf32>
    %34 = arith.subf %19, %33 : vector<8x1024xf32>
    %cst_16 = arith.constant 9.99999974E-6 : f32
    %35 = vector.broadcast %cst_16 : f32 to vector<1x1024xf32>
    %36 = arith.addf %32, %35 : vector<1x1024xf32>
    %37 = math.rsqrt %36 : vector<1x1024xf32>
    %38 = vector.broadcast %37 : vector<1x1024xf32> to vector<8x1024xf32>
    %39 = arith.mulf %34, %38 : vector<8x1024xf32>
    %40 = vector.broadcast %2 : vector<1x1024xf32> to vector<8x1024xf32>
    %41 = arith.mulf %39, %40 : vector<8x1024xf32>
    %42 = vector.broadcast %3 : vector<1x1024xf32> to vector<8x1024xf32>
    %43 = arith.addf %41, %42 : vector<8x1024xf32>
    %cst_17 = arith.constant 0.000000e+00 : f32
    %44 = vector.broadcast %cst_17 : f32 to vector<8x1024xf32>
    %45 = arith.cmpf ogt, %43, %44 : vector<8x1024xf32>
    %cst_18 = arith.constant 2.000000e-01 : f32
    %46 = vector.broadcast %cst_18 : f32 to vector<8x1024xf32>
    %47 = arith.mulf %46, %43 : vector<8x1024xf32>
    %48 = arith.select %45, %43, %47 : vector<8x1024xi1>, vector<8x1024xf32>
    %c0_19 = arith.constant 0 : index
    %c0_20 = arith.constant 0 : index
    %49 = vector.load %arg4[%c0_19, %c0_20] : memref<1x1024xf32, #tpu.memory_space<vmem>>, vector<1x1024xf32>
    %50 = vector.broadcast %49 : vector<1x1024xf32> to vector<8x1024xf32>
    %51 = arith.mulf %48, %50 : vector<8x1024xf32>
    %cst_21 = arith.constant dense<0.000000e+00> : vector<8xf32>
    %52 = vector.multi_reduction <add>, %51, %cst_21 [1] : vector<8x1024xf32> to vector<8xf32>
    %53 = vector.shape_cast %52 : vector<8xf32> to vector<8x1xf32>
    %54 = vector.broadcast %4 : vector<1x1xf32> to vector<8x1xf32>
    %55 = arith.addf %53, %54 : vector<8x1xf32>
    %56 = arith.negf %55 : vector<8x1xf32>
    %57 = math.exp %56 : vector<8x1xf32>
    %cst_22 = arith.constant 1.000000e+00 : f32
    %58 = vector.broadcast %cst_22 : f32 to vector<8x1xf32>
    %59 = arith.addf %58, %57 : vector<8x1xf32>
    %60 = arith.divf %58, %59 : vector<8x1xf32>
    %c0_23 = arith.constant 0 : index
    %c0_24 = arith.constant 0 : index
    %c0_25 = arith.constant 0 : index
    %61 = vector.load %arg6[%c0_23, %c0_24, %c0_25] : memref<1x8x1xf32, #tpu.memory_space<vmem>>, vector<1x8x1xf32>
    %62 = vector.shape_cast %61 : vector<1x8x1xf32> to vector<8x1xf32>
    %63 = vector.shape_cast %60 : vector<8x1xf32> to vector<1x8x1xf32>
    tpu.vector_store %arg6[%c0_23, %c0_24, %c0_25], %63 {strides = array<i32>} : memref<1x8x1xf32, #tpu.memory_space<vmem>>, vector<1x8x1xf32>,
    return
  }
  func.func @transform_0(%arg0: i32) -> (i32, i32, i32) {
    %c0_i32 = arith.constant 0 : i32
    %c0_i32_0 = arith.constant 0 : i32
    %c0_i32_1 = arith.constant 0 : i32
    return %arg0, %c0_i32, %c0_i32_0 : i32, i32, i32
  }
  func.func @transform_1(%arg0: i32) -> (i32, i32) {
    %c0_i32 = arith.constant 0 : i32
    %c0_i32_0 = arith.constant 0 : i32
    %c0_i32_1 = arith.constant 0 : i32
    return %c0_i32, %c0_i32_0 : i32, i32
  }
  func.func @transform_2(%arg0: i32) -> (i32, i32) {
    %c0_i32 = arith.constant 0 : i32
    %c0_i32_0 = arith.constant 0 : i32
    %c0_i32_1 = arith.constant 0 : i32
    return %c0_i32, %c0_i32_0 : i32, i32
  }
  func.func @transform_3(%arg0: i32) -> (i32, i32) {
    %c0_i32 = arith.constant 0 : i32
    %c0_i32_0 = arith.constant 0 : i32
    %c0_i32_1 = arith.constant 0 : i32
    return %c0_i32, %c0_i32_0 : i32, i32
  }
  func.func @transform_4(%arg0: i32) -> (i32, i32) {
    %c0_i32 = arith.constant 0 : i32
    %c0_i32_0 = arith.constant 0 : i32
    %c0_i32_1 = arith.constant 0 : i32
    return %c0_i32, %c0_i32_0 : i32, i32
  }
  func.func @transform_5(%arg0: i32) -> (i32, i32, i32) {
    %c0_i32 = arith.constant 0 : i32
    %c0_i32_0 = arith.constant 0 : i32
    %c0_i32_1 = arith.constant 0 : i32
    return %arg0, %c0_i32, %c0_i32_0 : i32, i32, i32
  }
}

</mosaic_0001>

<bundles_post_ra>
// kernel: tpu_custom_call.1
= control target key start
LH: loop header
LB: loop body
LE: loop exit
PB: predicated region body
PF: predicated region fallthrough
CT: control target
= control target key end

     0   :  { %10 = vsyncpa [#allocation3], 0  ;;  %s9725_s0 = inlined_call_operand.hbm [shape: f32[2,8,834], index: 0, kind: input, shape index: {}]   ;;  %s9726_s1 = inlined_call_operand.hbm [shape: bf16[834,1024], index: 1, kind: input, shape index: {}]   ;;  %s9727_s2 = inlined_call_operand.hbm [shape: bf16[1024,1024], index: 2, kind: input, shape index: {}]   ;;  %s9728_s3 = inlined_call_operand.hbm [shape: f32[1,1024], index: 3, kind: input, shape index: {}]   ;;  %s9729_s4 = inlined_call_operand.hbm [shape: f32[4,1024], index: 4, kind: input, shape index: {}]   ;;  %s9730_s5 = inlined_call_operand.vmem [shape: f32[2,8,1], index: 5, kind: output, shape index: {}]  }
   0x1   :  { %12 = vsyncpa [#allocation3 + $0x1], 0 }
   0x2   :  { %13 = vsyncpa [#allocation5], 0 }
   0x3   :  { %14 = vsyncpa [#allocation8], 0  ;;  %s9186_s18 = smov 0   ;;  %s9188_s19 = smov 0  }
   0x4   :  { %s9190_s20 = smov 0   ;;  %s9192_s21 = smov 0  }
   0x5 LB: > { %s9148_s22 = smov [#allocation4]   ;;  %s9207_s24 = sadd.s32 4294967295, %s9146_s21   ;;  %s9146_s21 = sphi %s9192_s21, %s9747_s21   ;;  %s9142_s20 = sphi %s9190_s20, %s9746_s20   ;;  %s9138_s19 = sphi %s9188_s19, %s9745_s19   ;;  %s9134_s18 = sphi %s9186_s18, %s9744_s18  }
   0x6   : > { %s173_s23 = sshll.u32 %s9148_s22, 4  ;;  %p7892_p0 = scmp.ge.s32.totalorder %s9146_s21, 1  ;;  %s174_s23 = int_to_ptr.vmem [resolvable:$true] %s173_s23 }
   0x7   : > { %p9731_p1 = scmp.eq.s32.totalorder %s9207_s24, 0  ;;  %p161_p2 = scmp.lt.s32.totalorder %s9146_s21, 3 }
   0x8   : > { %s9149_s26 = smov [#allocation7]   ;;  %s9150_s29 = smov [#allocation6]  }
   0x9   : > { %p9212_p3 = pnand %p7892_p0, %p161_p2  ;;  %s200_s27 = sshll.u32 %s9149_s26, 4  ;;  %s201_s27 = int_to_ptr.vmem [resolvable:$true] %s200_s27 }
   0xa   : > { %s186_s30 = sshll.u32 %s9150_s29, 4  ;;  %s8983_s6 = scalar_lea.vmem %s174_s23, 53760  ;;  %s9224_s30 = int_to_ptr.vmem [resolvable:$true] %s186_s30 }
   0xb   : > { %s9734_s25 = scalar_select %p9212_p3, 1, 0 }
   0xc   : > { %p8873_p4 = pneg %p9212_p3  ;;  %p8984_p7 = scmp.ne.s32.totalorder %s174_s23, %s8983_s6 }
   0xd   : > { %p8991_p10 = scmp.lt.s32.totalorder %s174_s23, %s174_s23  ;;  %p8992_p11 = scmp.lt.s32.totalorder %s8983_s6, %s8983_s6 }
   0xe   : > { %p9220_p5 = pnand %p8873_p4, %p9731_p1 }
   0xf   : > { %p8993_p12 = por %p8992_p11, %p8991_p10 }
  0x10   : > { %p8974_p6 = pneg %p9220_p5 }
  0x12   : > { %p8986_p8 = pnand %p8984_p7, %p8974_p6 }
  0x14   : > { %p8987_p9 = pneg %p8986_p8 }
  0x16   : > { %p8994_p13 = pnand %p8993_p12, %p8987_p9 }
  0x18   : > { %8997 = shalt.err (!%p8994_p13)
}
  0x19   : > { %s9151_s7 = smov 512   ;;  %s9152_s8 = smov 32  }
  0x1a   : > { %8876 = dma.hbm_to_vmem [thread:$0]  (!%p9220_p5), %s9726_s1, 53760, %s174_s23, [#allocation5], %s9151_s7, %s9151_s7, %s9152_s8  }
  0x1b   : > { %s9009_s11 = scalar_lea.vmem %s201_s27, 128  ;;  %p9017_p7 = scmp.lt.s32.totalorder %s201_s27, %s201_s27 }
  0x1c   : > { %p9010_p0 = scmp.ne.s32.totalorder %s201_s27, %s9009_s11  ;;  %p9018_p8 = scmp.lt.s32.totalorder %s9009_s11, %s9009_s11 }
  0x1e   : > { %p9012_p2 = pnand %p9010_p0, %p8974_p6  ;;  %p9019_p10 = por %p9018_p8, %p9017_p7 }
  0x20   : > { %p9013_p4 = pneg %p9012_p2 }
  0x22   : > { %p9020_p9 = pnand %p9019_p10, %p9013_p4 }
  0x24   : > { %9023 = shalt.err (!%p9020_p9)
}
  0x25   : > { %8882 = dma.hbm_to_vmem [thread:$0]  (!%p9220_p5), %s9728_s3, 128, %s201_s27, [#allocation8]  }
  0x26   : > { %s9035_s14 = scalar_lea.vmem %s9224_s30, 65536  ;;  %p9043_p0 = scmp.lt.s32.totalorder %s9224_s30, %s9224_s30 }
  0x27   : > { %p9036_p11 = scmp.ne.s32.totalorder %s9224_s30, %s9035_s14  ;;  %p9044_p2 = scmp.lt.s32.totalorder %s9035_s14, %s9035_s14 }
  0x29   : > { %p9038_p12 = pnand %p9036_p11, %p8974_p6  ;;  %p9045_p4 = por %p9044_p2, %p9043_p0 }
  0x2b   : > { %p9039_p13 = pneg %p9038_p12 }
  0x2d   : > { %p9046_p7 = pnand %p9045_p4, %p9039_p13 }
  0x2f   : > { %9049 = shalt.err (!%p9046_p7)
}
  0x30   : > { %8879 = dma.hbm_to_vmem [thread:$0]  (!%p9220_p5), %s9727_s2, 65536, %s9224_s30, [#allocation5], %s9151_s7, %s9151_s7, %s9152_s8  }
  0x31   : > { %s9153_s17 = smov [#allocation9]  }
  0x32   : > { %s211_s22 = sshll.u32 %s9153_s17, 4  ;;  %s212_s22 = int_to_ptr.vmem [resolvable:$true] %s211_s22 }
  0x33   : > { %s9061_s23 = scalar_lea.vmem %s212_s22, 512  ;;  %p9069_p11 = scmp.lt.s32.totalorder %s212_s22, %s212_s22 }
  0x34   : > { %p9062_p8 = scmp.ne.s32.totalorder %s212_s22, %s9061_s23  ;;  %p9070_p12 = scmp.lt.s32.totalorder %s9061_s23, %s9061_s23 }
  0x36   : > { %p9064_p10 = pnand %p9062_p8, %p8974_p6  ;;  %p9071_p13 = por %p9070_p12, %p9069_p11 }
  0x38   : > { %p9065_p9 = pneg %p9064_p10 }
  0x3a   : > { %p9072_p0 = pnand %p9071_p13, %p9065_p9 }
  0x3c   : > { %9075 = shalt.err (!%p9072_p0)
}
  0x3d   : > { %8885 = dma.hbm_to_vmem [thread:$0]  (!%p9220_p5), %s9729_s4, 512, %s212_s22, [#allocation8]  }
  0x3e   : > { %s9266_s29 = sadd.s32 1, %s9146_s21   ;;  %s27_s28 = sadd.s32 1, %s9142_s20 }
  0x3f   : > { %s24_s30 = ssub.s32 %s9146_s21, %s9266_s29  ;;  %p34_p6 = scmp.ne.s32.totalorder %s9142_s20, %s9138_s19 }
  0x40   : > { %p25_p2 = scmp.eq.s32.totalorder %s24_s30, 0  ;;  %p35_p4 = scmp.eq.s32.totalorder %s9146_s21, 0 }
  0x41   : > { %p40_p7 = scmp.ne.s32.totalorder %s9138_s19, %s9134_s18  ;;  %p8894_p8 = scmp.lt.s32.totalorder %s9146_s21, 2 }
  0x42   : > { %s9278_s6 = scalar_select %p25_p2, %s9142_s20, %s27_s28  }
  0x43   : > { %p36_p10 = por %p35_p4, %p34_p6  ;;  %p9282_p9 = por %p9731_p1, %p40_p7 }
  0x44   : > { %s222_s8 = sand.u32 1, %s9142_s20   ;;  %s8853_s9 = smul.u32 896, %s9146_s21 }
  0x45   : > { %s9736_s7 = scalar_select %p9282_p9, 1, 0 }
  0x46   : > { %s8852_s10 = smul.u32 56, %s222_s8  ;;  %p9288_p5 = pnand %p8894_p8, %p36_p10 }
  0x47   : > { %s9295_s18 = scalar_lea.hbm %s9725_s0, %s8853_s9  ;;  %s223_s16 = scalar_lea.sflag [#allocation3], %s222_s8 }
  0x48   : > { %s226_s14 = scalar_lea.vmem [#allocation2], %s8852_s10  ;;  %s9076_s17 = scalar_lea.hbm %s9295_s18, 896 }
  0x49   : > { %s234_s15 = sshll.u32 %s226_s14, 4  ;;  %p9077_p11 = scmp.ne.s32.totalorder %s9295_s18, %s9076_s17  ;;  %s235_s15 = int_to_ptr.vmem [resolvable:$true] %s234_s15 }
  0x4a   : > { %p9078_p12 = pneg %p9288_p5  ;;  %s9081_s23 = scalar_lea.hbm %s9725_s0, 1792 }
  0x4b   : > { %p9082_p6 = scmp.lt.s32.totalorder %s9295_s18, %s9725_s0  ;;  %p9083_p2 = scmp.lt.s32.totalorder %s9081_s23, %s9076_s17 }
  0x4c   : > { %p9079_p13 = pnand %p9078_p12, %p9077_p11 }
  0x4d   : > { %p9084_p4 = por %p9083_p2, %p9082_p6 }
  0x4e   : > { %p9080_p0 = pneg %p9079_p13 }
  0x50   : > { %p9085_p7 = pnand %p9084_p4, %p9080_p0 }
  0x52   : > { %9088 = shalt.err (!%p9085_p7)
}
  0x53   : > { %s9089_s28 = scalar_lea.vmem %s235_s15, 896  ;;  %s9154_s30 = smov [#allocation2]  }
  0x54   : > { %p9090_p8 = scmp.ne.s32.totalorder %s235_s15, %s9089_s28  ;;  %s9094_s8 = sshll.u32 %s9154_s30, 4  ;;  %s9095_s8 = int_to_ptr.vmem [resolvable:$false] %s9094_s8 }
  0x55   : > { %s9096_s9 = scalar_lea.vmem %s9095_s8, 1792  ;;  %p9097_p11 = scmp.lt.s32.totalorder %s235_s15, %s9095_s8 }
  0x56   : > { %p9092_p10 = pnand %p9090_p8, %p9078_p12  ;;  %p9098_p13 = scmp.lt.s32.totalorder %s9096_s9, %s9089_s28 }
  0x58   : > { %p9093_p1 = pneg %p9092_p10  ;;  %p9099_p9 = por %p9098_p13, %p9097_p11 }
  0x5a   : > { %p9100_p3 = pnand %p9099_p9, %p9093_p1 }
  0x5c   : > { %9103 = shalt.err (!%p9100_p3)
}
  0x5d   : > { %8889 = dma.hbm_to_vmem [thread:$0]  (!%p9288_p5), %s9295_s18, 896, %s235_s15, %s223_s16  }
  0x5e   : > { %p9738_p0 = scmp.ne.s32.totalorder %s9734_s25, 0 }
  0x5f   : > { %s245_s10 = sand.u32 (!%p9738_p0), 1, %s9138_s19   ;;  %p9739_p12 = scmp.ne.s32.totalorder (!%p9738_p0), %s9736_s7, 0 }
  0x60   : > { %243 = sbr.rel (%p9738_p0) target bundleno = 1547 (0x60b), region = 40  ;;  %s246_s13 = scalar_lea.sflag (!%p9738_p0), [#allocation3], %s245_s10 }
  0x61   : > { %s8854_s12 = smul.u32 (!%p9738_p0), 56, %s245_s10 }
  0x63   : > { %s9314_s14 = scalar_lea.vmem (!%p9738_p0), [#allocation2], %s8854_s12 }
  0x65   : > { %9121 = dma.done.wait (%p9739_p12), %s246_s13, 896  }
  0x66   : > { %9123 = vsyncadd (%p9739_p12), %s246_s13, 4294966400  ;;  %p9740_p1 = scmp.eq.s32.totalorder %s9207_s24, 0 }
  0x68   : > { %9125 = dma.done.wait (%p9740_p1), [#allocation5], 119296   ;;  %p9741_p3 = pmov %p9740_p1 }
  0x69   : > { %p9742_p9 = pmov %p9740_p1 }
  0x6a   : > { %9127 = vsyncadd (%p9741_p3), [#allocation5], 4294848000 }
  0x6b   : > { %9129 = dma.done.wait (%p9742_p9), [#allocation8], 640   ;;  %p9743_p5 = pmov %p9740_p1 }
  0x6c   : > { %v370_v0 = vld [vmem:[#allocation4 + $0x1c0] sm:$0xff]  ;;  %v301_v53 = vld [vmem:[%s9314_s14 + $0x8] sm:$0xff]  ;;  %vm2914_vm0 = vcmask 1040384   ;;  %vm2910_vm1 = vcmask 539648   ;;  %p291_p6 = scmp.lt.s32.totalorder %s9207_s24, 1 }
  0x6d   : > { %9131 = vsyncadd (%p9743_p5), [#allocation8], 4294966656  ;;  %v374_v1 = vld [vmem:[#allocation4 + $0x1e0] sm:$0xff]  ;;  %v9330_v58 = vpack.c.bf16 %v301_v53, %v301_v53 }
  0x6e   : > { %v498_v2 = vld [vmem:[#allocation4 + $0x5c0] sm:$0xff]  ;;  %v7962_v3 = vcombine.high %v370_v0, %v374_v1  ;;  %v7961_v5 = vcombine.low %v370_v0, %v374_v1  ;;  %s9749_s24 = smov (!%p291_p6, %s9207_s24), 1 }
  0x6f   : > { %v502_v4 = vld [vmem:[#allocation4 + $0x5e0] sm:$0xff]  ;;  %2971 = vmatprep.mubr.bf16.mxu0 %v9330_v58  ;;  %s7904_s25 = sshll.u32 %s9749_s24, 3 }
  0x70   : > { %v362_v6 = vld [vmem:[#allocation4 + $0x180] sm:$0xff]  ;;  %v8090_v8 = vcombine.high %v498_v2, %v502_v4  ;;  %v8089_v9 = vcombine.low %v498_v2, %v502_v4  ;;  %2939 = vmatprep.subr.bf16.mxu0 %v7962_v3  ;;  %s294_s18 = scalar_lea.vmem %s9730_s5, %s7904_s25 }
  0x71   : > { %v366_v7 = vld [vmem:[#allocation4 + $0x1a0] sm:$0xff]  ;;  %2940 = vmatpush1.bf16.msra.mxu0 %v7961_v5 }
  0x72   : > { %v7954_v10 = vcombine.high %v362_v6, %v366_v7  ;;  %v490_v11 = vld [vmem:[#allocation4 + $0x580] sm:$0xff]  ;;  %2980 = vmatprep.subr.bf16.mxu1 %v8090_v8  ;;  %v7953_v18 = vcombine.low %v362_v6, %v366_v7 }
  0x73   : > { %v494_v12 = vld [vmem:[#allocation4 + $0x5a0] sm:$0xff]  ;;  %2981 = vmatpush1.bf16.msra.mxu1 %v8089_v9 }
  0x74   : > { %v354_v13 = vld [vmem:[#allocation4 + $0x140] sm:$0xff]  ;;  %v8082_v14 = vcombine.high %v490_v11, %v494_v12  ;;  %2941 = vmatprep.subr.bf16.mxu0 %v7954_v10  ;;  %v8081_v19 = vcombine.low %v490_v11, %v494_v12 }
  0x75   : > { %v358_v15 = vld [vmem:[#allocation4 + $0x160] sm:$0xff]  ;;  %2942 = vmatpush1.bf16.msra.mxu0 %v7953_v18 }
  0x76   : > { %v482_v16 = vld [vmem:[#allocation4 + $0x540] sm:$0xff]  ;;  %v7946_v20 = vcombine.high %v354_v13, %v358_v15  ;;  %2982 = vmatprep.subr.bf16.mxu1 %v8082_v14  ;;  %v7945_v26 = vcombine.low %v354_v13, %v358_v15 }
  0x77   : > { %v486_v17 = vld [vmem:[#allocation4 + $0x560] sm:$0xff]  ;;  %2983 = vmatpush1.bf16.msra.mxu1 %v8081_v19 }
  0x78   : > { %v8074_v21 = vcombine.high %v482_v16, %v486_v17  ;;  %v346_v22 = vld [vmem:[#allocation4 + $0x100] sm:$0xff]  ;;  %2943 = vmatprep.subr.bf16.mxu0 %v7946_v20  ;;  %v8073_v27 = vcombine.low %v482_v16, %v486_v17 }
  0x79   : > { %v350_v23 = vld [vmem:[#allocation4 + $0x120] sm:$0xff]  ;;  %2944 = vmatpush1.bf16.msra.mxu0 %v7945_v26 }
  0x7a   : > { %v474_v24 = vld [vmem:[#allocation4 + $0x500] sm:$0xff]  ;;  %v7938_v28 = vcombine.high %v346_v22, %v350_v23  ;;  %2984 = vmatprep.subr.bf16.mxu1 %v8074_v21  ;;  %v7937_v34 = vcombine.low %v346_v22, %v350_v23 }
  0x7b   : > { %v478_v25 = vld [vmem:[#allocation4 + $0x520] sm:$0xff]  ;;  %2985 = vmatpush1.bf16.msra.mxu1 %v8073_v27 }
  0x7c   : > { %v8066_v29 = vcombine.high %v474_v24, %v478_v25  ;;  %v338_v30 = vld [vmem:[#allocation4 + $0xc0] sm:$0xff]  ;;  %2945 = vmatprep.subr.bf16.mxu0 %v7938_v28  ;;  %v8065_v35 = vcombine.low %v474_v24, %v478_v25 }
  0x7d   : > { %v342_v31 = vld [vmem:[#allocation4 + $0xe0] sm:$0xff]  ;;  %2946 = vmatpush1.bf16.msra.mxu0 %v7937_v34 }
  0x7e   : > { %v466_v32 = vld [vmem:[#allocation4 + $0x4c0] sm:$0xff]  ;;  %v7930_v36 = vcombine.high %v338_v30, %v342_v31  ;;  %2986 = vmatprep.subr.bf16.mxu1 %v8066_v29  ;;  %v7929_v42 = vcombine.low %v338_v30, %v342_v31 }
  0x7f   : > { %v470_v33 = vld [vmem:[#allocation4 + $0x4e0] sm:$0xff]  ;;  %2987 = vmatpush1.bf16.msra.mxu1 %v8065_v35 }
  0x80   : > { %v8058_v37 = vcombine.high %v466_v32, %v470_v33  ;;  %v330_v38 = vld [vmem:[#allocation4 + $0x80] sm:$0xff]  ;;  %2947 = vmatprep.subr.bf16.mxu0 %v7930_v36  ;;  %v8057_v43 = vcombine.low %v466_v32, %v470_v33 }
  0x81   : > { %v334_v39 = vld [vmem:[#allocation4 + $0xa0] sm:$0xff]  ;;  %2948 = vmatpush1.bf16.msra.mxu0 %v7929_v42 }
  0x82   : > { %v458_v40 = vld [vmem:[#allocation4 + $0x480] sm:$0xff]  ;;  %v7922_v44 = vcombine.high %v330_v38, %v334_v39  ;;  %2988 = vmatprep.subr.bf16.mxu1 %v8058_v37  ;;  %v7921_v50 = vcombine.low %v330_v38, %v334_v39 }
  0x83   : > { %v462_v41 = vld [vmem:[#allocation4 + $0x4a0] sm:$0xff]  ;;  %2989 = vmatpush1.bf16.msra.mxu1 %v8057_v43 }
  0x84   : > { %v8050_v45 = vcombine.high %v458_v40, %v462_v41  ;;  %v322_v46 = vld [vmem:[#allocation4 + $0x40] sm:$0xff]  ;;  %2949 = vmatprep.subr.bf16.mxu0 %v7922_v44  ;;  %v8049_v51 = vcombine.low %v458_v40, %v462_v41 }
  0x85   : > { %v326_v47 = vld [vmem:[#allocation4 + $0x60] sm:$0xff]  ;;  %2950 = vmatpush1.bf16.msra.mxu0 %v7921_v50 }
  0x86   : > { %v450_v48 = vld [vmem:[#allocation4 + $0x440] sm:$0xff]  ;;  %v7914_v52 = vcombine.high %v322_v46, %v326_v47  ;;  %2990 = vmatprep.subr.bf16.mxu1 %v8050_v45  ;;  %v7913_v62 = vcombine.low %v322_v46, %v326_v47 }
  0x87   : > { %v454_v49 = vld [vmem:[#allocation4 + $0x460] sm:$0xff]  ;;  %2991 = vmatpush1.bf16.msra.mxu1 %v8049_v51 }
  0x88   : > { %v303_v54 = vld [vmem:[%s9314_s14 + $0x18] sm:$0xff]  ;;  %v8042_v55 = vcombine.high %v450_v48, %v454_v49  ;;  %2951 = vmatprep.subr.bf16.mxu0 %v7914_v52  ;;  %v8041_v63 = vcombine.low %v450_v48, %v454_v49 }
  0x89   : > { %v314_v56 = vld [vmem:[#allocation4] sm:$0xff]  ;;  %v9332_v59 = vpack.c.bf16 %v303_v54, %v303_v54  ;;  %2952 = vmatpush1.bf16.msra.mxu0 %v7913_v62 }
  0x8a   : > { %v318_v57 = vld [vmem:[#allocation4 + $0x20] sm:$0xff]  ;;  %2992 = vmatprep.subr.bf16.mxu1 %v8042_v55 }
  0x8b   : > { %v442_v60 = vld [vmem:[#allocation4 + $0x400] sm:$0xff]  ;;  %v7906_v0 = vcombine.high %v314_v56, %v318_v57  ;;  %3012 = vmatprep.mubr.bf16.mxu1 %v9332_v59  ;;  %v7905_v6 = vcombine.low %v314_v56, %v318_v57  ;;  %2993 = vmatpush1.bf16.msra.mxu1 %v8041_v63 }
  0x8c   : > { %v446_v61 = vld [vmem:[#allocation4 + $0x420] sm:$0xff] }
  0x8d   : > { %v8034_v1 = vcombine.high %v442_v60, %v446_v61  ;;  %v434_v2 = vld [vmem:[#allocation4 + $0x3c0] sm:$0xff]  ;;  %2953 = vmatprep.subr.bf16.mxu0 %v7906_v0  ;;  %v8033_v7 = vcombine.low %v442_v60, %v446_v61 }
  0x8e   : > { %v438_v3 = vld [vmem:[#allocation4 + $0x3e0] sm:$0xff]  ;;  %2954 = vmatpush1.bf16.msra.mxu0 %v7905_v6 }
  0x8f   : > { %v562_v4 = vld [vmem:[#allocation4 + $0x7c0] sm:$0xff]  ;;  %v8026_v8 = vcombine.high %v434_v2, %v438_v3  ;;  %2994 = vmatprep.subr.bf16.mxu1 %v8034_v1  ;;  %v8025_v14 = vcombine.low %v434_v2, %v438_v3 }
  0x90   : > { %v566_v5 = vld [vmem:[#allocation4 + $0x7e0] sm:$0xff]  ;;  %2995 = vmatpush1.bf16.msra.mxu1 %v8033_v7 }
  0x91   : > { %v8154_v9 = vcombine.high %v562_v4, %v566_v5  ;;  %v426_v10 = vld [vmem:[#allocation4 + $0x380] sm:$0xff]  ;;  %2955 = vmatprep.subr.bf16.mxu0 %v8026_v8  ;;  %v8153_v15 = vcombine.low %v562_v4, %v566_v5  ;;  %v300_v8 = vld [vmem:[%s9314_s14] sm:$0xff] }
  0x92   : > { %v430_v11 = vld [vmem:[#allocation4 + $0x3a0] sm:$0xff]  ;;  %2956 = vmatpush2.bf16.msra.mxu0 %v8025_v14 }
  0x93   : > { %v554_v12 = vld [vmem:[#allocation4 + $0x780] sm:$0xff]  ;;  %v8018_v16 = vcombine.high %v426_v10, %v430_v11  ;;  %2996 = vmatprep.subr.bf16.mxu1 %v8154_v9  ;;  %v8017_v22 = vcombine.low %v426_v10, %v430_v11 }
  0x94   : > { %v558_v13 = vld [vmem:[#allocation4 + $0x7a0] sm:$0xff]  ;;  %2997 = vmatpush2.bf16.msra.mxu1 %v8153_v15 }
  0x95   : > { %v8146_v17 = vcombine.high %v554_v12, %v558_v13  ;;  %v418_v18 = vld [vmem:[#allocation4 + $0x340] sm:$0xff]  ;;  %2957 = vmatprep.subr.bf16.mxu0 %v8018_v16  ;;  %v8145_v23 = vcombine.low %v554_v12, %v558_v13  ;;  %v9338_v16 = vpack.c.bf16 %v300_v8, %v300_v8 }
  0x96   : > { %v422_v19 = vld [vmem:[#allocation4 + $0x360] sm:$0xff]  ;;  %2958 = vmatpush2.bf16.msra.mxu0 %v8017_v22 }
  0x97   : > { %v546_v20 = vld [vmem:[#allocation4 + $0x740] sm:$0xff]  ;;  %v8010_v24 = vcombine.high %v418_v18, %v422_v19  ;;  %2998 = vmatprep.subr.bf16.mxu1 %v8146_v17  ;;  %v8009_v30 = vcombine.low %v418_v18, %v422_v19 }
  0x98   : > { %v550_v21 = vld [vmem:[#allocation4 + $0x760] sm:$0xff]  ;;  %2999 = vmatpush2.bf16.msra.mxu1 %v8145_v23 }
  0x99   : > { %v8138_v25 = vcombine.high %v546_v20, %v550_v21  ;;  %v410_v26 = vld [vmem:[#allocation4 + $0x300] sm:$0xff]  ;;  %2959 = vmatprep.subr.bf16.mxu0 %v8010_v24  ;;  %v8137_v31 = vcombine.low %v546_v20, %v550_v21  ;;  %v305_v21 = vld [vmem:[%s9314_s14 + $0x28] sm:$0xff] }
  0x9a   : > { %v414_v27 = vld [vmem:[#allocation4 + $0x320] sm:$0xff]  ;;  %2960 = vmatpush2.bf16.msra.mxu0 %v8009_v30 }
  0x9b   : > { %v538_v28 = vld [vmem:[#allocation4 + $0x700] sm:$0xff]  ;;  %v8002_v32 = vcombine.high %v410_v26, %v414_v27  ;;  %3000 = vmatprep.subr.bf16.mxu1 %v8138_v25  ;;  %v8001_v38 = vcombine.low %v410_v26, %v414_v27 }
  0x9c   : > { %v542_v29 = vld [vmem:[#allocation4 + $0x720] sm:$0xff]  ;;  %3001 = vmatpush2.bf16.msra.mxu1 %v8137_v31 }
  0x9d   : > { %v8130_v33 = vcombine.high %v538_v28, %v542_v29  ;;  %v402_v34 = vld [vmem:[#allocation4 + $0x2c0] sm:$0xff]  ;;  %2961 = vmatprep.subr.bf16.mxu0 %v8002_v32  ;;  %v8129_v39 = vcombine.low %v538_v28, %v542_v29  ;;  %v9346_v29 = vpack.c.bf16 %v305_v21, %v305_v21 }
  0x9e   : > { %v406_v35 = vld [vmem:[#allocation4 + $0x2e0] sm:$0xff]  ;;  %2962 = vmatpush2.bf16.msra.mxu0 %v8001_v38 }
  0x9f   : > { %v530_v36 = vld [vmem:[#allocation4 + $0x6c0] sm:$0xff]  ;;  %v7994_v40 = vcombine.high %v402_v34, %v406_v35  ;;  %3002 = vmatprep.subr.bf16.mxu1 %v8130_v33  ;;  %v7993_v46 = vcombine.low %v402_v34, %v406_v35 }
  0xa0   : > { %v534_v37 = vld [vmem:[#allocation4 + $0x6e0] sm:$0xff]  ;;  %3003 = vmatpush2.bf16.msra.mxu1 %v8129_v39 }
  0xa1   : > { %v8122_v41 = vcombine.high %v530_v36, %v534_v37  ;;  %v394_v42 = vld [vmem:[#allocation4 + $0x280] sm:$0xff]  ;;  %2963 = vmatprep.subr.bf16.mxu0 %v7994_v40  ;;  %v8121_v47 = vcombine.low %v530_v36, %v534_v37  ;;  %v9155_v36 = vmov 0  }
  0xa2   : > { %v398_v43 = vld [vmem:[#allocation4 + $0x2a0] sm:$0xff]  ;;  %2964 = vmatpush2.bf16.msra.mxu0 %v7993_v46 }
  0xa3   : > { %v522_v44 = vld [vmem:[#allocation4 + $0x680] sm:$0xff]  ;;  %v7986_v48 = vcombine.high %v394_v42, %v398_v43  ;;  %3004 = vmatprep.subr.bf16.mxu1 %v8122_v41  ;;  %v7985_v54 = vcombine.low %v394_v42, %v398_v43 }
  0xa4   : > { %v526_v45 = vld [vmem:[#allocation4 + $0x6a0] sm:$0xff]  ;;  %3005 = vmatpush2.bf16.msra.mxu1 %v8121_v47 }
  0xa5   : > { %v8114_v49 = vcombine.high %v522_v44, %v526_v45  ;;  %v386_v50 = vld [vmem:[#allocation4 + $0x240] sm:$0xff]  ;;  %2965 = vmatprep.subr.bf16.mxu0 %v7986_v48  ;;  %v8113_v55 = vcombine.low %v522_v44, %v526_v45 }
  0xa6   : > { %v390_v51 = vld [vmem:[#allocation4 + $0x260] sm:$0xff]  ;;  %2966 = vmatpush2.bf16.msra.mxu0 %v7985_v54  ;;  %v375_v54 = vld [vmem:[#allocation4 + $0x1e8] sm:$0xff] }
  0xa7   : > { %v514_v52 = vld [vmem:[#allocation4 + $0x640] sm:$0xff]  ;;  %v7978_v56 = vcombine.high %v386_v50, %v390_v51  ;;  %3006 = vmatprep.subr.bf16.mxu1 %v8114_v49  ;;  %v7977_v0 = vcombine.low %v386_v50, %v390_v51 }
  0xa8   : > { %v518_v53 = vld [vmem:[#allocation4 + $0x660] sm:$0xff]  ;;  %3007 = vmatpush2.bf16.msra.mxu1 %v8113_v55 }
  0xa9   : > { %v8106_v57 = vcombine.high %v514_v52, %v518_v53  ;;  %v378_v60 = vld [vmem:[#allocation4 + $0x200] sm:$0xff]  ;;  %2967 = vmatprep.subr.bf16.mxu0 %v7978_v56  ;;  %v8105_v1 = vcombine.low %v514_v52, %v518_v53  ;;  %v371_v53 = vld [vmem:[#allocation4 + $0x1c8] sm:$0xff] }
  0xaa   : > { %v382_v61 = vld [vmem:[#allocation4 + $0x220] sm:$0xff]  ;;  %2968 = vmatpush2.bf16.msra.mxu0 %v7977_v0  ;;  %v363_v0 = vld [vmem:[#allocation4 + $0x188] sm:$0xff] }
  0xab   : > { %v506_v62 = vld [vmem:[#allocation4 + $0x600] sm:$0xff]  ;;  %v7970_v2 = vcombine.high %v378_v60, %v382_v61  ;;  %3008 = vmatprep.subr.bf16.mxu1 %v8106_v57  ;;  %v7969_v7 = vcombine.low %v378_v60, %v382_v61  ;;  %v7964_v61 = vcombine.high %v371_v53, %v375_v54 }
  0xac   : > { %v510_v63 = vld [vmem:[#allocation4 + $0x620] sm:$0xff]  ;;  %3009 = vmatpush2.bf16.msra.mxu1 %v8105_v1  ;;  %v367_v1 = vld [vmem:[#allocation4 + $0x1a8] sm:$0xff] }
  0xad   : > { %v8098_v3 = vcombine.high %v506_v62, %v510_v63  ;;  %v626_v4 = vld [vmem:[#allocation4 + $0x9c0] sm:$0xff]  ;;  %2969 = vmatprep.subr.bf16.mxu0 %v7970_v2  ;;  %v8097_v9 = vcombine.low %v506_v62, %v510_v63 }
  0xae   : > { %v630_v5 = vld [vmem:[#allocation4 + $0x9e0] sm:$0xff]  ;;  %2970 = vmatpush2.bf16.msra.mxu0 %v7969_v7 }
  0xaf   : > { %v730_v6 = vld [vmem:[#allocation4 + $0xd00] sm:$0x11]  ;;  %v8218_v11 = vcombine.high %v626_v4, %v630_v5  ;;  %3010 = vmatprep.subr.bf16.mxu1 %v8098_v3  ;;  %v8217_v20 = vcombine.low %v626_v4, %v630_v5  ;;  %v7963_v4 = vcombine.low %v371_v53, %v375_v54  ;;  %v315_v53 = vld [vmem:[#allocation4 + $0x8] sm:$0xff] }
  0xb0   : > { %v302_v10 = vld [vmem:[%s9314_s14 + $0x10] sm:$0xff]  ;;  %v8322_v12 = vcombine.high %v730_v6, %v730_v6  ;;  %v8321_v13 = vcombine.low %v730_v6, %v730_v6  ;;  %3011 = vmatpush2.bf16.msra.mxu1 %v8097_v9  ;;  %v7956_v6 = vcombine.high %v363_v0, %v367_v1  ;;  %v355_v9 = vld [vmem:[#allocation4 + $0x148] sm:$0xff] }
  0xb1   : > { %v618_v14 = vld [vmem:[#allocation4 + $0x980] sm:$0xff]  ;;  %v9340_v19 = vpack.c.bf16 %v302_v10, %v302_v10  ;;  %3021 = vmatprep.subr.bf16.mxu0 %v8218_v11  ;;  %2972 = vmatmul.mubr.bf16.vlgmr.msra.gmra.mxu0 %v9338_v16  ;;  %v359_v10 = vld [vmem:[#allocation4 + $0x168] sm:$0xff] }
  0xb2   : > { %v622_v15 = vld [vmem:[#allocation4 + $0x9a0] sm:$0xff]  ;;  %8329 = vmatprep.subr.msk.bf16.mxu1 %vm2914_vm0, %v8322_v12  ;;  %v2916_v23 = vsel %vm2914_vm0, %v8321_v13, 0  ;;  %3022 = vmatpush1.bf16.msra.mxu0 %v8217_v20  ;;  %v7955_v12 = vcombine.low %v363_v0, %v367_v1  ;;  %v351_v20 = vld [vmem:[#allocation4 + $0x128] sm:$0xff] }
  0xb3   : > { %v722_v17 = vld [vmem:[#allocation4 + $0xcc0] sm:$0xff]  ;;  %v8210_v22 = vcombine.high %v618_v14, %v622_v15  ;;  %3013 = vmatmul.mubr.bf16.vlgmr.msra.gmra.mxu1 %v9340_v19  ;;  %v8209_v30 = vcombine.low %v618_v14, %v622_v15  ;;  %3053 = vmatprep.mubr.bf16.mxu0 %v9346_v29  ;;  %v7948_v14 = vcombine.high %v355_v9, %v359_v10  ;;  %v319_v54 = vld [vmem:[#allocation4 + $0x28] sm:$0xff] }
  0xb4   : > { %v726_v18 = vld [vmem:[#allocation4 + $0xce0] sm:$0xff]  ;;  %3069 = vmatpush1.bf16.msra.mxu1 %v2916_v23  ;;  %3094 = vmatprep.mubr.bf16.mxu1 %v9155_v36  ;;  %v439_v0 = vld [vmem:[#allocation4 + $0x3e8] sm:$0xff] }
  0xb5   : > { %v8314_v24 = vcombine.high %v722_v17, %v726_v18  ;;  %v610_v25 = vld [vmem:[#allocation4 + $0x940] sm:$0xff]  ;;  %3023 = vmatprep.subr.bf16.mxu0 %v8210_v22  ;;  %v8313_v31 = vcombine.low %v722_v17, %v726_v18  ;;  %v347_v18 = vld [vmem:[#allocation4 + $0x108] sm:$0xff]  ;;  %v7947_v22 = vcombine.low %v355_v9, %v359_v10 }
  0xb6   : > { %v614_v26 = vld [vmem:[#allocation4 + $0x960] sm:$0xff]  ;;  %3024 = vmatpush1.bf16.msra.mxu0 %v8209_v30  ;;  %v431_v9 = vld [vmem:[#allocation4 + $0x3a8] sm:$0xff] }
  0xb7   : > { %v714_v27 = vld [vmem:[#allocation4 + $0xc80] sm:$0xff]  ;;  %v8202_v32 = vcombine.high %v610_v25, %v614_v26  ;;  %3070 = vmatprep.subr.bf16.mxu1 %v8314_v24  ;;  %v8201_v39 = vcombine.low %v610_v25, %v614_v26  ;;  %v7940_v24 = vcombine.high %v347_v18, %v351_v20 }
  0xb8   : > { %v718_v28 = vld [vmem:[#allocation4 + $0xca0] sm:$0xff]  ;;  %3071 = vmatpush1.bf16.msra.mxu1 %v8313_v31  ;;  %v7939_v31 = vcombine.low %v347_v18, %v351_v20  ;;  %v423_v18 = vld [vmem:[#allocation4 + $0x368] sm:$0xff] }
  0xb9   : > { %v8306_v33 = vcombine.high %v714_v27, %v718_v28  ;;  %v602_v34 = vld [vmem:[#allocation4 + $0x900] sm:$0xff]  ;;  %3025 = vmatprep.subr.bf16.mxu0 %v8202_v32  ;;  %v8305_v40 = vcombine.low %v714_v27, %v718_v28  ;;  %v339_v27 = vld [vmem:[#allocation4 + $0xc8] sm:$0xff] }
  0xba   : > { %v606_v35 = vld [vmem:[#allocation4 + $0x920] sm:$0xff]  ;;  %3026 = vmatpush1.bf16.msra.mxu0 %v8201_v39  ;;  %v343_v28 = vld [vmem:[#allocation4 + $0xe8] sm:$0xff] }
  0xbb   : > { %v706_v37 = vld [vmem:[#allocation4 + $0xc40] sm:$0xff]  ;;  %v8194_v41 = vcombine.high %v602_v34, %v606_v35  ;;  %3072 = vmatprep.subr.bf16.mxu1 %v8306_v33  ;;  %v8193_v47 = vcombine.low %v602_v34, %v606_v35  ;;  %v7932_v33 = vcombine.high %v339_v27, %v343_v28 }
  0xbc   : > { %v710_v38 = vld [vmem:[#allocation4 + $0xc60] sm:$0xff]  ;;  %3073 = vmatpush1.bf16.msra.mxu1 %v8305_v40  ;;  %v7931_v40 = vcombine.low %v339_v27, %v343_v28  ;;  %v415_v27 = vld [vmem:[#allocation4 + $0x328] sm:$0xff] }
  0xbd   : > { %v8298_v42 = vcombine.high %v706_v37, %v710_v38  ;;  %v594_v43 = vld [vmem:[#allocation4 + $0x8c0] sm:$0xff]  ;;  %3027 = vmatprep.subr.bf16.mxu0 %v8194_v41  ;;  %v8297_v48 = vcombine.low %v706_v37, %v710_v38  ;;  %v331_v37 = vld [vmem:[#allocation4 + $0x88] sm:$0xff] }
  0xbe   : > { %v598_v44 = vld [vmem:[#allocation4 + $0x8e0] sm:$0xff]  ;;  %3028 = vmatpush1.bf16.msra.mxu0 %v8193_v47  ;;  %v335_v38 = vld [vmem:[#allocation4 + $0xa8] sm:$0xff] }
  0xbf   : > { %v698_v45 = vld [vmem:[#allocation4 + $0xc00] sm:$0xff]  ;;  %v8186_v49 = vcombine.high %v594_v43, %v598_v44  ;;  %3074 = vmatprep.subr.bf16.mxu1 %v8298_v42  ;;  %v8185_v55 = vcombine.low %v594_v43, %v598_v44  ;;  %v7924_v42 = vcombine.high %v331_v37, %v335_v38 }
  0xc0   : > { %v702_v46 = vld [vmem:[#allocation4 + $0xc20] sm:$0xff]  ;;  %3075 = vmatpush1.bf16.msra.mxu1 %v8297_v48  ;;  %v7923_v48 = vcombine.low %v331_v37, %v335_v38  ;;  %v403_v38 = vld [vmem:[#allocation4 + $0x2c8] sm:$0xff] }
  0xc1   : > { %v8290_v50 = vcombine.high %v698_v45, %v702_v46  ;;  %v586_v51 = vld [vmem:[#allocation4 + $0x880] sm:$0xff]  ;;  %3029 = vmatprep.subr.bf16.mxu0 %v8186_v49  ;;  %v8289_v56 = vcombine.low %v698_v45, %v702_v46  ;;  %v323_v45 = vld [vmem:[#allocation4 + $0x48] sm:$0xff] }
  0xc2   : > { %v590_v52 = vld [vmem:[#allocation4 + $0x8a0] sm:$0xff]  ;;  %3030 = vmatpush1.bf16.msra.mxu0 %v8185_v55  ;;  %v327_v46 = vld [vmem:[#allocation4 + $0x68] sm:$0xff] }
  0xc3   : > { %v8178_v57 = vcombine.high %v586_v51, %v590_v52  ;;  %v306_v60 = vld [vmem:[%s9314_s14 + $0x30] sm:$0xff]  ;;  %3076 = vmatprep.subr.bf16.mxu1 %v8290_v50  ;;  %v8177_v2 = vcombine.low %v586_v51, %v590_v52  ;;  %v7916_v50 = vcombine.high %v323_v45, %v327_v46 }
  0xc4   : > { %v578_v62 = vld [vmem:[#allocation4 + $0x840] sm:$0xff]  ;;  %v9352_v3 = vpack.c.bf16 %v306_v60, %v306_v60  ;;  %3077 = vmatpush1.bf16.msra.mxu1 %v8289_v56  ;;  %v7915_v56 = vcombine.low %v323_v45, %v327_v46  ;;  %v7908_v60 = vcombine.high %v315_v53, %v319_v54  ;;  %v487_v45 = vld [vmem:[#allocation4 + $0x568] sm:$0xff] }
  0xc5   : > { %v582_v63 = vld [vmem:[#allocation4 + $0x860] sm:$0xff]  ;;  %3031 = vmatprep.subr.bf16.mxu0 %v8178_v57  ;;  %3103 = vmatprep.subr.bf16.mxu1 %v7964_v61  ;;  %v395_v46 = vld [vmem:[#allocation4 + $0x288] sm:$0xff] }
  0xc6   : > { %v8170_v5 = vcombine.high %v578_v62, %v582_v63  ;;  %v570_v7 = vld [vmem:[#allocation4 + $0x800] sm:$0xff]  ;;  %3032 = vmatpush1.bf16.msra.mxu0 %v8177_v2  ;;  %v8169_v11 = vcombine.low %v578_v62, %v582_v63  ;;  %v435_v63 = vld [vmem:[#allocation4 + $0x3c8] sm:$0xff]  ;;  %v7907_v2 = vcombine.low %v315_v53, %v319_v54 }
  0xc7   : > { %v574_v8 = vld [vmem:[#allocation4 + $0x820] sm:$0xff]  ;;  %8330 = vmatmul.mubr.msk.bf16.vlgmr.msra.gmra.mxu1 %vm2910_vm1, %v9352_v3  ;;  %v479_v53 = vld [vmem:[#allocation4 + $0x528] sm:$0xff] }
  0xc8   : > { %3104 = vmatpush1.bf16.msra.mxu1 %v7963_v4  ;;  %3033 = vmatprep.subr.bf16.mxu0 %v8170_v5  ;;  %v8162_v13 = vcombine.high %v570_v7, %v574_v8  ;;  %v690_v15 = vld [vmem:[#allocation4 + $0xbc0] sm:$0xff]  ;;  %v8161_v21 = vcombine.low %v570_v7, %v574_v8  ;;  %v8028_v5 = vcombine.high %v435_v63, %v439_v0  ;;  %v427_v8 = vld [vmem:[#allocation4 + $0x388] sm:$0xff] }
  0xc9   : > { %3105 = vmatprep.subr.bf16.mxu1 %v7956_v6  ;;  %v694_v17 = vld [vmem:[#allocation4 + $0xbe0] sm:$0xff]  ;;  %3135 = vmatprep.mubr.bf16.mxu1 %v9330_v58  ;;  %v387_v54 = vld [vmem:[#allocation4 + $0x248] sm:$0xff] }
  0xca   : > { %3034 = vmatpush1.bf16.msra.mxu0 %v8169_v11  ;;  %v8282_v23 = vcombine.high %v690_v15, %v694_v17  ;;  %v682_v25 = vld [vmem:[#allocation4 + $0xb80] sm:$0xff]  ;;  %v8281_v30 = vcombine.low %v690_v15, %v694_v17  ;;  %v8027_v11 = vcombine.low %v435_v63, %v439_v0  ;;  %v419_v17 = vld [vmem:[#allocation4 + $0x348] sm:$0xff] }
  0xcb   : > { %3035 = vmatprep.subr.bf16.mxu0 %v8162_v13  ;;  %v686_v26 = vld [vmem:[#allocation4 + $0xba0] sm:$0xff]  ;;  %v8020_v13 = vcombine.high %v427_v8, %v431_v9  ;;  %v471_v63 = vld [vmem:[#allocation4 + $0x4e8] sm:$0xff] }
  0xcc   : > { %3106 = vmatpush1.bf16.msra.mxu1 %v7955_v12  ;;  %v8274_v32 = vcombine.high %v682_v25, %v686_v26  ;;  %v674_v34 = vld [vmem:[#allocation4 + $0xb40] sm:$0xff]  ;;  %v8273_v39 = vcombine.low %v682_v25, %v686_v26  ;;  %v503_v25 = vld [vmem:[#allocation4 + $0x5e8] sm:$0xff] }
  0xcd   : > { %3107 = vmatprep.subr.bf16.mxu1 %v7948_v14  ;;  %v678_v35 = vld [vmem:[#allocation4 + $0xb60] sm:$0xff]  ;;  %v411_v26 = vld [vmem:[#allocation4 + $0x308] sm:$0xff] }
  0xce   : > { %3036 = vmatpush1.bf16.msra.mxu0 %v8161_v21  ;;  %v8266_v41 = vcombine.high %v674_v34, %v678_v35  ;;  %v666_v43 = vld [vmem:[#allocation4 + $0xb00] sm:$0xff]  ;;  %v8265_v47 = vcombine.low %v674_v34, %v678_v35  ;;  %v8019_v21 = vcombine.low %v427_v8, %v431_v9  ;;  %v491_v34 = vld [vmem:[#allocation4 + $0x588] sm:$0xff] }
  0xcf   : > { %3037 = vmatprep.subr.bf16.mxu0 %v8282_v23  ;;  %v670_v44 = vld [vmem:[#allocation4 + $0xb20] sm:$0xff]  ;;  %v8012_v23 = vcombine.high %v419_v17, %v423_v18  ;;  %v495_v35 = vld [vmem:[#allocation4 + $0x5a8] sm:$0xff] }
  0xd0   : > { %3108 = vmatpush1.bf16.msra.mxu1 %v7947_v22  ;;  %v8258_v49 = vcombine.high %v666_v43, %v670_v44  ;;  %v658_v51 = vld [vmem:[#allocation4 + $0xac0] sm:$0xff]  ;;  %v8257_v55 = vcombine.low %v666_v43, %v670_v44  ;;  %v483_v44 = vld [vmem:[#allocation4 + $0x548] sm:$0xff] }
  0xd1   : > { %3109 = vmatprep.subr.bf16.mxu1 %v7940_v24  ;;  %v662_v52 = vld [vmem:[#allocation4 + $0xae0] sm:$0xff]  ;;  %v499_v24 = vld [vmem:[#allocation4 + $0x5c8] sm:$0xff] }
  0xd2   : > { %3038 = vmatpush2.bf16.msra.mxu0 %v8281_v30  ;;  %v8250_v57 = vcombine.high %v658_v51, %v662_v52  ;;  %v650_v61 = vld [vmem:[#allocation4 + $0xa80] sm:$0xff]  ;;  %v8249_v1 = vcombine.low %v658_v51, %v662_v52  ;;  %v304_v30 = vld [vmem:[%s9314_s14 + $0x20] sm:$0xff] }
  0xd3   : > { %3039 = vmatprep.subr.bf16.mxu0 %v8274_v32  ;;  %v654_v62 = vld [vmem:[#allocation4 + $0xaa0] sm:$0xff]  ;;  %v8092_v32 = vcombine.high %v499_v24, %v503_v25  ;;  %v9358_v37 = vpack.c.bf16 %v304_v30, %v304_v30  ;;  %v475_v52 = vld [vmem:[#allocation4 + $0x508] sm:$0xff] }
  0xd4   : > { %3110 = vmatpush1.bf16.msra.mxu1 %v7939_v31  ;;  %v8242_v4 = vcombine.high %v650_v61, %v654_v62  ;;  %v642_v6 = vld [vmem:[#allocation4 + $0xa40] sm:$0xff]  ;;  %v8241_v10 = vcombine.low %v650_v61, %v654_v62  ;;  %v8011_v31 = vcombine.low %v419_v17, %v423_v18  ;;  %v467_v62 = vld [vmem:[#allocation4 + $0x4c8] sm:$0xff] }
  0xd5   : > { %3111 = vmatprep.subr.bf16.mxu1 %v7932_v33  ;;  %v646_v7 = vld [vmem:[#allocation4 + $0xa60] sm:$0xff]  ;;  %v8004_v33 = vcombine.high %v411_v26, %v415_v27  ;;  %v379_v0 = vld [vmem:[#allocation4 + $0x208] sm:$0xff] }
  0xd6   : > { %3040 = vmatpush2.bf16.msra.mxu0 %v8273_v39  ;;  %v8234_v12 = vcombine.high %v642_v6, %v646_v7  ;;  %v634_v14 = vld [vmem:[#allocation4 + $0xa00] sm:$0xff]  ;;  %v8233_v20 = vcombine.low %v642_v6, %v646_v7  ;;  %v407_v39 = vld [vmem:[#allocation4 + $0x2e8] sm:$0xff] }
  0xd7   : > { %3041 = vmatprep.subr.bf16.mxu0 %v8266_v41  ;;  %v638_v15 = vld [vmem:[#allocation4 + $0xa20] sm:$0xff]  ;;  %v8003_v41 = vcombine.low %v411_v26, %v415_v27  ;;  %v7996_v43 = vcombine.high %v403_v38, %v407_v39  ;;  %v459_v7 = vld [vmem:[#allocation4 + $0x488] sm:$0xff] }
  0xd8   : > { %3112 = vmatpush1.bf16.msra.mxu1 %v7931_v40  ;;  %v8226_v22 = vcombine.high %v634_v14, %v638_v15  ;;  %v8225_v28 = vcombine.low %v634_v14, %v638_v15  ;;  %v8091_v40 = vcombine.low %v499_v24, %v503_v25  ;;  %v463_v8 = vld [vmem:[#allocation4 + $0x4a8] sm:$0xff] }
  0xd9   : > { %3113 = vmatprep.subr.bf16.mxu1 %v7924_v42  ;;  %v8084_v42 = vcombine.high %v491_v34, %v495_v35  ;;  %v627_v9 = vld [vmem:[#allocation4 + $0x9c8] sm:$0xff] }
  0xda   : > { %3042 = vmatpush2.bf16.msra.mxu0 %v8265_v47  ;;  %v399_v47 = vld [vmem:[#allocation4 + $0x2a8] sm:$0xff] }
  0xdb   : > { %3043 = vmatprep.subr.bf16.mxu0 %v8258_v49  ;;  %v7995_v49 = vcombine.low %v403_v38, %v407_v39  ;;  %v7988_v51 = vcombine.high %v395_v46, %v399_v47  ;;  %v451_v15 = vld [vmem:[#allocation4 + $0x448] sm:$0xff] }
  0xdc   : > { %3114 = vmatpush1.bf16.msra.mxu1 %v7923_v48  ;;  %v8083_v48 = vcombine.low %v491_v34, %v495_v35  ;;  %v455_v17 = vld [vmem:[#allocation4 + $0x468] sm:$0xff] }
  0xdd   : > { %3115 = vmatprep.subr.bf16.mxu1 %v7916_v50  ;;  %v8076_v50 = vcombine.high %v483_v44, %v487_v45  ;;  %v619_v18 = vld [vmem:[#allocation4 + $0x988] sm:$0xff]  ;;  %v8043_v30 = vcombine.low %v451_v15, %v455_v17 }
  0xde   : > { %3044 = vmatpush2.bf16.msra.mxu0 %v8257_v55  ;;  %v391_v55 = vld [vmem:[#allocation4 + $0x268] sm:$0xff] }
  0xdf   : > { %3045 = vmatprep.subr.bf16.mxu0 %v8250_v57  ;;  %v7987_v57 = vcombine.low %v395_v46, %v399_v47  ;;  %v7980_v61 = vcombine.high %v387_v54, %v391_v55  ;;  %v443_v25 = vld [vmem:[#allocation4 + $0x408] sm:$0xff] }
  0xe0   : > { %3116 = vmatpush1.bf16.msra.mxu1 %v7915_v56  ;;  %v8075_v56 = vcombine.low %v483_v44, %v487_v45  ;;  %v447_v26 = vld [vmem:[#allocation4 + $0x428] sm:$0xff] }
  0xe1   : > { %3117 = vmatprep.subr.bf16.mxu1 %v7908_v60  ;;  %v8068_v60 = vcombine.high %v475_v52, %v479_v53  ;;  %v611_v27 = vld [vmem:[#allocation4 + $0x948] sm:$0xff] }
  0xe2   : > { %3046 = vmatpush2.bf16.msra.mxu0 %v8249_v1  ;;  %v383_v1 = vld [vmem:[#allocation4 + $0x228] sm:$0xff] }
  0xe3   : > { %3047 = vmatprep.subr.bf16.mxu0 %v8242_v4  ;;  %v7979_v4 = vcombine.low %v387_v54, %v391_v55  ;;  %v7972_v6 = vcombine.high %v379_v0, %v383_v1  ;;  %v563_v34 = vld [vmem:[#allocation4 + $0x7c8] sm:$0xff] }
  0xe4   : > { %3118 = vmatpush1.bf16.msra.mxu1 %v7907_v2  ;;  %v8067_v2 = vcombine.low %v475_v52, %v479_v53  ;;  %v567_v35 = vld [vmem:[#allocation4 + $0x7e8] sm:$0xff] }
  0xe5   : > { %3119 = vmatprep.subr.bf16.mxu1 %v8028_v5  ;;  %v8060_v5 = vcombine.high %v467_v62, %v471_v63  ;;  %v603_v38 = vld [vmem:[#allocation4 + $0x908] sm:$0xff] }
  0xe6   : > { %3048 = vmatpush2.bf16.msra.mxu0 %v8241_v10  ;;  %v631_v10 = vld [vmem:[#allocation4 + $0x9e8] sm:$0xff] }
  0xe7   : > { %3049 = vmatprep.subr.bf16.mxu0 %v8234_v12  ;;  %v7971_v12 = vcombine.low %v379_v0, %v383_v1  ;;  %v8220_v14 = vcombine.high %v627_v9, %v631_v10  ;;  %v607_v39 = vld [vmem:[#allocation4 + $0x928] sm:$0xff] }
  0xe8   : > { %3120 = vmatpush2.bf16.msra.mxu1 %v8027_v11  ;;  %v8059_v11 = vcombine.low %v467_v62, %v471_v63  ;;  %v555_v44 = vld [vmem:[#allocation4 + $0x788] sm:$0xff] }
  0xe9   : > { %3121 = vmatprep.subr.bf16.mxu1 %v8020_v13  ;;  %v8052_v13 = vcombine.high %v459_v7, %v463_v8  ;;  %v559_v45 = vld [vmem:[#allocation4 + $0x7a8] sm:$0xff] }
  0xea   : > { %3050 = vmatpush2.bf16.msra.mxu0 %v8233_v20  ;;  %v623_v20 = vld [vmem:[#allocation4 + $0x9a8] sm:$0xff] }
  0xeb   : > { %3051 = vmatprep.subr.bf16.mxu0 %v8226_v22  ;;  %v8219_v22 = vcombine.low %v627_v9, %v631_v10  ;;  %v8212_v24 = vcombine.high %v619_v18, %v623_v20  ;;  %v595_v46 = vld [vmem:[#allocation4 + $0x8c8] sm:$0xff] }
  0xec   : > { %3122 = vmatpush2.bf16.msra.mxu1 %v8019_v21  ;;  %v8051_v21 = vcombine.low %v459_v7, %v463_v8  ;;  %v599_v47 = vld [vmem:[#allocation4 + $0x8e8] sm:$0xff] }
  0xed   : > { %3123 = vmatprep.subr.bf16.mxu1 %v8012_v23  ;;  %v8044_v23 = vcombine.high %v451_v15, %v455_v17  ;;  %v547_v52 = vld [vmem:[#allocation4 + $0x748] sm:$0xff] }
  0xee   : > { %3052 = vmatpush2.bf16.msra.mxu0 %v8225_v28  ;;  %v615_v28 = vld [vmem:[#allocation4 + $0x968] sm:$0xff] }
  0xef   : > { %3144 = vmatprep.subr.bf16.mxu0 %v8092_v32  ;;  %v8036_v32 = vcombine.high %v443_v25, %v447_v26  ;;  %v551_v53 = vld [vmem:[#allocation4 + $0x768] sm:$0xff] }
  0xf0   : > { %3124 = vmatpush2.bf16.msra.mxu1 %v8011_v31  ;;  %v8211_v31 = vcombine.low %v619_v18, %v623_v20  ;;  %v587_v54 = vld [vmem:[#allocation4 + $0x888] sm:$0xff] }
  0xf1   : > { %3125 = vmatprep.subr.bf16.mxu1 %v8004_v33  ;;  %3054 = vmatmul.mubr.bf16.vlgmr.msra.gmra.mxu0 %v9358_v37  ;;  %v8204_v33 = vcombine.high %v611_v27, %v615_v28  ;;  %v591_v55 = vld [vmem:[#allocation4 + $0x8a8] sm:$0xff] }
  0xf2   : > { %3145 = vmatpush1.bf16.msra.mxu0 %v8091_v40  ;;  %3176 = vmatprep.mubr.bf16.mxu0 %v9332_v59  ;;  %v8035_v40 = vcombine.low %v443_v25, %v447_v26  ;;  %v539_v62 = vld [vmem:[#allocation4 + $0x708] sm:$0xff] }
  0xf3   : > { %3146 = vmatprep.subr.bf16.mxu0 %v8084_v42  ;;  %v8156_v42 = vcombine.high %v563_v34, %v567_v35  ;;  %v543_v63 = vld [vmem:[#allocation4 + $0x728] sm:$0xff] }
  0xf4   : > { %3126 = vmatpush2.bf16.msra.mxu1 %v8003_v41  ;;  %v8203_v41 = vcombine.low %v611_v27, %v615_v28  ;;  %v579_v0 = vld [vmem:[#allocation4 + $0x848] sm:$0xff] }
  0xf5   : > { %3127 = vmatprep.subr.bf16.mxu1 %v7996_v43  ;;  %v8196_v43 = vcombine.high %v603_v38, %v607_v39  ;;  %v583_v1 = vld [vmem:[#allocation4 + $0x868] sm:$0xff] }
  0xf6   : > { %3147 = vmatpush1.bf16.msra.mxu0 %v8083_v48  ;;  %v8155_v48 = vcombine.low %v563_v34, %v567_v35  ;;  %v531_v7 = vld [vmem:[#allocation4 + $0x6c8] sm:$0xff] }
  0xf7   : > { %3148 = vmatprep.subr.bf16.mxu0 %v8076_v50  ;;  %v8148_v50 = vcombine.high %v555_v44, %v559_v45  ;;  %v535_v8 = vld [vmem:[#allocation4 + $0x6e8] sm:$0xff] }
  0xf8   : > { %3128 = vmatpush2.bf16.msra.mxu1 %v7995_v49  ;;  %v8195_v49 = vcombine.low %v603_v38, %v607_v39  ;;  %v571_v9 = vld [vmem:[#allocation4 + $0x808] sm:$0xff] }
  0xf9   : > { %3129 = vmatprep.subr.bf16.mxu1 %v7988_v51  ;;  %v8188_v51 = vcombine.high %v595_v46, %v599_v47  ;;  %v575_v10 = vld [vmem:[#allocation4 + $0x828] sm:$0xff] }
  0xfa   : > { %3149 = vmatpush1.bf16.msra.mxu0 %v8075_v56  ;;  %v8147_v56 = vcombine.low %v555_v44, %v559_v45  ;;  %v523_v15 = vld [vmem:[#allocation4 + $0x688] sm:$0xff] }
  0xfb   : > { %3150 = vmatprep.subr.bf16.mxu0 %v8068_v60  ;;  %v8140_v60 = vcombine.high %v547_v52, %v551_v53  ;;  %v527_v17 = vld [vmem:[#allocation4 + $0x6a8] sm:$0xff] }
  0xfc   : > { %3130 = vmatpush2.bf16.msra.mxu1 %v7987_v57  ;;  %v8187_v57 = vcombine.low %v595_v46, %v599_v47  ;;  %v691_v18 = vld [vmem:[#allocation4 + $0xbc8] sm:$0xff] }
  0xfd   : > { %3131 = vmatprep.subr.bf16.mxu1 %v7980_v61  ;;  %v8180_v61 = vcombine.high %v587_v54, %v591_v55  ;;  %v695_v20 = vld [vmem:[#allocation4 + $0xbe8] sm:$0xff] }
  0xfe   : > { %3151 = vmatpush1.bf16.msra.mxu0 %v8067_v2  ;;  %v8139_v2 = vcombine.low %v547_v52, %v551_v53  ;;  %v515_v25 = vld [vmem:[#allocation4 + $0x648] sm:$0xff] }
  0xff   : > { %3152 = vmatprep.subr.bf16.mxu0 %v8060_v5  ;;  %v8132_v5 = vcombine.high %v539_v62, %v543_v63  ;;  %v519_v26 = vld [vmem:[#allocation4 + $0x668] sm:$0xff] }
 0x100   : > { %3132 = vmatpush2.bf16.msra.mxu1 %v7979_v4  ;;  %v8179_v4 = vcombine.low %v587_v54, %v591_v55  ;;  %v683_v27 = vld [vmem:[#allocation4 + $0xb88] sm:$0xff] }
 0x101   : > { %3133 = vmatprep.subr.bf16.mxu1 %v7972_v6  ;;  %v8172_v6 = vcombine.high %v579_v0, %v583_v1  ;;  %v687_v28 = vld [vmem:[#allocation4 + $0xba8] sm:$0xff] }
 0x102   : > { %3153 = vmatpush1.bf16.msra.mxu0 %v8059_v11  ;;  %v8131_v11 = vcombine.low %v539_v62, %v543_v63  ;;  %v507_v34 = vld [vmem:[#allocation4 + $0x608] sm:$0xff] }
 0x103   : > { %3154 = vmatprep.subr.bf16.mxu0 %v8052_v13  ;;  %v8124_v13 = vcombine.high %v531_v7, %v535_v8  ;;  %v511_v35 = vld [vmem:[#allocation4 + $0x628] sm:$0xff] }
 0x104   : > { %3134 = vmatpush2.bf16.msra.mxu1 %v7971_v12  ;;  %v8171_v12 = vcombine.low %v579_v0, %v583_v1  ;;  %v675_v38 = vld [vmem:[#allocation4 + $0xb48] sm:$0xff]  ;;  %v8099_v47 = vcombine.low %v507_v34, %v511_v35 }
 0x105   : > { %3185 = vmatprep.subr.bf16.mxu1 %v8220_v14  ;;  %v8164_v14 = vcombine.high %v571_v9, %v575_v10  ;;  %v679_v39 = vld [vmem:[#allocation4 + $0xb68] sm:$0xff] }
 0x106   : > { %3155 = vmatpush1.bf16.msra.mxu0 %v8051_v21  ;;  %v8123_v21 = vcombine.low %v531_v7, %v535_v8  ;;  %v731_v44 = vld [vmem:[#allocation4 + $0xd08] sm:$0x11] }
 0x107   : > { %3136 = vmatmul.mubr.bf16.vlgmr.msra.gmra.mxu1 %v9338_v16  ;;  %3156 = vmatprep.subr.bf16.mxu0 %v8044_v23  ;;  %v8116_v23 = vcombine.high %v523_v15, %v527_v17  ;;  %v667_v45 = vld [vmem:[#allocation4 + $0xb08] sm:$0xff] }
 0x108   : > { %3186 = vmatpush1.bf16.msra.mxu1 %v8219_v22  ;;  %3217 = vmatprep.mubr.bf16.mxu1 %v9346_v29  ;;  %v8163_v22 = vcombine.low %v571_v9, %v575_v10  ;;  %v671_v46 = vld [vmem:[#allocation4 + $0xb28] sm:$0xff] }
 0x109   : > { %3187 = vmatprep.subr.bf16.mxu1 %v8212_v24  ;;  %v8284_v24 = vcombine.high %v691_v18, %v695_v20  ;;  %v723_v52 = vld [vmem:[#allocation4 + $0xcc8] sm:$0xff] }
 0x10a   : > { %3157 = vmatpush1.bf16.msra.mxu0 %v8043_v30  ;;  %v8115_v30 = vcombine.low %v523_v15, %v527_v17  ;;  %v727_v53 = vld [vmem:[#allocation4 + $0xce8] sm:$0xff] }
 0x10b   : > { %3158 = vmatprep.subr.bf16.mxu0 %v8036_v32  ;;  %v8108_v32 = vcombine.high %v515_v25, %v519_v26  ;;  %v659_v54 = vld [vmem:[#allocation4 + $0xac8] sm:$0xff] }
 0x10c   : > { %3188 = vmatpush1.bf16.msra.mxu1 %v8211_v31  ;;  %v8283_v31 = vcombine.low %v691_v18, %v695_v20  ;;  %v663_v55 = vld [vmem:[#allocation4 + $0xae8] sm:$0xff] }
 0x10d   : > { %3189 = vmatprep.subr.bf16.mxu1 %v8204_v33  ;;  %v8276_v33 = vcombine.high %v683_v27, %v687_v28  ;;  %v715_v62 = vld [vmem:[#allocation4 + $0xc88] sm:$0xff] }
 0x10e   : > { %3159 = vmatpush1.bf16.msra.mxu0 %v8035_v40  ;;  %v8107_v40 = vcombine.low %v515_v25, %v519_v26  ;;  %v719_v63 = vld [vmem:[#allocation4 + $0xca8] sm:$0xff]  ;;  %v372_v25 = vld [vmem:[#allocation4 + $0x1d0] sm:$0xff] }
 0x10f   : > { %3160 = vmatprep.subr.bf16.mxu0 %v8156_v42  ;;  %v8100_v42 = vcombine.high %v507_v34, %v511_v35  ;;  %v651_v0 = vld [vmem:[#allocation4 + $0xa88] sm:$0xff]  ;;  %v376_v26 = vld [vmem:[#allocation4 + $0x1f0] sm:$0xff] }
 0x110   : > { %3190 = vmatpush1.bf16.msra.mxu1 %v8203_v41  ;;  %v8275_v41 = vcombine.low %v683_v27, %v687_v28  ;;  %v655_v1 = vld [vmem:[#allocation4 + $0xaa8] sm:$0xff]  ;;  %v500_v27 = vld [vmem:[#allocation4 + $0x5d0] sm:$0xff] }
 0x111   : > { %3191 = vmatprep.subr.bf16.mxu1 %v8196_v43  ;;  %v8268_v43 = vcombine.high %v675_v38, %v679_v39  ;;  %v707_v7 = vld [vmem:[#allocation4 + $0xc48] sm:$0xff]  ;;  %v504_v28 = vld [vmem:[#allocation4 + $0x5f0] sm:$0xff] }
 0x112   : > { %3161 = vmatpush2.bf16.msra.mxu0 %v8155_v48  ;;  %v8267_v48 = vcombine.low %v675_v38, %v679_v39  ;;  %v711_v8 = vld [vmem:[#allocation4 + $0xc68] sm:$0xff]  ;;  %v364_v34 = vld [vmem:[#allocation4 + $0x190] sm:$0xff] }
 0x113   : > { %3162 = vmatprep.subr.bf16.mxu0 %v8148_v50  ;;  %v8323_v50 = vcombine.low %v731_v44, %v731_v44  ;;  %v643_v9 = vld [vmem:[#allocation4 + $0xa48] sm:$0xff]  ;;  %v368_v35 = vld [vmem:[#allocation4 + $0x1b0] sm:$0xff] }
 0x114   : > { %3192 = vmatpush1.bf16.msra.mxu1 %v8195_v49  ;;  %v8324_v49 = vcombine.high %v731_v44, %v731_v44  ;;  %v647_v10 = vld [vmem:[#allocation4 + $0xa68] sm:$0xff]  ;;  %v492_v38 = vld [vmem:[#allocation4 + $0x590] sm:$0xff] }
 0x115   : > { %3193 = vmatprep.subr.bf16.mxu1 %v8188_v51  ;;  %v8260_v51 = vcombine.high %v667_v45, %v671_v46  ;;  %v699_v15 = vld [vmem:[#allocation4 + $0xc08] sm:$0xff]  ;;  %v496_v39 = vld [vmem:[#allocation4 + $0x5b0] sm:$0xff] }
 0x116   : > { %3163 = vmatpush2.bf16.msra.mxu0 %v8147_v56  ;;  %v8259_v56 = vcombine.low %v667_v45, %v671_v46  ;;  %v703_v17 = vld [vmem:[#allocation4 + $0xc28] sm:$0xff]  ;;  %v356_v44 = vld [vmem:[#allocation4 + $0x150] sm:$0xff] }
 0x117   : > { %3164 = vmatprep.subr.bf16.mxu0 %v8140_v60  ;;  %v8316_v60 = vcombine.high %v723_v52, %v727_v53  ;;  %v635_v18 = vld [vmem:[#allocation4 + $0xa08] sm:$0xff]  ;;  %v360_v45 = vld [vmem:[#allocation4 + $0x170] sm:$0xff] }
 0x118   : > { %3194 = vmatpush1.bf16.msra.mxu1 %v8187_v57  ;;  %v2922_v57 = vsel %vm2914_vm0, %v8323_v50, 0  ;;  %v639_v20 = vld [vmem:[#allocation4 + $0xa28] sm:$0xff]  ;;  %v484_v46 = vld [vmem:[#allocation4 + $0x550] sm:$0xff]  ;;  %v7950_v50 = vcombine.high %v356_v44, %v360_v45 }
 0x119   : > { %3195 = vmatprep.subr.bf16.mxu1 %v8180_v61  ;;  %v8252_v61 = vcombine.high %v659_v54, %v663_v55 }
 0x11a   : > { %3165 = vmatpush2.bf16.msra.mxu0 %v8139_v2  ;;  %v8315_v2 = vcombine.low %v723_v52, %v727_v53  ;;  %v348_v52 = vld [vmem:[#allocation4 + $0x110] sm:$0xff] }
 0x11b   : > { %3166 = vmatprep.subr.bf16.mxu0 %v8132_v5  ;;  %v8308_v5 = vcombine.high %v715_v62, %v719_v63  ;;  %v352_v53 = vld [vmem:[#allocation4 + $0x130] sm:$0xff] }
 0x11c   : > { %3196 = vmatpush1.bf16.msra.mxu1 %v8179_v4  ;;  %v8251_v4 = vcombine.low %v659_v54, %v663_v55  ;;  %v476_v54 = vld [vmem:[#allocation4 + $0x510] sm:$0xff] }
 0x11d   : > { %3197 = vmatprep.subr.bf16.mxu1 %v8172_v6  ;;  %v8244_v6 = vcombine.high %v651_v0, %v655_v1  ;;  %v480_v55 = vld [vmem:[#allocation4 + $0x530] sm:$0xff] }
 0x11e   : > { %3167 = vmatpush2.bf16.msra.mxu0 %v8131_v11  ;;  %v8307_v11 = vcombine.low %v715_v62, %v719_v63  ;;  %v340_v62 = vld [vmem:[#allocation4 + $0xd0] sm:$0xff] }
 0x11f   : > { %3168 = vmatprep.subr.bf16.mxu0 %v8124_v13  ;;  %v8300_v13 = vcombine.high %v707_v7, %v711_v8  ;;  %v344_v63 = vld [vmem:[#allocation4 + $0xf0] sm:$0xff] }
 0x120   : > { %3198 = vmatpush1.bf16.msra.mxu1 %v8171_v12  ;;  %v8243_v12 = vcombine.low %v651_v0, %v655_v1  ;;  %v468_v0 = vld [vmem:[#allocation4 + $0x4d0] sm:$0xff] }
 0x121   : > { %3199 = vmatprep.subr.bf16.mxu1 %v8164_v14  ;;  %v8236_v14 = vcombine.high %v643_v9, %v647_v10  ;;  %v472_v1 = vld [vmem:[#allocation4 + $0x4f0] sm:$0xff] }
 0x122   : > { %3169 = vmatpush2.bf16.msra.mxu0 %v8123_v21  ;;  %v8299_v21 = vcombine.low %v707_v7, %v711_v8  ;;  %v332_v7 = vld [vmem:[#allocation4 + $0x90] sm:$0xff] }
 0x123   : > { %3170 = vmatprep.subr.bf16.mxu0 %v8116_v23  ;;  %v8292_v23 = vcombine.high %v699_v15, %v703_v17  ;;  %v336_v8 = vld [vmem:[#allocation4 + $0xb0] sm:$0xff] }
 0x124   : > { %3200 = vmatpush1.bf16.msra.mxu1 %v8163_v22  ;;  %v8235_v22 = vcombine.low %v643_v9, %v647_v10  ;;  %v460_v9 = vld [vmem:[#allocation4 + $0x490] sm:$0xff] }
 0x125   : > { %3201 = vmatprep.subr.bf16.mxu1 %v8284_v24  ;;  %v8228_v24 = vcombine.high %v635_v18, %v639_v20  ;;  %v464_v10 = vld [vmem:[#allocation4 + $0x4b0] sm:$0xff] }
 0x126   : > { %3171 = vmatpush2.bf16.msra.mxu0 %v8115_v30  ;;  %v8291_v30 = vcombine.low %v699_v15, %v703_v17  ;;  %v324_v15 = vld [vmem:[#allocation4 + $0x50] sm:$0xff] }
 0x127   : > { %3172 = vmatprep.subr.bf16.mxu0 %v8108_v32  ;;  %v7966_v32 = vcombine.high %v372_v25, %v376_v26  ;;  %v328_v17 = vld [vmem:[#allocation4 + $0x70] sm:$0xff] }
 0x128   : > { %3202 = vmatpush2.bf16.msra.mxu1 %v8283_v31  ;;  %v8227_v31 = vcombine.low %v635_v18, %v639_v20  ;;  %v452_v18 = vld [vmem:[#allocation4 + $0x450] sm:$0xff] }
 0x129   : > { %3203 = vmatprep.subr.bf16.mxu1 %v8276_v33  ;;  %v8094_v33 = vcombine.high %v500_v27, %v504_v28  ;;  %v456_v20 = vld [vmem:[#allocation4 + $0x470] sm:$0xff] }
 0x12a   : > { %3173 = vmatpush2.bf16.msra.mxu0 %v8107_v40  ;;  %v7965_v40 = vcombine.low %v372_v25, %v376_v26  ;;  %v316_v25 = vld [vmem:[#allocation4 + $0x10] sm:$0xff] }
 0x12b   : > { %3174 = vmatprep.subr.bf16.mxu0 %v8100_v42  ;;  %v7958_v42 = vcombine.high %v364_v34, %v368_v35  ;;  %v320_v26 = vld [vmem:[#allocation4 + $0x30] sm:$0xff] }
 0x12c   : > { %3204 = vmatpush2.bf16.msra.mxu1 %v8275_v41  ;;  %v8093_v41 = vcombine.low %v500_v27, %v504_v28  ;;  %v444_v27 = vld [vmem:[#allocation4 + $0x410] sm:$0xff] }
 0x12d   : > { %3205 = vmatprep.subr.bf16.mxu1 %v8268_v43  ;;  %v8086_v43 = vcombine.high %v492_v38, %v496_v39  ;;  %v448_v28 = vld [vmem:[#allocation4 + $0x430] sm:$0xff] }
 0x12e   : > { %3175 = vmatpush2.bf16.msra.mxu0 %v8099_v47  ;;  %v488_v47 = vld [vmem:[#allocation4 + $0x570] sm:$0xff] }
 0x12f   : > { %8331 = vmatprep.subr.msk.bf16.mxu0 %vm2914_vm0, %v8324_v49  ;;  %v8085_v49 = vcombine.low %v492_v38, %v496_v39  ;;  %v564_v38 = vld [vmem:[#allocation4 + $0x7d0] sm:$0xff] }
 0x130   : > { %3206 = vmatpush2.bf16.msra.mxu1 %v8267_v48  ;;  %v7957_v48 = vcombine.low %v364_v34, %v368_v35  ;;  %v436_v34 = vld [vmem:[#allocation4 + $0x3d0] sm:$0xff] }
 0x131   : > { %3207 = vmatprep.subr.bf16.mxu1 %v8260_v51  ;;  %3177 = vmatmul.mubr.bf16.vlgmr.msra.gmra.mxu0 %v9340_v19  ;;  %v8078_v51 = vcombine.high %v484_v46, %v488_v47  ;;  %v440_v35 = vld [vmem:[#allocation4 + $0x3f0] sm:$0xff] }
 0x132   : > { %3233 = vmatpush1.bf16.msra.mxu0 %v2922_v57  ;;  %3258 = vmatprep.mubr.bf16.mxu0 %v9155_v36  ;;  %v8077_v57 = vcombine.low %v484_v46, %v488_v47  ;;  %v568_v39 = vld [vmem:[#allocation4 + $0x7f0] sm:$0xff] }
 0x133   : > { %3234 = vmatprep.subr.bf16.mxu0 %v8316_v60  ;;  %v7942_v60 = vcombine.high %v348_v52, %v352_v53  ;;  %v432_v46 = vld [vmem:[#allocation4 + $0x3b0] sm:$0xff] }
 0x134   : > { %3208 = vmatpush2.bf16.msra.mxu1 %v8259_v56  ;;  %v7949_v56 = vcombine.low %v356_v44, %v360_v45  ;;  %v8158_v44 = vcombine.high %v564_v38, %v568_v39  ;;  %v428_v45 = vld [vmem:[#allocation4 + $0x390] sm:$0xff] }
 0x135   : > { %3209 = vmatprep.subr.bf16.mxu1 %v8252_v61  ;;  %v8070_v61 = vcombine.high %v476_v54, %v480_v55  ;;  %v556_v47 = vld [vmem:[#allocation4 + $0x790] sm:$0xff] }
 0x136   : > { %3235 = vmatpush1.bf16.msra.mxu0 %v8315_v2  ;;  %v7941_v2 = vcombine.low %v348_v52, %v352_v53  ;;  %v8022_v52 = vcombine.high %v428_v45, %v432_v46 }
 0x137   : > { %3236 = vmatprep.subr.bf16.mxu0 %v8308_v5  ;;  %v7934_v5 = vcombine.high %v340_v62, %v344_v63 }
 0x138   : > { %3210 = vmatpush2.bf16.msra.mxu1 %v8251_v4  ;;  %v8069_v4 = vcombine.low %v476_v54, %v480_v55  ;;  %v420_v54 = vld [vmem:[#allocation4 + $0x350] sm:$0xff] }
 0x139   : > { %3211 = vmatprep.subr.bf16.mxu1 %v8244_v6  ;;  %v8062_v6 = vcombine.high %v468_v0, %v472_v1  ;;  %v424_v55 = vld [vmem:[#allocation4 + $0x370] sm:$0xff] }
 0x13a   : > { %3237 = vmatpush1.bf16.msra.mxu0 %v8307_v11  ;;  %v7933_v11 = vcombine.low %v340_v62, %v344_v63  ;;  %v8014_v63 = vcombine.high %v420_v54, %v424_v55 }
 0x13b   : > { %3238 = vmatprep.subr.bf16.mxu0 %v8300_v13  ;;  %v7926_v13 = vcombine.high %v332_v7, %v336_v8 }
 0x13c   : > { %3212 = vmatpush2.bf16.msra.mxu1 %v8243_v12  ;;  %v8061_v12 = vcombine.low %v468_v0, %v472_v1  ;;  %v296_v0 = vld [vmem:[#allocation9] sm:$0xff] }
 0x13d   : > { %3213 = vmatprep.subr.bf16.mxu1 %v8236_v14  ;;  %v8054_v14 = vcombine.high %v460_v9, %v464_v10 }
 0x13e   : > { %3239 = vmatpush1.bf16.msra.mxu0 %v8299_v21  ;;  %v7925_v21 = vcombine.low %v332_v7, %v336_v8  ;;  %v544_v7 = vld [vmem:[#allocation4 + $0x730] sm:$0xff]  ;;  %v8013_v8 = vcombine.low %v420_v54, %v424_v55 }
 0x13f   : > { %3240 = vmatprep.subr.bf16.mxu0 %v8292_v23  ;;  %v7918_v23 = vcombine.high %v324_v15, %v328_v17 }
 0x140   : > { %3214 = vmatpush2.bf16.msra.mxu1 %v8235_v22  ;;  %v8053_v22 = vcombine.low %v460_v9, %v464_v10 }
 0x141   : > { %3215 = vmatprep.subr.bf16.mxu1 %v8228_v24  ;;  %v8046_v24 = vcombine.high %v452_v18, %v456_v20 }
 0x142   : > { %3241 = vmatpush1.bf16.msra.mxu0 %v8291_v30  ;;  %v7917_v30 = vcombine.low %v324_v15, %v328_v17  ;;  %v408_v15 = vld [vmem:[#allocation4 + $0x2f0] sm:$0xff] }
 0x143   : > { %3267 = vmatprep.subr.bf16.mxu0 %v7966_v32  ;;  %v7910_v32 = vcombine.high %v316_v25, %v320_v26  ;;  %v532_v17 = vld [vmem:[#allocation4 + $0x6d0] sm:$0xff] }
 0x144   : > { %3216 = vmatpush2.bf16.msra.mxu1 %v8227_v31  ;;  %v8045_v31 = vcombine.low %v452_v18, %v456_v20  ;;  %v536_v18 = vld [vmem:[#allocation4 + $0x6f0] sm:$0xff] }
 0x145   : > { %3308 = vmatprep.subr.bf16.mxu1 %v8094_v33  ;;  %8332 = vmatmul.mubr.msk.bf16.vlgmr.msra.gmra.mxu0 %vm2910_vm1, %v9352_v3  ;;  %v8038_v33 = vcombine.high %v444_v27, %v448_v28 }
 0x146   : > { %3268 = vmatpush1.bf16.msra.mxu0 %v7965_v40  ;;  %3299 = vmatprep.mubr.bf16.mxu0 %v9330_v58  ;;  %v7909_v40 = vcombine.low %v316_v25, %v320_v26  ;;  %v8126_v25 = vcombine.high %v532_v17, %v536_v18  ;;  %v396_v26 = vld [vmem:[#allocation4 + $0x290] sm:$0xff] }
 0x147   : > { %3218 = vmatmul.mubr.bf16.vlgmr.msra.gmra.mxu1 %v9358_v37  ;;  %3269 = vmatprep.subr.bf16.mxu0 %v7958_v42  ;;  %v8037_v42 = vcombine.low %v444_v27, %v448_v28  ;;  %v400_v27 = vld [vmem:[#allocation4 + $0x2b0] sm:$0xff] }
 0x148   : > { %3309 = vmatpush1.bf16.msra.mxu1 %v8093_v41  ;;  %3340 = vmatprep.mubr.bf16.mxu1 %v9332_v59  ;;  %v738_v41 = vlaneseq }
 0x149   : > { %3310 = vmatprep.subr.bf16.mxu1 %v8086_v43  ;;  %v8030_v43 = vcombine.high %v436_v34, %v440_v35 }
 0x14a   : > { %3270 = vmatpush1.bf16.msra.mxu0 %v7957_v48  ;;  %v560_v48 = vld [vmem:[#allocation4 + $0x7b0] sm:$0xff] }
 0x14b   : > { %3271 = vmatprep.subr.bf16.mxu0 %v7950_v50  ;;  %v9373_v50 = vshrl.u32 %v738_v41, 7  ;;  %v8150_v53 = vcombine.high %v556_v47, %v560_v48  ;;  %v8149_v62 = vcombine.low %v556_v47, %v560_v48  ;;  %v516_v47 = vld [vmem:[#allocation4 + $0x650] sm:$0xff] }
 0x14c   : > { %3311 = vmatpush1.bf16.msra.mxu1 %v8085_v49  ;;  %v8029_v49 = vcombine.low %v436_v34, %v440_v35  ;;  %v520_v48 = vld [vmem:[#allocation4 + $0x670] sm:$0xff] }
 0x14d   : > { %3312 = vmatprep.subr.bf16.mxu1 %v8078_v51  ;;  %v8157_v51 = vcombine.low %v564_v38, %v568_v39  ;;  %v8125_v38 = vcombine.low %v532_v17, %v536_v18  ;;  %v7990_v39 = vcombine.high %v396_v26, %v400_v27  ;;  %v624_v17 = vld [vmem:[#allocation4 + $0x9b0] sm:$0xff] }
 0x14e   : > { %3272 = vmatpush1.bf16.msra.mxu0 %v7949_v56  ;;  %v548_v56 = vld [vmem:[#allocation4 + $0x750] sm:$0xff] }
 0x14f   : > { %3273 = vmatprep.subr.bf16.mxu0 %v7942_v60  ;;  %v8021_v60 = vcombine.low %v428_v45, %v432_v46  ;;  %v392_v45 = vld [vmem:[#allocation4 + $0x270] sm:$0xff] }
 0x150   : > { %3313 = vmatpush1.bf16.msra.mxu1 %v8077_v57  ;;  %v552_v57 = vld [vmem:[#allocation4 + $0x770] sm:$0xff] }
 0x151   : > { %3314 = vmatprep.subr.bf16.mxu1 %v8070_v61  ;;  %v9376_v61 = vsub.s32 0, %v9373_v50  ;;  %v8142_v1 = vcombine.high %v548_v56, %v552_v57  ;;  %v8141_v10 = vcombine.low %v548_v56, %v552_v57  ;;  %v8110_v57 = vcombine.high %v516_v47, %v520_v48  ;;  %v724_v18 = vld [vmem:[#allocation4 + $0xcd0] sm:$0xff] }
 0x152   : > { %3274 = vmatpush1.bf16.msra.mxu0 %v7941_v2  ;;  %v412_v2 = vld [vmem:[#allocation4 + $0x310] sm:$0xff] }
 0x153   : > { %3275 = vmatprep.subr.bf16.mxu0 %v7934_v5  ;;  %v9379_v5 = vsub.s32 4, %v9373_v50  ;;  %v741_v9 = vrot.slane %v296_v0, %v9376_v61 }
 0x154   : > { %3315 = vmatpush1.bf16.msra.mxu1 %v8069_v4  ;;  %v416_v4 = vld [vmem:[#allocation4 + $0x330] sm:$0xff] }
 0x155   : > { %3316 = vmatprep.subr.bf16.mxu1 %v8062_v6  ;;  %v540_v6 = vld [vmem:[#allocation4 + $0x710] sm:$0xff]  ;;  %v781_v20 = vrot.slane %v741_v9, %v9376_v61 }
 0x156   : > { %3276 = vmatpush1.bf16.msra.mxu0 %v7933_v11  ;;  %v8006_v11 = vcombine.high %v412_v2, %v416_v4  ;;  %v732_v9 = vld [vmem:[#allocation4 + $0xd10] sm:$0x11] }
 0x157   : > { %3277 = vmatprep.subr.bf16.mxu0 %v7926_v13  ;;  %v745_v13 = vrot.slane %v296_v0, %v9379_v5  ;;  %v512_v0 = vld [vmem:[#allocation4 + $0x630] sm:$0xff] }
 0x158   : > { %3317 = vmatpush1.bf16.msra.mxu1 %v8061_v12  ;;  %v8134_v12 = vcombine.high %v540_v6, %v544_v7 }
 0x159   : > { %3318 = vmatprep.subr.bf16.mxu1 %v8054_v14  ;;  %v404_v14 = vld [vmem:[#allocation4 + $0x2d0] sm:$0xff] }
 0x15a   : > { %3278 = vmatpush1.bf16.msra.mxu0 %v7925_v21  ;;  %v8005_v21 = vcombine.low %v412_v2, %v416_v4  ;;  %v7997_v34 = vcombine.low %v404_v14, %v408_v15  ;;  %v8109_v2 = vcombine.low %v516_v47, %v520_v48 }
 0x15b   : > { %3279 = vmatprep.subr.bf16.mxu0 %v7918_v23  ;;  %v7998_v23 = vcombine.high %v404_v14, %v408_v15  ;;  %v8325_v14 = vcombine.low %v732_v9, %v732_v9  ;;  %v620_v15 = vld [vmem:[#allocation4 + $0x990] sm:$0xff] }
 0x15c   : > { %3319 = vmatpush1.bf16.msra.mxu1 %v8053_v22  ;;  %v8133_v22 = vcombine.low %v540_v6, %v544_v7  ;;  %v628_v7 = vld [vmem:[#allocation4 + $0x9d0] sm:$0xff] }
 0x15d   : > { %3320 = vmatprep.subr.bf16.mxu1 %v8046_v24  ;;  %v785_v24 = vrot.slane %v745_v13, %v9376_v61  ;;  %v8326_v13 = vcombine.high %v732_v9, %v732_v9  ;;  %v584_v9 = vld [vmem:[#allocation4 + $0x870] sm:$0xff] }
 0x15e   : > { %3280 = vmatpush1.bf16.msra.mxu0 %v7917_v30  ;;  %v524_v30 = vld [vmem:[#allocation4 + $0x690] sm:$0xff] }
 0x15f   : > { %3281 = vmatprep.subr.bf16.mxu0 %v7910_v32 }
 0x160   : > { %3321 = vmatpush1.bf16.msra.mxu1 %v8045_v31  ;;  %v528_v31 = vld [vmem:[#allocation4 + $0x6b0] sm:$0xff] }
 0x161   : > { %3322 = vmatprep.subr.bf16.mxu1 %v8038_v33  ;;  %v8117_v54 = vcombine.low %v524_v30, %v528_v31 }
 0x162   : > { %3282 = vmatpush1.bf16.msra.mxu0 %v7909_v40 }
 0x163   : > { %3283 = vmatprep.subr.bf16.mxu0 %v8030_v43  ;;  %v8118_v43 = vcombine.high %v524_v30, %v528_v31  ;;  %v8213_v31 = vcombine.low %v620_v15, %v624_v17 }
 0x164   : > { %3323 = vmatpush1.bf16.msra.mxu1 %v8037_v42 }
 0x165   : > { %3324 = vmatprep.subr.bf16.mxu1 %v8158_v44  ;;  %v388_v44 = vld [vmem:[#allocation4 + $0x250] sm:$0xff] }
 0x166   : > { %3284 = vmatpush2.bf16.msra.mxu0 %v8029_v49  ;;  %v7982_v55 = vcombine.high %v388_v44, %v392_v45 }
 0x167   : > { %3285 = vmatprep.subr.bf16.mxu0 %v8022_v52  ;;  %v7989_v52 = vcombine.low %v396_v26, %v400_v27  ;;  %v616_v26 = vld [vmem:[#allocation4 + $0x970] sm:$0xff] }
 0x168   : > { %3325 = vmatpush2.bf16.msra.mxu1 %v8157_v51  ;;  %v716_v27 = vld [vmem:[#allocation4 + $0xc90] sm:$0xff] }
 0x169   : > { %3326 = vmatprep.subr.bf16.mxu1 %v8150_v53 }
 0x16a   : > { %3286 = vmatpush2.bf16.msra.mxu0 %v8021_v60  ;;  %v380_v60 = vld [vmem:[#allocation4 + $0x210] sm:$0xff] }
 0x16b   : > { %3287 = vmatprep.subr.bf16.mxu0 %v8014_v63  ;;  %v508_v63 = vld [vmem:[#allocation4 + $0x610] sm:$0xff] }
 0x16c   : > { %3327 = vmatpush2.bf16.msra.mxu1 %v8149_v62  ;;  %v384_v62 = vld [vmem:[#allocation4 + $0x230] sm:$0xff]  ;;  %v8102_v6 = vcombine.high %v508_v63, %v512_v0 }
 0x16d   : > { %3328 = vmatprep.subr.bf16.mxu1 %v8142_v1  ;;  %v7981_v1 = vcombine.low %v388_v44, %v392_v45  ;;  %v7974_v4 = vcombine.high %v380_v60, %v384_v62 }
 0x16e   : > { %3288 = vmatpush2.bf16.msra.mxu0 %v8013_v8  ;;  %v632_v8 = vld [vmem:[#allocation4 + $0x9f0] sm:$0xff] }
 0x16f   : > { %3289 = vmatprep.subr.bf16.mxu0 %v8006_v11  ;;  %v8101_v11 = vcombine.low %v508_v63, %v512_v0  ;;  %v592_v63 = vld [vmem:[#allocation4 + $0x8b0] sm:$0xff]  ;;  %v373_v0 = vld [vmem:[#allocation4 + $0x1d8] sm:$0xff] }
 0x170   : > { %3329 = vmatpush2.bf16.msra.mxu1 %v8141_v10  ;;  %v7973_v10 = vcombine.low %v380_v60, %v384_v62  ;;  %v588_v62 = vld [vmem:[#allocation4 + $0x890] sm:$0xff] }
 0x171   : > { %3330 = vmatprep.subr.bf16.mxu1 %v8134_v12  ;;  %v2973_v28 = vpop.f32.mrf.mxu0  ;;  %v8222_v12 = vcombine.high %v628_v7, %v632_v8 }
 0x172   : > { %v2974_v32 = vadd.f32 %v2973_v28, %v781_v20  ;;  %3290 = vmatpush2.bf16.msra.mxu0 %v8005_v21  ;;  %v728_v20 = vld [vmem:[#allocation4 + $0xcf0] sm:$0xff]  ;;  %v8221_v21 = vcombine.low %v628_v7, %v632_v8 }
 0x173   : > { %v3014_v33 = vpop.f32.mrf.mxu1  ;;  %v2975_v35 = vpop.f32.mrf.mxu0  ;;  %3291 = vmatprep.subr.bf16.mxu0 %v7998_v23  ;;  %v2928_v23 = vsel %vm2914_vm0, %v8325_v14, 0  ;;  %v720_v28 = vld [vmem:[#allocation4 + $0xcb0] sm:$0xff] }
 0x174   : > { %3331 = vmatpush2.bf16.msra.mxu1 %v8133_v22  ;;  %v9385_v40 = vadd.f32 %v3014_v33, %v2974_v32  ;;  %v2976_v41 = vadd.f32 %v2975_v35, %v785_v24  ;;  %v8214_v22 = vcombine.high %v620_v15, %v624_v17  ;;  %v8318_v24 = vcombine.high %v724_v18, %v728_v20  ;;  %v580_v8 = vld [vmem:[#allocation4 + $0x850] sm:$0xff] }
 0x175   : > { %v3016_v42 = vpop.f32.mrf.mxu1  ;;  %3332 = vmatprep.subr.bf16.mxu1 %v8126_v25  ;;  %v2977_v46 = vpop.f32.mrf.mxu0  ;;  %v612_v25 = vld [vmem:[#allocation4 + $0x950] sm:$0xff]  ;;  %v8317_v32 = vcombine.low %v724_v18, %v728_v20  ;;  %v8310_v35 = vcombine.high %v716_v27, %v720_v28  ;;  %v8309_v45 = vcombine.low %v716_v27, %v720_v28  ;;  %v8174_v14 = vcombine.high %v580_v8, %v584_v9  ;;  %v357_v20 = vld [vmem:[#allocation4 + $0x158] sm:$0xff] }
 0x176   : > { %v9387_v49 = vadd.f32 %v3016_v42, %v2976_v41  ;;  %3292 = vmatpush2.bf16.msra.mxu0 %v7997_v34  ;;  %v8206_v33 = vcombine.high %v612_v25, %v616_v26  ;;  %v708_v41 = vld [vmem:[#allocation4 + $0xc50] sm:$0xff]  ;;  %v8205_v44 = vcombine.low %v612_v25, %v616_v26  ;;  %v349_v28 = vld [vmem:[#allocation4 + $0x118] sm:$0xff] }
 0x177   : > { %v3018_v51 = vpop.f32.mrf.mxu1  ;;  %v2978_v53 = vpop.f32.mrf.mxu0  ;;  %3293 = vmatprep.subr.bf16.mxu0 %v7990_v39  ;;  %v608_v39 = vld [vmem:[#allocation4 + $0x930] sm:$0xff] }
 0x178   : > { %3333 = vmatpush2.bf16.msra.mxu1 %v8125_v38  ;;  %v604_v38 = vld [vmem:[#allocation4 + $0x910] sm:$0xff] }
 0x179   : > { %v3019_v56 = vpop.f32.mrf.mxu1  ;;  %3334 = vmatprep.subr.bf16.mxu1 %v8118_v43  ;;  %v712_v42 = vld [vmem:[#allocation4 + $0xc70] sm:$0xff]  ;;  %v8198_v46 = vcombine.high %v604_v38, %v608_v39 }
 0x17a   : > { %3294 = vmatpush2.bf16.msra.mxu0 %v7989_v52  ;;  %v8302_v48 = vcombine.high %v708_v41, %v712_v42  ;;  %v596_v51 = vld [vmem:[#allocation4 + $0x8d0] sm:$0xff]  ;;  %v8301_v56 = vcombine.low %v708_v41, %v712_v42  ;;  %v341_v42 = vld [vmem:[#allocation4 + $0xd8] sm:$0xff] }
 0x17b   : > { %3295 = vmatprep.subr.bf16.mxu0 %v7982_v55  ;;  %v600_v52 = vld [vmem:[#allocation4 + $0x8f0] sm:$0xff]  ;;  %v8197_v55 = vcombine.low %v604_v38, %v608_v39 }
 0x17c   : > { %3335 = vmatpush2.bf16.msra.mxu1 %v8117_v54  ;;  %v700_v53 = vld [vmem:[#allocation4 + $0xc10] sm:$0xff] }
 0x17d   : > { %3336 = vmatprep.subr.bf16.mxu1 %v8110_v57  ;;  %v704_v54 = vld [vmem:[#allocation4 + $0xc30] sm:$0xff]  ;;  %v8190_v57 = vcombine.high %v596_v51, %v600_v52 }
 0x17e   : > { %3296 = vmatpush2.bf16.msra.mxu0 %v7981_v1  ;;  %v8294_v60 = vcombine.high %v700_v53, %v704_v54  ;;  %v377_v1 = vld [vmem:[#allocation4 + $0x1f8] sm:$0xff]  ;;  %v572_v17 = vld [vmem:[#allocation4 + $0x810] sm:$0xff] }
 0x17f   : > { %3297 = vmatprep.subr.bf16.mxu0 %v7974_v4  ;;  %v8293_v4 = vcombine.low %v700_v53, %v704_v54  ;;  %v7968_v7 = vcombine.high %v373_v0, %v377_v1  ;;  %v576_v18 = vld [vmem:[#allocation4 + $0x830] sm:$0xff] }
 0x180   : > { %3337 = vmatpush2.bf16.msra.mxu1 %v8109_v2  ;;  %v8189_v2 = vcombine.low %v596_v51, %v600_v52  ;;  %v692_v26 = vld [vmem:[#allocation4 + $0xbd0] sm:$0xff]  ;;  %v333_v51 = vld [vmem:[#allocation4 + $0x98] sm:$0xff] }
 0x181   : > { %3338 = vmatprep.subr.bf16.mxu1 %v8102_v6  ;;  %v8182_v6 = vcombine.high %v588_v62, %v592_v63  ;;  %v696_v27 = vld [vmem:[#allocation4 + $0xbf0] sm:$0xff]  ;;  %v337_v52 = vld [vmem:[#allocation4 + $0xb8] sm:$0xff] }
 0x182   : > { %3298 = vmatpush2.bf16.msra.mxu0 %v7973_v10  ;;  %v365_v10 = vld [vmem:[#allocation4 + $0x198] sm:$0xff]  ;;  %v684_v39 = vld [vmem:[#allocation4 + $0xb90] sm:$0xff] }
 0x183   : > { %3349 = vmatprep.subr.bf16.mxu0 %v8222_v12  ;;  %v8181_v12 = vcombine.low %v588_v62, %v592_v63  ;;  %v688_v41 = vld [vmem:[#allocation4 + $0xbb0] sm:$0xff]  ;;  %v325_v62 = vld [vmem:[#allocation4 + $0x58] sm:$0xff] }
 0x184   : > { %3339 = vmatpush2.bf16.msra.mxu1 %v8101_v11  ;;  %v369_v11 = vld [vmem:[#allocation4 + $0x1b8] sm:$0xff]  ;;  %v8277_v53 = vcombine.low %v684_v39, %v688_v41 }
 0x185   : > { %8333 = vmatprep.subr.msk.bf16.mxu1 %vm2914_vm0, %v8326_v13  ;;  %3300 = vmatmul.mubr.bf16.vlgmr.msra.gmra.mxu0 %v9338_v16  ;;  %v7967_v13 = vcombine.low %v373_v0, %v377_v1  ;;  %v7960_v15 = vcombine.high %v365_v10, %v369_v11  ;;  %v329_v63 = vld [vmem:[#allocation4 + $0x78] sm:$0xff]  ;;  %v7927_v1 = vcombine.low %v333_v51, %v337_v52 }
 0x186   : > { %3350 = vmatpush1.bf16.msra.mxu0 %v8221_v21  ;;  %3381 = vmatprep.mubr.bf16.mxu0 %v9346_v29  ;;  %v361_v21 = vld [vmem:[#allocation4 + $0x178] sm:$0xff] }
 0x187   : > { %v9392_v30 = vpop.f32.mrf.mxu1  ;;  %3341 = vmatmul.mubr.bf16.vlgmr.msra.gmra.mxu1 %v9340_v19  ;;  %3351 = vmatprep.subr.bf16.mxu0 %v8214_v22  ;;  %v8173_v22 = vcombine.low %v580_v8, %v584_v9  ;;  %v7952_v25 = vcombine.high %v357_v20, %v361_v21  ;;  %v317_v8 = vld [vmem:[#allocation4 + $0x18] sm:$0xff] }
 0x188   : > { %3397 = vmatpush1.bf16.msra.mxu1 %v2928_v23  ;;  %3422 = vmatprep.mubr.bf16.mxu1 %v9155_v36  ;;  %v7959_v23 = vcombine.low %v365_v10, %v369_v11  ;;  %v321_v9 = vld [vmem:[#allocation4 + $0x38] sm:$0xff]  ;;  %v7919_v11 = vcombine.low %v325_v62, %v329_v63 }
 0x189   : > { %v9395_v34 = vpop.f32.mrf.mxu1  ;;  %3398 = vmatprep.subr.bf16.mxu1 %v8318_v24  ;;  %v8166_v24 = vcombine.high %v572_v17, %v576_v18 }
 0x18a   : > { %3352 = vmatpush1.bf16.msra.mxu0 %v8213_v31  ;;  %v353_v31 = vld [vmem:[#allocation4 + $0x138] sm:$0xff] }
 0x18b   : > { %v3100_v43 = vpop.f32.mrf.mxu1  ;;  %3353 = vmatprep.subr.bf16.mxu0 %v8206_v33  ;;  %v7951_v33 = vcombine.low %v357_v20, %v361_v21  ;;  %v7944_v38 = vcombine.high %v349_v28, %v353_v31  ;;  %v441_v20 = vld [vmem:[#allocation4 + $0x3f8] sm:$0xff] }
 0x18c   : > { %3399 = vmatpush1.bf16.msra.mxu1 %v8317_v32  ;;  %v8165_v32 = vcombine.low %v572_v17, %v576_v18  ;;  %v345_v43 = vld [vmem:[#allocation4 + $0xf8] sm:$0xff] }
 0x18d   : > { %v3101_v47 = vpop.f32.mrf.mxu1  ;;  %3400 = vmatprep.subr.bf16.mxu1 %v8310_v35  ;;  %v8286_v35 = vcombine.high %v692_v26, %v696_v27  ;;  %v7935_v54 = vcombine.low %v341_v42, %v345_v43  ;;  %v437_v18 = vld [vmem:[#allocation4 + $0x3d8] sm:$0xff] }
 0x18e   : > { %3354 = vmatpush1.bf16.msra.mxu0 %v8205_v44  ;;  %v8285_v44 = vcombine.low %v692_v26, %v696_v27  ;;  %v676_v47 = vld [vmem:[#allocation4 + $0xb50] sm:$0xff] }
 0x18f   : > { %3355 = vmatprep.subr.bf16.mxu0 %v8198_v46  ;;  %v7936_v46 = vcombine.high %v341_v42, %v345_v43  ;;  %v8031_v42 = vcombine.low %v437_v18, %v441_v20 }
 0x190   : > { %3401 = vmatpush1.bf16.msra.mxu1 %v8309_v45  ;;  %v7943_v45 = vcombine.low %v349_v28, %v353_v31  ;;  %v8032_v28 = vcombine.high %v437_v18, %v441_v20  ;;  %v644_v31 = vld [vmem:[#allocation4 + $0xa50] sm:$0xff]  ;;  %v477_v20 = vld [vmem:[#allocation4 + $0x518] sm:$0xff] }
 0x191   : > { %3402 = vmatprep.subr.bf16.mxu1 %v8302_v48  ;;  %v680_v48 = vld [vmem:[#allocation4 + $0xb70] sm:$0xff] }
 0x192   : > { %3356 = vmatpush1.bf16.msra.mxu0 %v8197_v55  ;;  %v8270_v55 = vcombine.high %v676_v47, %v680_v48  ;;  %v8269_v0 = vcombine.low %v676_v47, %v680_v48 }
 0x193   : > { %3357 = vmatprep.subr.bf16.mxu0 %v8190_v57  ;;  %v668_v57 = vld [vmem:[#allocation4 + $0xb10] sm:$0xff] }
 0x194   : > { %3403 = vmatpush1.bf16.msra.mxu1 %v8301_v56  ;;  %v7928_v56 = vcombine.high %v333_v51, %v337_v52  ;;  %v501_v51 = vld [vmem:[#allocation4 + $0x5d8] sm:$0xff] }
 0x195   : > { %3404 = vmatprep.subr.bf16.mxu1 %v8294_v60  ;;  %v672_v60 = vld [vmem:[#allocation4 + $0xb30] sm:$0xff]  ;;  %v505_v52 = vld [vmem:[#allocation4 + $0x5f8] sm:$0xff] }
 0x196   : > { %3358 = vmatpush1.bf16.msra.mxu0 %v8189_v2  ;;  %v8262_v2 = vcombine.high %v668_v57, %v672_v60  ;;  %v8261_v10 = vcombine.low %v668_v57, %v672_v60  ;;  %v8096_v57 = vcombine.high %v501_v51, %v505_v52 }
 0x197   : > { %3359 = vmatprep.subr.bf16.mxu0 %v8182_v6  ;;  %v660_v6 = vld [vmem:[#allocation4 + $0xad0] sm:$0xff] }
 0x198   : > { %3405 = vmatpush1.bf16.msra.mxu1 %v8293_v4  ;;  %v7920_v4 = vcombine.high %v325_v62, %v329_v63  ;;  %v493_v62 = vld [vmem:[#allocation4 + $0x598] sm:$0xff] }
 0x199   : > { %3431 = vmatprep.subr.bf16.mxu1 %v7968_v7  ;;  %v664_v7 = vld [vmem:[#allocation4 + $0xaf0] sm:$0xff]  ;;  %v497_v63 = vld [vmem:[#allocation4 + $0x5b8] sm:$0xff] }
 0x19a   : > { %3360 = vmatpush1.bf16.msra.mxu0 %v8181_v12  ;;  %v8254_v12 = vcombine.high %v660_v6, %v664_v7 }
 0x19b   : > { %8334 = vmatmul.mubr.msk.bf16.vlgmr.msra.gmra.mxu1 %vm2910_vm1, %v9352_v3  ;;  %3361 = vmatprep.subr.bf16.mxu0 %v8174_v14  ;;  %v652_v14 = vld [vmem:[#allocation4 + $0xa90] sm:$0xff] }
 0x19c   : > { %3432 = vmatpush1.bf16.msra.mxu1 %v7967_v13  ;;  %3463 = vmatprep.mubr.bf16.mxu1 %v9330_v58  ;;  %v8278_v58 = vcombine.high %v684_v39, %v688_v41  ;;  %v7912_v13 = vcombine.high %v317_v8, %v321_v9 }
 0x19d   : > { %3433 = vmatprep.subr.bf16.mxu1 %v7960_v15  ;;  %v656_v15 = vld [vmem:[#allocation4 + $0xab0] sm:$0xff] }
 0x19e   : > { %3362 = vmatpush1.bf16.msra.mxu0 %v8173_v22  ;;  %v8253_v22 = vcombine.low %v660_v6, %v664_v7  ;;  %v8245_v39 = vcombine.low %v652_v14, %v656_v15  ;;  %v8088_v6 = vcombine.high %v493_v62, %v497_v63 }
 0x19f   : > { %3363 = vmatprep.subr.bf16.mxu0 %v8166_v24  ;;  %v7911_v24 = vcombine.low %v317_v8, %v321_v9  ;;  %v485_v8 = vld [vmem:[#allocation4 + $0x558] sm:$0xff] }
 0x1a0   : > { %3434 = vmatpush1.bf16.msra.mxu1 %v7959_v23  ;;  %v489_v9 = vld [vmem:[#allocation4 + $0x578] sm:$0xff] }
 0x1a1   : > { %3435 = vmatprep.subr.bf16.mxu1 %v7952_v25  ;;  %v8246_v25 = vcombine.high %v652_v14, %v656_v15  ;;  %v8080_v15 = vcombine.high %v485_v8, %v489_v9 }
 0x1a2   : > { %3364 = vmatpush1.bf16.msra.mxu0 %v8165_v32  ;;  %v648_v32 = vld [vmem:[#allocation4 + $0xa70] sm:$0xff] }
 0x1a3   : > { %3365 = vmatprep.subr.bf16.mxu0 %v8286_v35  ;;  %v429_v35 = vld [vmem:[#allocation4 + $0x398] sm:$0xff] }
 0x1a4   : > { %3436 = vmatpush1.bf16.msra.mxu1 %v7951_v33 }
 0x1a5   : > { %3437 = vmatprep.subr.bf16.mxu1 %v7944_v38  ;;  %v433_v38 = vld [vmem:[#allocation4 + $0x3b8] sm:$0xff] }
 0x1a6   : > { %3366 = vmatpush2.bf16.msra.mxu0 %v8285_v44  ;;  %v8024_v43 = vcombine.high %v429_v35, %v433_v38  ;;  %v640_v44 = vld [vmem:[#allocation4 + $0xa30] sm:$0xff]  ;;  %v8023_v47 = vcombine.low %v429_v35, %v433_v38  ;;  %v381_v35 = vld [vmem:[#allocation4 + $0x218] sm:$0xff] }
 0x1a7   : > { %3367 = vmatprep.subr.bf16.mxu0 %v8278_v58  ;;  %v425_v58 = vld [vmem:[#allocation4 + $0x378] sm:$0xff] }
 0x1a8   : > { %3438 = vmatpush1.bf16.msra.mxu1 %v7943_v45  ;;  %v421_v45 = vld [vmem:[#allocation4 + $0x358] sm:$0xff] }
 0x1a9   : > { %3439 = vmatprep.subr.bf16.mxu1 %v7936_v46  ;;  %v8237_v46 = vcombine.low %v644_v31, %v648_v32  ;;  %v8016_v48 = vcombine.high %v421_v45, %v425_v58  ;;  %v385_v38 = vld [vmem:[#allocation4 + $0x238] sm:$0xff] }
 0x1aa   : > { %3368 = vmatpush2.bf16.msra.mxu0 %v8277_v53  ;;  %v413_v53 = vld [vmem:[#allocation4 + $0x318] sm:$0xff] }
 0x1ab   : > { %3369 = vmatprep.subr.bf16.mxu0 %v8270_v55 }
 0x1ac   : > { %3440 = vmatpush1.bf16.msra.mxu1 %v7935_v54  ;;  %v417_v54 = vld [vmem:[#allocation4 + $0x338] sm:$0xff] }
 0x1ad   : > { %3441 = vmatprep.subr.bf16.mxu1 %v7928_v56  ;;  %v8015_v56 = vcombine.low %v421_v45, %v425_v58  ;;  %v8008_v60 = vcombine.high %v413_v53, %v417_v54  ;;  %v633_v45 = vld [vmem:[#allocation4 + $0x9f8] sm:$0xff] }
 0x1ae   : > { %3370 = vmatpush2.bf16.msra.mxu0 %v8269_v0  ;;  %v405_v0 = vld [vmem:[#allocation4 + $0x2d8] sm:$0xff] }
 0x1af   : > { %3371 = vmatprep.subr.bf16.mxu0 %v8262_v2  ;;  %v8095_v2 = vcombine.low %v501_v51, %v505_v52  ;;  %v457_v51 = vld [vmem:[#allocation4 + $0x478] sm:$0xff] }
 0x1b0   : > { %3442 = vmatpush1.bf16.msra.mxu1 %v7927_v1  ;;  %v409_v1 = vld [vmem:[#allocation4 + $0x2f8] sm:$0xff] }
 0x1b1   : > { %3443 = vmatprep.subr.bf16.mxu1 %v7920_v4  ;;  %v3055_v17 = vpop.f32.mrf.mxu0  ;;  %v8007_v4 = vcombine.low %v413_v53, %v417_v54  ;;  %v8000_v7 = vcombine.high %v405_v0, %v409_v1  ;;  %v7999_v14 = vcombine.low %v405_v0, %v409_v1  ;;  %v621_v52 = vld [vmem:[#allocation4 + $0x998] sm:$0xff] }
 0x1b2   : > { %v3056_v21 = vadd.f32 %v3055_v17, %v9385_v40  ;;  %3372 = vmatpush2.bf16.msra.mxu0 %v8261_v10  ;;  %v397_v10 = vld [vmem:[#allocation4 + $0x298] sm:$0xff] }
 0x1b3   : > { %v3057_v23 = vpop.f32.mrf.mxu0  ;;  %3373 = vmatprep.subr.bf16.mxu0 %v8254_v12  ;;  %v625_v53 = vld [vmem:[#allocation4 + $0x9b8] sm:$0xff] }
 0x1b4   : > { %3444 = vmatpush1.bf16.msra.mxu1 %v7919_v11  ;;  %v9404_v26 = vadd.f32 %v9392_v30, %v3056_v21  ;;  %v3058_v27 = vadd.f32 %v3057_v23, %v9387_v49  ;;  %v8238_v30 = vcombine.high %v644_v31, %v648_v32  ;;  %v636_v49 = vld [vmem:[#allocation4 + $0xa10] sm:$0xff]  ;;  %v401_v11 = vld [vmem:[#allocation4 + $0x2b8] sm:$0xff] }
 0x1b5   : > { %3445 = vmatprep.subr.bf16.mxu1 %v7912_v13  ;;  %v3059_v33 = vpop.f32.mrf.mxu0  ;;  %v8229_v55 = vcombine.low %v636_v49, %v640_v44  ;;  %v8087_v13 = vcombine.low %v493_v62, %v497_v63  ;;  %v7992_v18 = vcombine.high %v397_v10, %v401_v11  ;;  %v481_v21 = vld [vmem:[#allocation4 + $0x538] sm:$0xff] }
 0x1b6   : > { %v9408_v40 = vadd.f32 %v9395_v34, %v3058_v27  ;;  %3374 = vmatpush2.bf16.msra.mxu0 %v8253_v22  ;;  %v8230_v34 = vcombine.high %v636_v49, %v640_v44  ;;  %v389_v22 = vld [vmem:[#allocation4 + $0x258] sm:$0xff]  ;;  %v7991_v27 = vcombine.low %v397_v10, %v401_v11  ;;  %vm3595_vm4 = vcmp.gt.f32.partialorder %v9404_v26, 0.0 }
 0x1b7   : > { %v3060_v41 = vpop.f32.mrf.mxu0  ;;  %3375 = vmatprep.subr.bf16.mxu0 %v8246_v25  ;;  %v393_v23 = vld [vmem:[#allocation4 + $0x278] sm:$0xff]  ;;  %v8079_v25 = vcombine.low %v485_v8, %v489_v9 }
 0x1b8   : > { %3446 = vmatpush1.bf16.msra.mxu1 %v7911_v24  ;;  %v7984_v31 = vcombine.high %v389_v22, %v393_v23  ;;  %v469_v32 = vld [vmem:[#allocation4 + $0x4d8] sm:$0xff]  ;;  %v7983_v41 = vcombine.low %v389_v22, %v393_v23  ;;  %vm3596_vm2 = vcmp.gt.f32.partialorder %v9408_v40, 0.0 }
 0x1b9   : > { %3447 = vmatprep.subr.bf16.mxu1 %v8032_v28  ;;  %v8072_v28 = vcombine.high %v477_v20, %v481_v21  ;;  %v473_v33 = vld [vmem:[#allocation4 + $0x4f8] sm:$0xff] }
 0x1ba   : > { %3376 = vmatpush2.bf16.msra.mxu0 %v8245_v39  ;;  %v8071_v39 = vcombine.low %v477_v20, %v481_v21  ;;  %v465_v49 = vld [vmem:[#allocation4 + $0x4b8] sm:$0xff]  ;;  %v8063_v58 = vcombine.low %v469_v32, %v473_v33 }
 0x1bb   : > { %3377 = vmatprep.subr.bf16.mxu0 %v8238_v30  ;;  %v7976_v30 = vcombine.high %v381_v35, %v385_v38  ;;  %v629_v44 = vld [vmem:[#allocation4 + $0x9d8] sm:$0xff] }
 0x1bc   : > { %3448 = vmatpush2.bf16.msra.mxu1 %v8031_v42  ;;  %v8064_v42 = vcombine.high %v469_v32, %v473_v33  ;;  %v449_v62 = vld [vmem:[#allocation4 + $0x438] sm:$0xff] }
 0x1bd   : > { %3449 = vmatprep.subr.bf16.mxu1 %v8024_v43  ;;  %v461_v43 = vld [vmem:[#allocation4 + $0x498] sm:$0xff] }
 0x1be   : > { %3378 = vmatpush2.bf16.msra.mxu0 %v8237_v46  ;;  %v7975_v46 = vcombine.low %v381_v35, %v385_v38  ;;  %v8055_v54 = vcombine.low %v461_v43, %v465_v49  ;;  %v613_v63 = vld [vmem:[#allocation4 + $0x958] sm:$0xff] }
 0x1bf   : > { %3379 = vmatprep.subr.bf16.mxu0 %v8230_v34  ;;  %v8224_v34 = vcombine.high %v629_v44, %v633_v45  ;;  %v617_v0 = vld [vmem:[#allocation4 + $0x978] sm:$0xff] }
 0x1c0   : > { %3450 = vmatpush2.bf16.msra.mxu1 %v8023_v47  ;;  %v8056_v47 = vcombine.high %v461_v43, %v465_v49  ;;  %v569_v8 = vld [vmem:[#allocation4 + $0x7f8] sm:$0xff] }
 0x1c1   : > { %3451 = vmatprep.subr.bf16.mxu1 %v8016_v48  ;;  %v453_v48 = vld [vmem:[#allocation4 + $0x458] sm:$0xff] }
 0x1c2   : > { %3380 = vmatpush2.bf16.msra.mxu0 %v8229_v55  ;;  %v8223_v55 = vcombine.low %v629_v44, %v633_v45  ;;  %v8047_v1 = vcombine.low %v453_v48, %v457_v51  ;;  %v605_v9 = vld [vmem:[#allocation4 + $0x918] sm:$0xff] }
 0x1c3   : > { %3472 = vmatprep.subr.bf16.mxu0 %v8096_v57  ;;  %v8216_v57 = vcombine.high %v621_v52, %v625_v53  ;;  %v609_v10 = vld [vmem:[#allocation4 + $0x938] sm:$0xff] }
 0x1c4   : > { %3452 = vmatpush2.bf16.msra.mxu1 %v8015_v56  ;;  %v8048_v56 = vcombine.high %v453_v48, %v457_v51  ;;  %v597_v20 = vld [vmem:[#allocation4 + $0x8d8] sm:$0xff]  ;;  %v8199_v23 = vcombine.low %v605_v9, %v609_v10 }
 0x1c5   : > { %3453 = vmatprep.subr.bf16.mxu1 %v8008_v60  ;;  %3382 = vmatmul.mubr.bf16.vlgmr.msra.gmra.mxu0 %v9358_v37  ;;  %v445_v60 = vld [vmem:[#allocation4 + $0x418] sm:$0xff] }
 0x1c6   : > { %3473 = vmatpush1.bf16.msra.mxu0 %v8095_v2  ;;  %3504 = vmatprep.mubr.bf16.mxu0 %v9332_v59  ;;  %v8215_v2 = vcombine.low %v621_v52, %v625_v53  ;;  %v8039_v11 = vcombine.low %v445_v60, %v449_v62  ;;  %v601_v21 = vld [vmem:[#allocation4 + $0x8f8] sm:$0xff] }
 0x1c7   : > { %v9411_v12 = vpop.f32.mrf.mxu1  ;;  %3474 = vmatprep.subr.bf16.mxu0 %v8088_v6  ;;  %v8208_v6 = vcombine.high %v613_v63, %v617_v0  ;;  %v8191_v33 = vcombine.low %v597_v20, %v601_v21  ;;  %v585_v43 = vld [vmem:[#allocation4 + $0x878] sm:$0xff] }
 0x1c8   : > { %3454 = vmatpush2.bf16.msra.mxu1 %v8007_v4  ;;  %v8040_v4 = vcombine.high %v445_v60, %v449_v62  ;;  %v573_v48 = vld [vmem:[#allocation4 + $0x818] sm:$0xff] }
 0x1c9   : > { %v9414_v17 = vpop.f32.mrf.mxu1  ;;  %3455 = vmatprep.subr.bf16.mxu1 %v8000_v7  ;;  %v565_v7 = vld [vmem:[#allocation4 + $0x7d8] sm:$0xff] }
 0x1ca   : > { %3475 = vmatpush1.bf16.msra.mxu0 %v8087_v13  ;;  %v8207_v13 = vcombine.low %v613_v63, %v617_v0  ;;  %v8159_v22 = vcombine.low %v565_v7, %v569_v8  ;;  %v577_v51 = vld [vmem:[#allocation4 + $0x838] sm:$0xff] }
 0x1cb   : > { %v3141_v24 = vpop.f32.mrf.mxu1  ;;  %3476 = vmatprep.subr.bf16.mxu0 %v8080_v15  ;;  %v557_v15 = vld [vmem:[#allocation4 + $0x798] sm:$0xff] }
 0x1cc   : > { %3456 = vmatpush2.bf16.msra.mxu1 %v7999_v14  ;;  %v8200_v14 = vcombine.high %v605_v9, %v609_v10  ;;  %v8192_v24 = vcombine.high %v597_v20, %v601_v21  ;;  %v529_v60 = vld [vmem:[#allocation4 + $0x6b8] sm:$0xff] }
 0x1cd   : > { %v3142_v59 = vpop.f32.mrf.mxu1  ;;  %3457 = vmatprep.subr.bf16.mxu1 %v7992_v18  ;;  %v561_v18 = vld [vmem:[#allocation4 + $0x7b8] sm:$0xff] }
 0x1ce   : > { %3477 = vmatpush1.bf16.msra.mxu0 %v8079_v25  ;;  %v549_v25 = vld [vmem:[#allocation4 + $0x758] sm:$0xff]  ;;  %v8151_v32 = vcombine.low %v557_v15, %v561_v18 }
 0x1cf   : > { %3478 = vmatprep.subr.bf16.mxu0 %v8072_v28  ;;  %v9418_v28 = vld [vmem:[#allocation9 + $0x8] sm:$0xff]  ;;  %v589_v59 = vld [vmem:[#allocation4 + $0x898] sm:$0xff] }
 0x1d0   : > { %3458 = vmatpush2.bf16.msra.mxu1 %v7991_v27  ;;  %v553_v27 = vld [vmem:[#allocation4 + $0x778] sm:$0xff]  ;;  %v749_v38 = vrot.slane %v9418_v28, %v9376_v61 }
 0x1d1   : > { %3459 = vmatprep.subr.bf16.mxu1 %v7984_v31  ;;  %v593_v31 = vld [vmem:[#allocation4 + $0x8b8] sm:$0xff]  ;;  %v8144_v35 = vcombine.high %v549_v25, %v553_v27  ;;  %v8143_v49 = vcombine.low %v549_v25, %v553_v27 }
 0x1d2   : > { %3479 = vmatpush1.bf16.msra.mxu0 %v8071_v39  ;;  %v8184_v39 = vcombine.high %v589_v59, %v593_v31  ;;  %v8183_v44 = vcombine.low %v589_v59, %v593_v31  ;;  %v693_v63 = vld [vmem:[#allocation4 + $0xbd8] sm:$0xff] }
 0x1d3   : > { %3480 = vmatprep.subr.bf16.mxu0 %v8064_v42  ;;  %v545_v42 = vld [vmem:[#allocation4 + $0x738] sm:$0xff] }
 0x1d4   : > { %3460 = vmatpush2.bf16.msra.mxu1 %v7983_v41  ;;  %v541_v41 = vld [vmem:[#allocation4 + $0x718] sm:$0xff] }
 0x1d5   : > { %3461 = vmatprep.subr.bf16.mxu1 %v7976_v30  ;;  %v581_v30 = vld [vmem:[#allocation4 + $0x858] sm:$0xff]  ;;  %v8136_v45 = vcombine.high %v541_v41, %v545_v42  ;;  %v8135_v52 = vcombine.low %v541_v41, %v545_v42 }
 0x1d6   : > { %3481 = vmatpush1.bf16.msra.mxu0 %v8063_v58  ;;  %v789_v58 = vrot.slane %v749_v38, %v9376_v61  ;;  %v8175_v53 = vcombine.low %v581_v30, %v585_v43  ;;  %v697_v0 = vld [vmem:[#allocation4 + $0xbf8] sm:$0xff] }
 0x1d7   : > { %3482 = vmatprep.subr.bf16.mxu0 %v8056_v47  ;;  %v533_v47 = vld [vmem:[#allocation4 + $0x6d8] sm:$0xff] }
 0x1d8   : > { %3462 = vmatpush2.bf16.msra.mxu1 %v7975_v46  ;;  %v8176_v46 = vcombine.high %v581_v30, %v585_v43  ;;  %v521_v9 = vld [vmem:[#allocation4 + $0x678] sm:$0xff] }
 0x1d9   : > { %3513 = vmatprep.subr.bf16.mxu1 %v8224_v34  ;;  %v537_v34 = vld [vmem:[#allocation4 + $0x6f8] sm:$0xff] }
 0x1da   : > { %3483 = vmatpush1.bf16.msra.mxu0 %v8055_v54  ;;  %v8128_v54 = vcombine.high %v533_v47, %v537_v34  ;;  %v509_v21 = vld [vmem:[#allocation4 + $0x618] sm:$0xff] }
 0x1db   : > { %3464 = vmatmul.mubr.bf16.vlgmr.msra.gmra.mxu1 %v9338_v16  ;;  %3484 = vmatprep.subr.bf16.mxu0 %v8048_v56  ;;  %v8160_v16 = vcombine.high %v565_v7, %v569_v8  ;;  %v8168_v56 = vcombine.high %v573_v48, %v577_v51  ;;  %v8288_v8 = vcombine.high %v693_v63, %v697_v0  ;;  %v733_v31 = vld [vmem:[#allocation4 + $0xd18] sm:$0x11] }
 0x1dc   : > { %3514 = vmatpush1.bf16.msra.mxu1 %v8223_v55  ;;  %3545 = vmatprep.mubr.bf16.mxu1 %v9346_v29  ;;  %v8152_v29 = vcombine.high %v557_v15, %v561_v18  ;;  %v3138_v55 = vadd.f32 %v9411_v12, %v789_v58  ;;  %v517_v12 = vld [vmem:[#allocation4 + $0x658] sm:$0xff]  ;;  %v8287_v15 = vcombine.low %v693_v63, %v697_v0 }
 0x1dd   : > { %3515 = vmatprep.subr.bf16.mxu1 %v8216_v57  ;;  %v525_v57 = vld [vmem:[#allocation4 + $0x698] sm:$0xff]  ;;  %v8112_v18 = vcombine.high %v517_v12, %v521_v9  ;;  %v8328_v41 = vcombine.high %v733_v31, %v733_v31  ;;  %v8327_v42 = vcombine.low %v733_v31, %v733_v31  ;;  %v3687_v31 = vld [vmem:[#allocation6 + $0x1e0] sm:$0xff] }
 0x1de   : > { %3485 = vmatpush1.bf16.msra.mxu0 %v8047_v1  ;;  %v8120_v7 = vcombine.high %v525_v57, %v529_v60  ;;  %v725_v43 = vld [vmem:[#allocation4 + $0xcd8] sm:$0xff] }
 0x1df   : > { %3486 = vmatprep.subr.bf16.mxu0 %v8040_v4 }
 0x1e0   : > { %3516 = vmatpush1.bf16.msra.mxu1 %v8215_v2  ;;  %v8127_v2 = vcombine.low %v533_v47, %v537_v34 }
 0x1e1   : > { %3517 = vmatprep.subr.bf16.mxu1 %v8208_v6  ;;  %v8167_v6 = vcombine.low %v573_v48, %v577_v51  ;;  %v717_v48 = vld [vmem:[#allocation4 + $0xc98] sm:$0xff] }
 0x1e2   : > { %3487 = vmatpush1.bf16.msra.mxu0 %v8039_v11  ;;  %v685_v11 = vld [vmem:[#allocation4 + $0xb98] sm:$0xff] }
 0x1e3   : > { %3488 = vmatprep.subr.bf16.mxu0 %v8160_v16  ;;  %v8119_v16 = vcombine.low %v525_v57, %v529_v60  ;;  %v721_v51 = vld [vmem:[#allocation4 + $0xcb8] sm:$0xff] }
 0x1e4   : > { %3518 = vmatpush1.bf16.msra.mxu1 %v8207_v13  ;;  %v689_v13 = vld [vmem:[#allocation4 + $0xbb8] sm:$0xff]  ;;  %v8312_v0 = vcombine.high %v717_v48, %v721_v51 }
 0x1e5   : > { %3519 = vmatprep.subr.bf16.mxu1 %v8200_v14  ;;  %v8280_v20 = vcombine.high %v685_v11, %v689_v13  ;;  %v8279_v25 = vcombine.low %v685_v11, %v689_v13 }
 0x1e6   : > { %3489 = vmatpush2.bf16.msra.mxu0 %v8159_v22  ;;  %v513_v22 = vld [vmem:[#allocation4 + $0x638] sm:$0xff] }
 0x1e7   : > { %3490 = vmatprep.subr.bf16.mxu0 %v8152_v29  ;;  %v681_v29 = vld [vmem:[#allocation4 + $0xb78] sm:$0xff]  ;;  %v8104_v27 = vcombine.high %v509_v21, %v513_v22  ;;  %v8103_v38 = vcombine.low %v509_v21, %v513_v22 }
 0x1e8   : > { %3520 = vmatpush1.bf16.msra.mxu1 %v8199_v23  ;;  %v677_v23 = vld [vmem:[#allocation4 + $0xb58] sm:$0xff] }
 0x1e9   : > { %3521 = vmatprep.subr.bf16.mxu1 %v8192_v24  ;;  %v8111_v24 = vcombine.low %v517_v12, %v521_v9  ;;  %v8272_v59 = vcombine.high %v677_v23, %v681_v29  ;;  %v705_v21 = vld [vmem:[#allocation4 + $0xc38] sm:$0xff] }
 0x1ea   : > { %3491 = vmatpush2.bf16.msra.mxu0 %v8151_v32  ;;  %v669_v32 = vld [vmem:[#allocation4 + $0xb18] sm:$0xff] }
 0x1eb   : > { %3492 = vmatprep.subr.bf16.mxu0 %v8144_v35  ;;  %v753_v35 = vrot.slane %v9418_v28, %v9379_v5  ;;  %v2934_v28 = vsel %vm2914_vm0, %v8327_v42, 0  ;;  %v641_v22 = vld [vmem:[#allocation4 + $0xa38] sm:$0xff] }
 0x1ec   : > { %3522 = vmatpush1.bf16.msra.mxu1 %v8191_v33  ;;  %v673_v33 = vld [vmem:[#allocation4 + $0xb38] sm:$0xff] }
 0x1ed   : > { %3523 = vmatprep.subr.bf16.mxu1 %v8184_v39  ;;  %v8271_v39 = vcombine.low %v677_v23, %v681_v29  ;;  %v8264_v30 = vcombine.high %v669_v32, %v673_v33  ;;  %v793_v58 = vrot.slane %v753_v35, %v9376_v61  ;;  %v3604_v35 = vmul.f32 0.2, %v9408_v40 }
 0x1ee   : > { %3493 = vmatpush2.bf16.msra.mxu0 %v8143_v49  ;;  %v729_v49 = vld [vmem:[#allocation4 + $0xcf8] sm:$0xff] }
 0x1ef   : > { %3494 = vmatprep.subr.bf16.mxu0 %v8136_v45  ;;  %v665_v45 = vld [vmem:[#allocation4 + $0xaf8] sm:$0xff]  ;;  %v8320_v47 = vcombine.high %v725_v43, %v729_v49  ;;  %v8319_v57 = vcombine.low %v725_v43, %v729_v49  ;;  %v3140_v60 = vadd.f32 %v9414_v17, %v793_v58  ;;  %v8311_v17 = vcombine.low %v717_v48, %v721_v51  ;;  %v3675_v43 = vld [vmem:[#allocation6 + $0x180] sm:$0xff] }
 0x1f0   : > { %3524 = vmatpush1.bf16.msra.mxu1 %v8183_v44  ;;  %v661_v44 = vld [vmem:[#allocation4 + $0xad8] sm:$0xff]  ;;  %v3679_v49 = vld [vmem:[#allocation6 + $0x1a0] sm:$0xff] }
 0x1f1   : > { %3525 = vmatprep.subr.bf16.mxu1 %v8176_v46  ;;  %v3178_v62 = vpop.f32.mrf.mxu0  ;;  %v8263_v46 = vcombine.low %v669_v32, %v673_v33  ;;  %v8256_v34 = vcombine.high %v661_v44, %v665_v45  ;;  %v3811_v32 = vld [vmem:[#allocation6 + $0x5c0] sm:$0xff] }
 0x1f2   : > { %v9424_v1 = vadd.f32 %v3178_v62, %v3138_v55  ;;  %3495 = vmatpush2.bf16.msra.mxu0 %v8135_v52  ;;  %v3815_v33 = vld [vmem:[#allocation6 + $0x5e0] sm:$0xff] }
 0x1f3   : > { %v9426_v4 = vpop.f32.mrf.mxu0  ;;  %3496 = vmatprep.subr.bf16.mxu0 %v8128_v54  ;;  %v657_v54 = vld [vmem:[#allocation4 + $0xab8] sm:$0xff]  ;;  %v3803_v58 = vld [vmem:[#allocation6 + $0x580] sm:$0xff] }
 0x1f4   : > { %3526 = vmatpush1.bf16.msra.mxu1 %v8175_v53  ;;  %v653_v53 = vld [vmem:[#allocation4 + $0xa98] sm:$0xff]  ;;  %v3667_v48 = vld [vmem:[#allocation6 + $0x140] sm:$0xff] }
 0x1f5   : > { %3527 = vmatprep.subr.bf16.mxu1 %v8168_v56  ;;  %v3182_v10 = vpop.f32.mrf.mxu0  ;;  %v8255_v56 = vcombine.low %v661_v44, %v665_v45  ;;  %v3612_v44 = vsel %vm3596_vm2, %v9408_v40, %v3604_v35  ;;  %v3671_v51 = vld [vmem:[#allocation6 + $0x160] sm:$0xff]  ;;  %vm7786_vm2 = vcmask 7168  }
 0x1f6   : > { %3497 = vmatpush2.bf16.msra.mxu0 %v8127_v2  ;;  %v645_v10 = vld [vmem:[#allocation4 + $0xa58] sm:$0xff]  ;;  %v3799_v40 = vld [vmem:[#allocation6 + $0x560] sm:$0xff] }
 0x1f7   : > { %v3183_v14 = vpop.f32.mrf.mxu0  ;;  %3498 = vmatprep.subr.bf16.mxu0 %v8120_v7  ;;  %v713_v7 = vld [vmem:[#allocation4 + $0xc78] sm:$0xff]  ;;  %v3631_v35 = vld [vmem:[#allocation6 + $0x20] sm:$0xff] }
 0x1f8   : > { %3528 = vmatpush1.bf16.msra.mxu1 %v8167_v6  ;;  %v8248_v6 = vcombine.high %v653_v53, %v657_v54 }
 0x1f9   : > { %3529 = vmatprep.subr.bf16.mxu1 %v8288_v8  ;;  %v3181_v8 = vadd.f32 %v9426_v4, %v3140_v60  ;;  %v637_v4 = vld [vmem:[#allocation4 + $0xa18] sm:$0xff]  ;;  %v8378_v60 = vcombine.high %v3667_v48, %v3671_v51 }
 0x1fa   : > { %3499 = vmatpush2.bf16.msra.mxu0 %v8119_v16  ;;  %v8247_v16 = vcombine.low %v653_v53, %v657_v54  ;;  %v3795_v54 = vld [vmem:[#allocation6 + $0x540] sm:$0xff] }
 0x1fb   : > { %3500 = vmatprep.subr.bf16.mxu0 %v8112_v18 }
 0x1fc   : > { %3530 = vmatpush2.bf16.msra.mxu1 %v8287_v15 }
 0x1fd   : > { %3531 = vmatprep.subr.bf16.mxu1 %v8280_v20  ;;  %v701_v20 = vld [vmem:[#allocation4 + $0xc18] sm:$0xff] }
 0x1fe   : > { %3501 = vmatpush2.bf16.msra.mxu0 %v8111_v24 }
 0x1ff   : > { %3502 = vmatprep.subr.bf16.mxu0 %v8104_v27  ;;  %v8232_v27 = vcombine.high %v637_v4, %v641_v22 }
 0x200   : > { %3532 = vmatpush2.bf16.msra.mxu1 %v8279_v25  ;;  %v8296_v25 = vcombine.high %v701_v20, %v705_v21 }
 0x201   : > { %3533 = vmatprep.subr.bf16.mxu1 %v8272_v59  ;;  %v3683_v59 = vld [vmem:[#allocation6 + $0x1c0] sm:$0xff] }
 0x202   : > { %3503 = vmatpush2.bf16.msra.mxu0 %v8103_v38  ;;  %v8295_v38 = vcombine.low %v701_v20, %v705_v21  ;;  %v8394_v42 = vcombine.high %v3683_v59, %v3687_v31  ;;  %v8393_v45 = vcombine.low %v3683_v59, %v3687_v31 }
 0x203   : > { %8335 = vmatprep.subr.msk.bf16.mxu0 %vm2914_vm0, %v8328_v41  ;;  %v8231_v41 = vcombine.low %v637_v4, %v641_v22 }
 0x204   : > { %3534 = vmatpush2.bf16.msra.mxu1 %v8271_v39 }
 0x205   : > { %3535 = vmatprep.subr.bf16.mxu1 %v8264_v30  ;;  %v3260_v52 = vpop.f32.mrf.mxu0  ;;  %3505 = vmatmul.mubr.bf16.vlgmr.msra.gmra.mxu0 %v9340_v19  ;;  %v709_v19 = vld [vmem:[#allocation4 + $0xc58] sm:$0xff]  ;;  %v8522_v30 = vcombine.high %v3811_v32, %v3815_v33 }
 0x206   : > { %3561 = vmatpush1.bf16.msra.mxu0 %v2934_v28  ;;  %3586 = vmatprep.mubr.bf16.mxu0 %v9155_v36  ;;  %v649_v36 = vld [vmem:[#allocation4 + $0xa78] sm:$0xff]  ;;  %v8304_v14 = vcombine.high %v709_v19, %v713_v7  ;;  %v8303_v23 = vcombine.low %v709_v19, %v713_v7 }
 0x207   : > { %v3219_v55 = vpop.f32.mrf.mxu1  ;;  %v3262_v63 = vpop.f32.mrf.mxu0  ;;  %3562 = vmatprep.subr.bf16.mxu0 %v8320_v47  ;;  %v8240_v18 = vcombine.high %v645_v10, %v649_v36  ;;  %v8239_v24 = vcombine.low %v645_v10, %v649_v36  ;;  %v8521_v47 = vcombine.low %v3811_v32, %v3815_v33  ;;  %v3779_v10 = vld [vmem:[#allocation6 + $0x4c0] sm:$0xff] }
 0x208   : > { %v3220_v62 = vadd.f32 %v3219_v55, %v9424_v1  ;;  %3536 = vmatpush2.bf16.msra.mxu1 %v8263_v46  ;;  %v3807_v46 = vld [vmem:[#allocation6 + $0x5a0] sm:$0xff] }
 0x209   : > { %v3221_v2 = vpop.f32.mrf.mxu1  ;;  %3537 = vmatprep.subr.bf16.mxu1 %v8256_v34  ;;  %v3264_v9 = vpop.f32.mrf.mxu0  ;;  %v8386_v34 = vcombine.high %v3675_v43, %v3679_v49  ;;  %v8514_v53 = vcombine.high %v3803_v58, %v3807_v46  ;;  %v3783_v36 = vld [vmem:[#allocation6 + $0x4e0] sm:$0xff] }
 0x20a   : > { %v9438_v12 = vadd.f32 %v3260_v52, %v3220_v62  ;;  %3563 = vmatpush1.bf16.msra.mxu0 %v8319_v57  ;;  %v3222_v1 = vadd.f32 %v3221_v2, %v3181_v8  ;;  %v9443_v52 = vpack.c.bf16 %v3612_v44, %v3612_v44  ;;  %v8513_v57 = vcombine.low %v3803_v58, %v3807_v46  ;;  %v3791_v2 = vld [vmem:[#allocation6 + $0x520] sm:$0xff] }
 0x20b   : > { %v3223_v11 = vpop.f32.mrf.mxu1  ;;  %v3265_v13 = vpop.f32.mrf.mxu0  ;;  %3564 = vmatprep.subr.bf16.mxu0 %v8312_v0  ;;  %v8506_v62 = vcombine.high %v3795_v54, %v3799_v40  ;;  %v3787_v0 = vld [vmem:[#allocation6 + $0x500] sm:$0xff]  ;;  %v8489_v21 = vcombine.low %v3779_v10, %v3783_v36 }
 0x20c   : > { %3538 = vmatpush2.bf16.msra.mxu1 %v8255_v56  ;;  %v3263_v29 = vadd.f32 %v3262_v63, %v3222_v1  ;;  %v8385_v56 = vcombine.low %v3675_v43, %v3679_v49  ;;  %v3659_v63 = vld [vmem:[#allocation6 + $0x100] sm:$0xff]  ;;  %v8498_v7 = vcombine.high %v3787_v0, %v3791_v2  ;;  %v8490_v13 = vcombine.high %v3779_v10, %v3783_v36 }
 0x20d   : > { %v3224_v15 = vpop.f32.mrf.mxu1  ;;  %3539 = vmatprep.subr.bf16.mxu1 %v8248_v6  ;;  %v8377_v6 = vcombine.low %v3667_v48, %v3671_v51  ;;  %v3651_v8 = vld [vmem:[#allocation6 + $0xc0] sm:$0xff]  ;;  %vm3597_vm5 = vcmp.gt.f32.partialorder %v9438_v12, 0.0 }
 0x20e   : > { %3565 = vmatpush1.bf16.msra.mxu0 %v8311_v17  ;;  %v3606_v39 = vmul.f32 0.2, %v3263_v29  ;;  %vm3598_vm3 = vcmp.gt.f32.partialorder %v3263_v29, 0.0  ;;  %v3655_v9 = vld [vmem:[#allocation6 + $0xe0] sm:$0xff]  ;;  %v8497_v17 = vcombine.low %v3787_v0, %v3791_v2 }
 0x20f   : > { %3566 = vmatprep.subr.bf16.mxu0 %v8304_v14  ;;  %v8362_v1 = vcombine.high %v3651_v8, %v3655_v9  ;;  %v3647_v14 = vld [vmem:[#allocation6 + $0xa0] sm:$0xff]  ;;  %v8361_v20 = vcombine.low %v3651_v8, %v3655_v9 }
 0x210   : > { %3540 = vmatpush2.bf16.msra.mxu1 %v8247_v16  ;;  %v3614_v28 = vsel %vm3598_vm3, %v3263_v29, %v3606_v39  ;;  %v3643_v16 = vld [vmem:[#allocation6 + $0x80] sm:$0xff] }
 0x211   : > { %3541 = vmatprep.subr.bf16.mxu1 %v8240_v18  ;;  %v9447_v55 = vpack.c.bf16 %v3614_v28, %v3614_v28  ;;  %v3771_v15 = vld [vmem:[#allocation6 + $0x480] sm:$0xff]  ;;  %v8354_v4 = vcombine.high %v3643_v16, %v3647_v14 }
 0x212   : > { %3567 = vmatpush1.bf16.msra.mxu0 %v8303_v23  ;;  %v3775_v18 = vld [vmem:[#allocation6 + $0x4a0] sm:$0xff] }
 0x213   : > { %3568 = vmatprep.subr.bf16.mxu0 %v8296_v25  ;;  %v8482_v22 = vcombine.high %v3771_v15, %v3775_v18  ;;  %v3635_v23 = vld [vmem:[#allocation6 + $0x40] sm:$0xff]  ;;  %v8481_v59 = vcombine.low %v3771_v15, %v3775_v18 }
 0x214   : > { %3542 = vmatpush2.bf16.msra.mxu1 %v8239_v24  ;;  %v3639_v29 = vld [vmem:[#allocation6 + $0x60] sm:$0xff] }
 0x215   : > { %3543 = vmatprep.subr.bf16.mxu1 %v8232_v27  ;;  %v3763_v24 = vld [vmem:[#allocation6 + $0x440] sm:$0xff]  ;;  %v8353_v27 = vcombine.low %v3643_v16, %v3647_v14  ;;  %v8346_v31 = vcombine.high %v3635_v23, %v3639_v29 }
 0x216   : > { %3569 = vmatpush1.bf16.msra.mxu0 %v8295_v38  ;;  %v3767_v25 = vld [vmem:[#allocation6 + $0x460] sm:$0xff] }
 0x217   : > { %6699 = vmatprep.subr.bf16.mxu0 %v8394_v42  ;;  %v8474_v32 = vcombine.high %v3763_v24, %v3767_v25  ;;  %v3627_v33 = vld [vmem:[#allocation6] sm:$0xff]  ;;  %v8473_v42 = vcombine.low %v3763_v24, %v3767_v25 }
 0x218   : > { %3544 = vmatpush2.bf16.msra.mxu1 %v8231_v41  ;;  %v3755_v38 = vld [vmem:[#allocation6 + $0x400] sm:$0xff]  ;;  %v8345_v41 = vcombine.low %v3635_v23, %v3639_v29  ;;  %v8337_v46 = vcombine.low %v3627_v33, %v3631_v35 }
 0x219   : > { %6740 = vmatprep.subr.bf16.mxu1 %v8522_v30  ;;  %8336 = vmatmul.mubr.msk.bf16.vlgmr.msra.gmra.mxu0 %vm2910_vm1, %v9352_v3  ;;  %v3663_v3 = vld [vmem:[#allocation6 + $0x120] sm:$0xff]  ;;  %v8338_v30 = vcombine.high %v3627_v33, %v3631_v35 }
 0x21a   : > { %6700 = vmatpush1.bf16.msra.mxu0 %v8393_v45  ;;  %6731 = vmatprep.mubr.bf16.mxu0 %v9443_v52  ;;  %v8370_v19 = vcombine.high %v3659_v63, %v3663_v3  ;;  %v8369_v11 = vcombine.low %v3659_v63, %v3663_v3  ;;  %v3759_v39 = vld [vmem:[#allocation6 + $0x420] sm:$0xff] }
 0x21b   : > { %3546 = vmatmul.mubr.bf16.vlgmr.msra.gmra.mxu1 %v9358_v37  ;;  %6701 = vmatprep.subr.bf16.mxu0 %v8386_v34  ;;  %v8505_v37 = vcombine.low %v3795_v54, %v3799_v40  ;;  %v8466_v43 = vcombine.high %v3755_v38, %v3759_v39  ;;  %v3747_v49 = vld [vmem:[#allocation6 + $0x3c0] sm:$0xff]  ;;  %v8465_v28 = vcombine.low %v3755_v38, %v3759_v39 }
 0x21c   : > { %6741 = vmatpush1.bf16.msra.mxu1 %v8521_v47  ;;  %6772 = vmatprep.mubr.bf16.mxu1 %v9447_v55  ;;  %v3751_v44 = vld [vmem:[#allocation6 + $0x3e0] sm:$0xff] }
 0x21d   : > { %6742 = vmatprep.subr.bf16.mxu1 %v8514_v53  ;;  %v3875_v45 = vld [vmem:[#allocation6 + $0x7c0] sm:$0xff]  ;;  %v8458_v47 = vcombine.high %v3747_v49, %v3751_v44  ;;  %v8457_v40 = vcombine.low %v3747_v49, %v3751_v44 }
 0x21e   : > { %6702 = vmatpush1.bf16.msra.mxu0 %v8385_v56  ;;  %v3879_v58 = vld [vmem:[#allocation6 + $0x7e0] sm:$0xff] }
 0x21f   : > { %6703 = vmatprep.subr.bf16.mxu0 %v8378_v60  ;;  %v8586_v34 = vcombine.high %v3875_v45, %v3879_v58  ;;  %v3739_v48 = vld [vmem:[#allocation6 + $0x380] sm:$0xff]  ;;  %v8585_v56 = vcombine.low %v3875_v45, %v3879_v58 }
 0x220   : > { %6743 = vmatpush1.bf16.msra.mxu1 %v8513_v57  ;;  %v3743_v51 = vld [vmem:[#allocation6 + $0x3a0] sm:$0xff] }
 0x221   : > { %6744 = vmatprep.subr.bf16.mxu1 %v8506_v62  ;;  %v3867_v53 = vld [vmem:[#allocation6 + $0x780] sm:$0xff]  ;;  %v8450_v57 = vcombine.high %v3739_v48, %v3743_v51  ;;  %v8449_v2 = vcombine.low %v3739_v48, %v3743_v51 }
 0x222   : > { %6704 = vmatpush1.bf16.msra.mxu0 %v8377_v6  ;;  %v3871_v54 = vld [vmem:[#allocation6 + $0x7a0] sm:$0xff] }
 0x223   : > { %6705 = vmatprep.subr.bf16.mxu0 %v8370_v19  ;;  %v8578_v60 = vcombine.high %v3867_v53, %v3871_v54  ;;  %v3731_v62 = vld [vmem:[#allocation6 + $0x340] sm:$0xff]  ;;  %v8577_v6 = vcombine.low %v3867_v53, %v3871_v54  ;;  %v9452_v19 = vld [vmem:[#allocation9 + $0x10] sm:$0xff] }
 0x224   : > { %6745 = vmatpush1.bf16.msra.mxu1 %v8505_v37  ;;  %v3735_v63 = vld [vmem:[#allocation6 + $0x360] sm:$0xff] }
 0x225   : > { %6746 = vmatprep.subr.bf16.mxu1 %v8498_v7  ;;  %v3859_v3 = vld [vmem:[#allocation6 + $0x740] sm:$0xff]  ;;  %v8442_v37 = vcombine.high %v3731_v62, %v3735_v63 }
 0x226   : > { %6706 = vmatpush1.bf16.msra.mxu0 %v8369_v11  ;;  %v3863_v0 = vld [vmem:[#allocation6 + $0x760] sm:$0xff]  ;;  %v8441_v11 = vcombine.low %v3731_v62, %v3735_v63 }
 0x227   : > { %6707 = vmatprep.subr.bf16.mxu0 %v8362_v1  ;;  %v8570_v7 = vcombine.high %v3859_v3, %v3863_v0  ;;  %v3723_v8 = vld [vmem:[#allocation6 + $0x300] sm:$0xff]  ;;  %v8569_v1 = vcombine.low %v3859_v3, %v3863_v0  ;;  %v3603_v0 = vmul.f32 0.2, %v9404_v26 }
 0x228   : > { %6747 = vmatpush1.bf16.msra.mxu1 %v8497_v17  ;;  %v3727_v9 = vld [vmem:[#allocation6 + $0x320] sm:$0xff]  ;;  %v757_v17 = vrot.slane %v9452_v19, %v9376_v61 }
 0x229   : > { %6748 = vmatprep.subr.bf16.mxu1 %v8490_v13  ;;  %v3851_v10 = vld [vmem:[#allocation6 + $0x700] sm:$0xff]  ;;  %v8434_v13 = vcombine.high %v3723_v8, %v3727_v9 }
 0x22a   : > { %6708 = vmatpush1.bf16.msra.mxu0 %v8361_v20  ;;  %v3855_v36 = vld [vmem:[#allocation6 + $0x720] sm:$0xff] }
 0x22b   : > { %6709 = vmatprep.subr.bf16.mxu0 %v8354_v4  ;;  %v8562_v16 = vcombine.high %v3851_v10, %v3855_v36  ;;  %v3715_v14 = vld [vmem:[#allocation6 + $0x2c0] sm:$0xff]  ;;  %v8433_v4 = vcombine.low %v3723_v8, %v3727_v9 }
 0x22c   : > { %6749 = vmatpush1.bf16.msra.mxu1 %v8489_v21  ;;  %v3719_v15 = vld [vmem:[#allocation6 + $0x2e0] sm:$0xff]  ;;  %v797_v21 = vrot.slane %v757_v17, %v9376_v61  ;;  %v3611_v17 = vsel %vm3595_vm4, %v9404_v26, %v3603_v0 }
 0x22d   : > { %6750 = vmatprep.subr.bf16.mxu1 %v8482_v22  ;;  %v3843_v18 = vld [vmem:[#allocation6 + $0x6c0] sm:$0xff]  ;;  %v8561_v22 = vcombine.low %v3851_v10, %v3855_v36  ;;  %v8426_v23 = vcombine.high %v3715_v14, %v3719_v15  ;;  %v8425_v35 = vcombine.low %v3715_v14, %v3719_v15 }
 0x22e   : > { %6710 = vmatpush1.bf16.msra.mxu0 %v8353_v27  ;;  %v3847_v20 = vld [vmem:[#allocation6 + $0x6e0] sm:$0xff] }
 0x22f   : > { %6711 = vmatprep.subr.bf16.mxu0 %v8346_v31  ;;  %v8554_v29 = vcombine.high %v3843_v18, %v3847_v20  ;;  %v3707_v24 = vld [vmem:[#allocation6 + $0x280] sm:$0xff]  ;;  %v8553_v39 = vcombine.low %v3843_v18, %v3847_v20 }
 0x230   : > { %6751 = vmatpush1.bf16.msra.mxu1 %v8481_v59  ;;  %v3711_v25 = vld [vmem:[#allocation6 + $0x2a0] sm:$0xff] }
 0x231   : > { %6752 = vmatprep.subr.bf16.mxu1 %v8474_v32  ;;  %v3835_v59 = vld [vmem:[#allocation6 + $0x680] sm:$0xff] }
 0x232   : > { %6712 = vmatpush1.bf16.msra.mxu0 %v8345_v41  ;;  %v3839_v31 = vld [vmem:[#allocation6 + $0x6a0] sm:$0xff]  ;;  %v8418_v41 = vcombine.high %v3707_v24, %v3711_v25 }
 0x233   : > { %6713 = vmatprep.subr.bf16.mxu0 %v8338_v30  ;;  %v3699_v49 = vld [vmem:[#allocation6 + $0x240] sm:$0xff]  ;;  %v8545_v48 = vcombine.low %v3835_v59, %v3839_v31 }
 0x234   : > { %6753 = vmatpush1.bf16.msra.mxu1 %v8473_v42  ;;  %v3703_v44 = vld [vmem:[#allocation6 + $0x260] sm:$0xff] }
 0x235   : > { %6754 = vmatprep.subr.bf16.mxu1 %v8466_v43  ;;  %v8546_v43 = vcombine.high %v3835_v59, %v3839_v31  ;;  %v3827_v58 = vld [vmem:[#allocation6 + $0x640] sm:$0xff]  ;;  %v8410_v51 = vcombine.high %v3699_v49, %v3703_v44  ;;  %v8409_v62 = vcombine.low %v3699_v49, %v3703_v44 }
 0x236   : > { %6714 = vmatpush1.bf16.msra.mxu0 %v8337_v46  ;;  %v3831_v46 = vld [vmem:[#allocation6 + $0x660] sm:$0xff] }
 0x237   : > { %6715 = vmatprep.subr.bf16.mxu0 %v8458_v47  ;;  %v8417_v47 = vcombine.low %v3707_v24, %v3711_v25  ;;  %v8538_v54 = vcombine.high %v3827_v58, %v3831_v46  ;;  %v8537_v63 = vcombine.low %v3827_v58, %v3831_v46  ;;  %v4067_v8 = vld [vmem:[#allocation6 + $0xdc0] sm:$0xff] }
 0x238   : > { %6755 = vmatpush1.bf16.msra.mxu1 %v8465_v28  ;;  %v4071_v9 = vld [vmem:[#allocation6 + $0xde0] sm:$0xff] }
 0x239   : > { %6756 = vmatprep.subr.bf16.mxu1 %v8586_v34  ;;  %v4059_v15 = vld [vmem:[#allocation6 + $0xd80] sm:$0xff] }
 0x23a   : > { %6716 = vmatpush2.bf16.msra.mxu0 %v8457_v40  ;;  %v3691_v40 = vld [vmem:[#allocation6 + $0x200] sm:$0xff] }
 0x23b   : > { %6717 = vmatprep.subr.bf16.mxu0 %v8450_v57  ;;  %v3819_v57 = vld [vmem:[#allocation6 + $0x600] sm:$0xff] }
 0x23c   : > { %6757 = vmatpush2.bf16.msra.mxu1 %v8585_v56  ;;  %v3695_v56 = vld [vmem:[#allocation6 + $0x220] sm:$0xff] }
 0x23d   : > { %6758 = vmatprep.subr.bf16.mxu1 %v8578_v60  ;;  %v3823_v60 = vld [vmem:[#allocation6 + $0x620] sm:$0xff]  ;;  %v8402_v3 = vcombine.high %v3691_v40, %v3695_v56  ;;  %v8401_v10 = vcombine.low %v3691_v40, %v3695_v56 }
 0x23e   : > { %6718 = vmatpush2.bf16.msra.mxu0 %v8449_v2  ;;  %v8530_v2 = vcombine.high %v3819_v57, %v3823_v60  ;;  %v8529_v36 = vcombine.low %v3819_v57, %v3823_v60  ;;  %v4063_v18 = vld [vmem:[#allocation6 + $0xda0] sm:$0xff] }
 0x23f   : > { %6719 = vmatprep.subr.bf16.mxu0 %v8442_v37  ;;  %v3943_v37 = vld [vmem:[#allocation6 + $0x9e0] sm:$0xff]  ;;  %v8770_v24 = vcombine.high %v4059_v15, %v4063_v18 }
 0x240   : > { %6759 = vmatpush2.bf16.msra.mxu1 %v8577_v6  ;;  %v3939_v6 = vld [vmem:[#allocation6 + $0x9c0] sm:$0xff] }
 0x241   : > { %6760 = vmatprep.subr.bf16.mxu1 %v8570_v7  ;;  %v3605_v7 = vmul.f32 0.2, %v9438_v12  ;;  %v8649_v20 = vcombine.low %v3939_v6, %v3943_v37  ;;  %v3927_v26 = vld [vmem:[#allocation6 + $0x960] sm:$0xff] }
 0x242   : > { %6720 = vmatpush2.bf16.msra.mxu0 %v8441_v11  ;;  %v8650_v11 = vcombine.high %v3939_v6, %v3943_v37  ;;  %v4051_v25 = vld [vmem:[#allocation6 + $0xd40] sm:$0xff] }
 0x243   : > { %6721 = vmatprep.subr.bf16.mxu0 %v8434_v13  ;;  %v3935_v13 = vld [vmem:[#allocation6 + $0x9a0] sm:$0xff]  ;;  %v3613_v14 = vsel %vm3597_vm5, %v9438_v12, %v3605_v7 }
 0x244   : > { %6761 = vmatpush2.bf16.msra.mxu1 %v8569_v1  ;;  %v3931_v1 = vld [vmem:[#allocation6 + $0x980] sm:$0xff] }
 0x245   : > { %6762 = vmatprep.subr.bf16.mxu1 %v8562_v16  ;;  %v3301_v27 = vpop.f32.mrf.mxu0  ;;  %v8778_v16 = vcombine.high %v4067_v8, %v4071_v9  ;;  %v4055_v12 = vld [vmem:[#allocation6 + $0xd60] sm:$0xff]  ;;  %v8641_v59 = vcombine.low %v3931_v1, %v3935_v13 }
 0x246   : > { %v3302_v32 = vadd.f32 %v3301_v27, %v797_v21  ;;  %6722 = vmatpush2.bf16.msra.mxu0 %v8433_v4  ;;  %v9469_v21 = vpack.c.bf16 %v3611_v17, %v3611_v17  ;;  %v8642_v4 = vcombine.high %v3931_v1, %v3935_v13  ;;  %v4047_v49 = vld [vmem:[#allocation6 + $0xd20] sm:$0xff]  ;;  %v8761_v46 = vcombine.low %v4051_v25, %v4055_v12 }
 0x247   : > { %v3342_v33 = vpop.f32.mrf.mxu1  ;;  %v9457_v38 = vpop.f32.mrf.mxu0  ;;  %6723 = vmatprep.subr.bf16.mxu0 %v8426_v23  ;;  %v9471_v23 = vpack.c.bf16 %v3613_v14, %v3613_v14  ;;  %v3899_v56 = vld [vmem:[#allocation6 + $0x880] sm:$0xff] }
 0x248   : > { %6763 = vmatpush2.bf16.msra.mxu1 %v8561_v22  ;;  %v9459_v42 = vadd.f32 %v3342_v33, %v3302_v32  ;;  %v8777_v22 = vcombine.low %v4067_v8, %v4071_v9  ;;  %v8769_v32 = vcombine.low %v4059_v15, %v4063_v18  ;;  %v3903_v60 = vld [vmem:[#allocation6 + $0x8a0] sm:$0xff] }
 0x249   : > { %v9461_v30 = vpop.f32.mrf.mxu1  ;;  %6764 = vmatprep.subr.bf16.mxu1 %v8554_v29  ;;  %v3305_v45 = vpop.f32.mrf.mxu0  ;;  %v3923_v29 = vld [vmem:[#allocation6 + $0x940] sm:$0xff]  ;;  %v8610_v7 = vcombine.high %v3899_v56, %v3903_v60  ;;  %v8609_v1 = vcombine.low %v3899_v56, %v3903_v60 }
 0x24a   : > { %6724 = vmatpush2.bf16.msra.mxu0 %v8425_v35  ;;  %v8634_v31 = vcombine.high %v3923_v29, %v3927_v26  ;;  %v3915_v35 = vld [vmem:[#allocation6 + $0x900] sm:$0xff]  ;;  %v8633_v45 = vcombine.low %v3923_v29, %v3927_v26 }
 0x24b   : > { %v3346_v28 = vpop.f32.mrf.mxu1  ;;  %v3306_v34 = vpop.f32.mrf.mxu0  ;;  %6725 = vmatprep.subr.bf16.mxu0 %v8418_v41  ;;  %v8762_v41 = vcombine.high %v4051_v25, %v4055_v12  ;;  %v4027_v0 = vld [vmem:[#allocation6 + $0xc80] sm:$0xff] }
 0x24c   : > { %6765 = vmatpush2.bf16.msra.mxu1 %v8553_v39  ;;  %v3919_v39 = vld [vmem:[#allocation6 + $0x920] sm:$0xff] }
 0x24d   : > { %v3347_v53 = vpop.f32.mrf.mxu1  ;;  %6766 = vmatprep.subr.bf16.mxu1 %v8546_v43  ;;  %v4043_v43 = vld [vmem:[#allocation6 + $0xd00] sm:$0xff]  ;;  %v8626_v58 = vcombine.high %v3915_v35, %v3919_v39 }
 0x24e   : > { %6726 = vmatpush2.bf16.msra.mxu0 %v8417_v47  ;;  %v3907_v47 = vld [vmem:[#allocation6 + $0x8c0] sm:$0xff]  ;;  %v8753_v57 = vcombine.low %v4043_v43, %v4047_v49 }
 0x24f   : > { %6727 = vmatprep.subr.bf16.mxu0 %v8410_v51  ;;  %v3911_v34 = vld [vmem:[#allocation6 + $0x8e0] sm:$0xff] }
 0x250   : > { %6767 = vmatpush2.bf16.msra.mxu1 %v8545_v48  ;;  %v8754_v48 = vcombine.high %v4043_v43, %v4047_v49  ;;  %v4035_v51 = vld [vmem:[#allocation6 + $0xcc0] sm:$0xff]  ;;  %v8618_v40 = vcombine.high %v3907_v47, %v3911_v34  ;;  %v8617_v6 = vcombine.low %v3907_v47, %v3911_v34 }
 0x251   : > { %6768 = vmatprep.subr.bf16.mxu1 %v8538_v54  ;;  %v4039_v53 = vld [vmem:[#allocation6 + $0xce0] sm:$0xff]  ;;  %v8625_v54 = vcombine.low %v3915_v35, %v3919_v39 }
 0x252   : > { %6728 = vmatpush2.bf16.msra.mxu0 %v8409_v62  ;;  %v8746_v62 = vcombine.high %v4035_v51, %v4039_v53  ;;  %v8745_v8 = vcombine.low %v4035_v51, %v4039_v53  ;;  %v3891_v9 = vld [vmem:[#allocation6 + $0x840] sm:$0xff] }
 0x253   : > { %6729 = vmatprep.subr.bf16.mxu0 %v8402_v3  ;;  %v9481_v3 = vld [vmem:[#allocation6 + $0x5e8] sm:$0xff]  ;;  %v4023_v17 = vld [vmem:[#allocation6 + $0xc60] sm:$0xff] }
 0x254   : > { %6769 = vmatpush2.bf16.msra.mxu1 %v8537_v63  ;;  %v9479_v63 = vld [vmem:[#allocation6 + $0x5c8] sm:$0xff]  ;;  %v3883_v14 = vld [vmem:[#allocation6 + $0x800] sm:$0xff] }
 0x255   : > { %6770 = vmatprep.subr.bf16.mxu1 %v8530_v2  ;;  %v4031_v2 = vld [vmem:[#allocation6 + $0xca0] sm:$0xff]  ;;  %v8523_v37 = vcombine.low %v9479_v63, %v9481_v3 }
 0x256   : > { %6730 = vmatpush2.bf16.msra.mxu0 %v8401_v10  ;;  %v3895_v10 = vld [vmem:[#allocation6 + $0x860] sm:$0xff] }
 0x257   : > { %6781 = vmatprep.subr.bf16.mxu0 %v8650_v11  ;;  %v4019_v11 = vld [vmem:[#allocation6 + $0xc40] sm:$0xff]  ;;  %v8602_v13 = vcombine.high %v3891_v9, %v3895_v10 }
 0x258   : > { %6771 = vmatpush2.bf16.msra.mxu1 %v8529_v36  ;;  %v8738_v36 = vcombine.high %v4027_v0, %v4031_v2  ;;  %v3887_v15 = vld [vmem:[#allocation6 + $0x820] sm:$0xff]  ;;  %v8730_v18 = vcombine.high %v4019_v11, %v4023_v17  ;;  %v8729_v26 = vcombine.low %v4019_v11, %v4023_v17 }
 0x259   : > { %6822 = vmatprep.subr.bf16.mxu1 %v8778_v16  ;;  %6732 = vmatmul.mubr.bf16.vlgmr.msra.gmra.mxu0 %v9469_v21  ;;  %v8737_v16 = vcombine.low %v4027_v0, %v4031_v2  ;;  %v8594_v29 = vcombine.high %v3883_v14, %v3887_v15  ;;  %v4007_v25 = vld [vmem:[#allocation6 + $0xbe0] sm:$0xff] }
 0x25a   : > { %6782 = vmatpush1.bf16.msra.mxu0 %v8649_v20  ;;  %v4011_v20 = vld [vmem:[#allocation6 + $0xc00] sm:$0xff] }
 0x25b   : > { %v9474_v27 = vpop.f32.mrf.mxu1  ;;  %6773 = vmatmul.mubr.bf16.vlgmr.msra.gmra.mxu1 %v9471_v23  ;;  %6783 = vmatprep.subr.bf16.mxu0 %v8642_v4  ;;  %v4015_v4 = vld [vmem:[#allocation6 + $0xc20] sm:$0xff] }
 0x25c   : > { %6823 = vmatpush1.bf16.msra.mxu1 %v8777_v22  ;;  %v8601_v22 = vcombine.low %v3891_v9, %v3895_v10  ;;  %v8722_v12 = vcombine.high %v4011_v20, %v4015_v4  ;;  %v8721_v39 = vcombine.low %v4011_v20, %v4015_v4  ;;  %v3999_v43 = vld [vmem:[#allocation6 + $0xba0] sm:$0xff] }
 0x25d   : > { %v9477_v33 = vpop.f32.mrf.mxu1  ;;  %6824 = vmatprep.subr.bf16.mxu1 %v8770_v24  ;;  %v4003_v24 = vld [vmem:[#allocation6 + $0xbc0] sm:$0xff] }
 0x25e   : > { %6784 = vmatpush1.bf16.msra.mxu0 %v8641_v59  ;;  %v4131_v59 = vld [vmem:[#allocation6 + $0xfc0] sm:$0xff]  ;;  %v8714_v35 = vcombine.high %v4003_v24, %v4007_v25 }
 0x25f   : > { %v3428_v44 = vpop.f32.mrf.mxu1  ;;  %6785 = vmatprep.subr.bf16.mxu0 %v8634_v31  ;;  %v4135_v31 = vld [vmem:[#allocation6 + $0xfe0] sm:$0xff] }
 0x260   : > { %6825 = vmatpush1.bf16.msra.mxu1 %v8769_v32  ;;  %v8593_v32 = vcombine.low %v3883_v14, %v3887_v15  ;;  %v8842_v49 = vcombine.high %v4131_v59, %v4135_v31  ;;  %v4123_v44 = vld [vmem:[#allocation6 + $0xf80] sm:$0xff] }
 0x261   : > { %v3429_v28 = vpop.f32.mrf.mxu1  ;;  %6826 = vmatprep.subr.bf16.mxu1 %v8762_v41  ;;  %v3995_v41 = vld [vmem:[#allocation6 + $0xb80] sm:$0xff] }
 0x262   : > { %6786 = vmatpush1.bf16.msra.mxu0 %v8633_v45  ;;  %v4127_v45 = vld [vmem:[#allocation6 + $0xfa0] sm:$0xff]  ;;  %v8841_v28 = vcombine.low %v4131_v59, %v4135_v31 }
 0x263   : > { %6787 = vmatprep.subr.bf16.mxu0 %v8626_v58  ;;  %v8713_v58 = vcombine.low %v4003_v24, %v4007_v25  ;;  %v3987_v47 = vld [vmem:[#allocation6 + $0xb40] sm:$0xff] }
 0x264   : > { %6827 = vmatpush1.bf16.msra.mxu1 %v8761_v46  ;;  %v8706_v46 = vcombine.high %v3995_v41, %v3999_v43  ;;  %v3991_v34 = vld [vmem:[#allocation6 + $0xb60] sm:$0xff] }
 0x265   : > { %6828 = vmatprep.subr.bf16.mxu1 %v8754_v48  ;;  %v8834_v48 = vcombine.high %v4123_v44, %v4127_v45  ;;  %v4115_v51 = vld [vmem:[#allocation6 + $0xf40] sm:$0xff]  ;;  %v8698_v56 = vcombine.high %v3987_v47, %v3991_v34 }
 0x266   : > { %6788 = vmatpush1.bf16.msra.mxu0 %v8625_v54  ;;  %v4119_v53 = vld [vmem:[#allocation6 + $0xf60] sm:$0xff]  ;;  %v761_v54 = vrot.slane %v9452_v19, %v9379_v5 }
 0x267   : > { %6789 = vmatprep.subr.bf16.mxu0 %v8618_v40  ;;  %v8705_v40 = vcombine.low %v3995_v41, %v3999_v43  ;;  %v3979_v60 = vld [vmem:[#allocation6 + $0xb00] sm:$0xff]  ;;  %v8826_v0 = vcombine.high %v4115_v51, %v4119_v53  ;;  %v8825_v19 = vcombine.low %v4115_v51, %v4119_v53 }
 0x268   : > { %6829 = vmatpush1.bf16.msra.mxu1 %v8753_v57  ;;  %v8833_v57 = vcombine.low %v4123_v44, %v4127_v45  ;;  %v4107_v2 = vld [vmem:[#allocation6 + $0xf00] sm:$0xff] }
 0x269   : > { %6830 = vmatprep.subr.bf16.mxu1 %v8746_v62  ;;  %v3983_v62 = vld [vmem:[#allocation6 + $0xb20] sm:$0xff] }
 0x26a   : > { %6790 = vmatpush1.bf16.msra.mxu0 %v8617_v6  ;;  %v4111_v6 = vld [vmem:[#allocation6 + $0xf20] sm:$0xff]  ;;  %v8690_v9 = vcombine.high %v3979_v60, %v3983_v62 }
 0x26b   : > { %6791 = vmatprep.subr.bf16.mxu0 %v8610_v7  ;;  %v801_v7 = vrot.slane %v761_v54, %v9376_v61  ;;  %v3971_v10 = vld [vmem:[#allocation6 + $0xac0] sm:$0xff]  ;;  %v8818_v11 = vcombine.high %v4107_v2, %v4111_v6  ;;  %v8817_v15 = vcombine.low %v4107_v2, %v4111_v6 }
 0x26c   : > { %6831 = vmatpush1.bf16.msra.mxu1 %v8745_v8  ;;  %v8697_v8 = vcombine.low %v3987_v47, %v3991_v34  ;;  %v4099_v17 = vld [vmem:[#allocation6 + $0xec0] sm:$0xff] }
 0x26d   : > { %6832 = vmatprep.subr.bf16.mxu1 %v8738_v36  ;;  %v3975_v36 = vld [vmem:[#allocation6 + $0xae0] sm:$0xff] }
 0x26e   : > { %6792 = vmatpush1.bf16.msra.mxu0 %v8609_v1  ;;  %v4103_v1 = vld [vmem:[#allocation6 + $0xee0] sm:$0xff]  ;;  %v8682_v14 = vcombine.high %v3971_v10, %v3975_v36  ;;  %v8681_v25 = vcombine.low %v3971_v10, %v3975_v36  ;;  %v3680_v10 = vld [vmem:[#allocation6 + $0x1a8] sm:$0xff]  ;;  %v8524_v36 = vcombine.high %v9479_v63, %v9481_v3 }
 0x26f   : > { %6793 = vmatprep.subr.bf16.mxu0 %v8602_v13  ;;  %v3304_v13 = vadd.f32 %v9457_v38, %v801_v7  ;;  %v3967_v20 = vld [vmem:[#allocation6 + $0xaa0] sm:$0xff]  ;;  %v8810_v4 = vcombine.high %v4099_v17, %v4103_v1  ;;  %v8809_v59 = vcombine.low %v4099_v17, %v4103_v1 }
 0x270   : > { %6833 = vmatpush1.bf16.msra.mxu1 %v8737_v16  ;;  %v8689_v16 = vcombine.low %v3979_v60, %v3983_v62  ;;  %v4087_v44 = vld [vmem:[#allocation6 + $0xe60] sm:$0xff] }
 0x271   : > { %6834 = vmatprep.subr.bf16.mxu1 %v8730_v18  ;;  %v3963_v18 = vld [vmem:[#allocation6 + $0xa80] sm:$0xff]  ;;  %v3345_v24 = vadd.f32 %v9461_v30, %v3304_v13  ;;  %v3668_v13 = vld [vmem:[#allocation6 + $0x148] sm:$0xff] }
 0x272   : > { %6794 = vmatpush1.bf16.msra.mxu0 %v8601_v22  ;;  %v8674_v38 = vcombine.high %v3963_v18, %v3967_v20  ;;  %v8673_v30 = vcombine.low %v3963_v18, %v3967_v20  ;;  %v3947_v34 = vld [vmem:[#allocation6 + $0xa00] sm:$0xff] }
 0x273   : > { %6795 = vmatprep.subr.bf16.mxu0 %v8594_v29  ;;  %v4091_v29 = vld [vmem:[#allocation6 + $0xe80] sm:$0xff] }
 0x274   : > { %6835 = vmatpush1.bf16.msra.mxu1 %v8729_v26  ;;  %v4095_v26 = vld [vmem:[#allocation6 + $0xea0] sm:$0xff] }
 0x275   : > { %6836 = vmatprep.subr.bf16.mxu1 %v8722_v12  ;;  %v8802_v41 = vcombine.high %v4091_v29, %v4095_v26  ;;  %v4075_v53 = vld [vmem:[#allocation6 + $0xe00] sm:$0xff] }
 0x276   : > { %6796 = vmatpush1.bf16.msra.mxu0 %v8593_v32  ;;  %v4079_v54 = vld [vmem:[#allocation6 + $0xe20] sm:$0xff] }
 0x277   : > { %6797 = vmatprep.subr.bf16.mxu0 %v8714_v35  ;;  %v3955_v35 = vld [vmem:[#allocation6 + $0xa40] sm:$0xff]  ;;  %v8786_v2 = vcombine.high %v4075_v53, %v4079_v54 }
 0x278   : > { %6837 = vmatpush1.bf16.msra.mxu1 %v8721_v39  ;;  %v3959_v39 = vld [vmem:[#allocation6 + $0xa60] sm:$0xff] }
 0x279   : > { %6838 = vmatprep.subr.bf16.mxu1 %v8842_v49  ;;  %v4083_v49 = vld [vmem:[#allocation6 + $0xe40] sm:$0xff] }
 0x27a   : > { %6798 = vmatpush2.bf16.msra.mxu0 %v8713_v58  ;;  %v8794_v51 = vcombine.high %v4083_v49, %v4087_v44  ;;  %v8793_v60 = vcombine.low %v4083_v49, %v4087_v44  ;;  %v3640_v49 = vld [vmem:[#allocation6 + $0x68] sm:$0xff] }
 0x27b   : > { %6799 = vmatprep.subr.bf16.mxu0 %v8706_v46  ;;  %v8666_v46 = vcombine.high %v3955_v35, %v3959_v39 }
 0x27c   : > { %6839 = vmatpush2.bf16.msra.mxu1 %v8841_v28  ;;  %v8801_v28 = vcombine.low %v4091_v29, %v4095_v26 }
 0x27d   : > { %6840 = vmatprep.subr.bf16.mxu1 %v8834_v48  ;;  %v3951_v48 = vld [vmem:[#allocation6 + $0xa20] sm:$0xff] }
 0x27e   : > { %6800 = vmatpush2.bf16.msra.mxu0 %v8705_v40  ;;  %v8657_v6 = vcombine.low %v3947_v34, %v3951_v48 }
 0x27f   : > { %6801 = vmatprep.subr.bf16.mxu0 %v8698_v56 }
 0x280   : > { %6841 = vmatpush2.bf16.msra.mxu1 %v8833_v57  ;;  %v8658_v57 = vcombine.high %v3947_v34, %v3951_v48 }
 0x281   : > { %6842 = vmatprep.subr.bf16.mxu1 %v8826_v0  ;;  %v3684_v0 = vld [vmem:[#allocation6 + $0x1c8] sm:$0xff] }
 0x282   : > { %6802 = vmatpush2.bf16.msra.mxu0 %v8697_v8  ;;  %v8785_v8 = vcombine.low %v4075_v53, %v4079_v54  ;;  %v3744_v53 = vld [vmem:[#allocation6 + $0x3a8] sm:$0xff] }
 0x283   : > { %6803 = vmatprep.subr.bf16.mxu0 %v8690_v9 }
 0x284   : > { %6843 = vmatpush2.bf16.msra.mxu1 %v8825_v19  ;;  %v3676_v19 = vld [vmem:[#allocation6 + $0x188] sm:$0xff] }
 0x285   : > { %6844 = vmatprep.subr.bf16.mxu1 %v8818_v11  ;;  %v3383_v22 = vpop.f32.mrf.mxu0  ;;  %v8388_v1 = vcombine.high %v3676_v19, %v3680_v10 }
 0x286   : > { %6804 = vmatpush2.bf16.msra.mxu0 %v8689_v16  ;;  %v3384_v31 = vadd.f32 %v3383_v22, %v9459_v42  ;;  %v3672_v16 = vld [vmem:[#allocation6 + $0x168] sm:$0xff] }
 0x287   : > { %v3385_v12 = vpop.f32.mrf.mxu0  ;;  %6805 = vmatprep.subr.bf16.mxu0 %v8682_v14  ;;  %v8380_v18 = vcombine.high %v3668_v13, %v3672_v16  ;;  %v3664_v22 = vld [vmem:[#allocation6 + $0x128] sm:$0xff]  ;;  %v8379_v26 = vcombine.low %v3668_v13, %v3672_v16 }
 0x288   : > { %6845 = vmatpush2.bf16.msra.mxu1 %v8817_v15  ;;  %v3386_v32 = vadd.f32 %v3385_v12, %v3345_v24  ;;  %v3425_v47 = vadd.f32 %v9474_v27, %v3384_v31  ;;  %v3688_v27 = vld [vmem:[#allocation6 + $0x1e8] sm:$0xff]  ;;  %v8387_v15 = vcombine.low %v3676_v19, %v3680_v10 }
 0x289   : > { %6846 = vmatprep.subr.bf16.mxu1 %v8810_v4  ;;  %v3387_v43 = vpop.f32.mrf.mxu0  ;;  %v8396_v7 = vcombine.high %v3684_v0, %v3688_v27  ;;  %v8395_v11 = vcombine.low %v3684_v0, %v3688_v27  ;;  %v3660_v4 = vld [vmem:[#allocation6 + $0x108] sm:$0xff] }
 0x28a   : > { %v3427_v45 = vadd.f32 %v9477_v33, %v3386_v32  ;;  %6806 = vmatpush2.bf16.msra.mxu0 %v8681_v25  ;;  %v8665_v33 = vcombine.low %v3955_v35, %v3959_v39  ;;  %v3607_v62 = vmul.f32 0.2, %v3425_v47  ;;  %vm3599_vm7 = vcmp.gt.f32.partialorder %v3425_v47, 0.0  ;;  %v3652_v12 = vld [vmem:[#allocation6 + $0xc8] sm:$0xff] }
 0x28b   : > { %v3388_v58 = vpop.f32.mrf.mxu0  ;;  %6807 = vmatprep.subr.bf16.mxu0 %v8674_v38  ;;  %v8372_v24 = vcombine.high %v3660_v4, %v3664_v22  ;;  %v3656_v38 = vld [vmem:[#allocation6 + $0xe8] sm:$0xff] }
 0x28c   : > { %6847 = vmatpush2.bf16.msra.mxu1 %v8809_v59  ;;  %vm3600_vm6 = vcmp.gt.f32.partialorder %v3427_v45, 0.0  ;;  %v3608_v42 = vmul.f32 0.2, %v3427_v45  ;;  %v3615_v9 = vsel %vm3599_vm7, %v3425_v47, %v3607_v62  ;;  %v8371_v59 = vcombine.low %v3660_v4, %v3664_v22  ;;  %v3644_v32 = vld [vmem:[#allocation6 + $0x88] sm:$0xff] }
 0x28d   : > { %6848 = vmatprep.subr.bf16.mxu1 %v8802_v41  ;;  %v9498_v17 = vpack.c.bf16 %v3615_v9, %v3615_v9  ;;  %v8364_v31 = vcombine.high %v3652_v12, %v3656_v38  ;;  %v3648_v35 = vld [vmem:[#allocation6 + $0xa8] sm:$0xff]  ;;  %v8363_v39 = vcombine.low %v3652_v12, %v3656_v38 }
 0x28e   : > { %v3616_v40 = vsel %vm3600_vm6, %v3427_v45, %v3608_v42  ;;  %6808 = vmatpush2.bf16.msra.mxu0 %v8673_v30  ;;  %v8356_v41 = vcombine.high %v3644_v32, %v3648_v35  ;;  %v3636_v43 = vld [vmem:[#allocation6 + $0x48] sm:$0xff]  ;;  %v8355_v44 = vcombine.low %v3644_v32, %v3648_v35 }
 0x28f   : > { %v9493_v56 = vpack.c.bf16 %v3616_v40, %v3616_v40  ;;  %6809 = vmatprep.subr.bf16.mxu0 %v8666_v46  ;;  %v8348_v45 = vcombine.high %v3636_v43, %v3640_v49  ;;  %v3628_v30 = vld [vmem:[#allocation6 + $0x8] sm:$0xff]  ;;  %v8347_v46 = vcombine.low %v3636_v43, %v3640_v49 }
 0x290   : > { %6849 = vmatpush2.bf16.msra.mxu1 %v8801_v28  ;;  %v3632_v58 = vld [vmem:[#allocation6 + $0x28] sm:$0xff] }
 0x291   : > { %6850 = vmatprep.subr.bf16.mxu1 %v8794_v51  ;;  %6813 = vmatprep.mubr.bf16.mxu0 %v9493_v56  ;;  %v8340_v28 = vcombine.high %v3628_v30, %v3632_v58  ;;  %v3748_v47 = vld [vmem:[#allocation6 + $0x3c8] sm:$0xff]  ;;  %v8339_v34 = vcombine.low %v3628_v30, %v3632_v58 }
 0x292   : > { %6810 = vmatpush2.bf16.msra.mxu0 %v8665_v33  ;;  %v3752_v42 = vld [vmem:[#allocation6 + $0x3e8] sm:$0xff] }
 0x293   : > { %6811 = vmatprep.subr.bf16.mxu0 %v8658_v57  ;;  %v8460_v48 = vcombine.high %v3748_v47, %v3752_v42  ;;  %v3740_v51 = vld [vmem:[#allocation6 + $0x388] sm:$0xff]  ;;  %v8459_v54 = vcombine.low %v3748_v47, %v3752_v42 }
 0x294   : > { %6851 = vmatpush2.bf16.msra.mxu1 %v8793_v60  ;;  %v8452_v40 = vcombine.high %v3740_v51, %v3744_v53  ;;  %v3732_v33 = vld [vmem:[#allocation6 + $0x348] sm:$0xff]  ;;  %v8451_v60 = vcombine.low %v3740_v51, %v3744_v53 }
 0x295   : > { %6852 = vmatprep.subr.bf16.mxu1 %v8786_v2  ;;  %v3736_v57 = vld [vmem:[#allocation6 + $0x368] sm:$0xff] }
 0x296   : > { %6812 = vmatpush2.bf16.msra.mxu0 %v8657_v6  ;;  %v8444_v62 = vcombine.high %v3732_v33, %v3736_v57  ;;  %v3724_v0 = vld [vmem:[#allocation6 + $0x308] sm:$0xff]  ;;  %v8443_v2 = vcombine.low %v3732_v33, %v3736_v57 }
 0x297   : > { %6863 = vmatprep.subr.bf16.mxu0 %v8396_v7  ;;  %v3728_v27 = vld [vmem:[#allocation6 + $0x328] sm:$0xff] }
 0x298   : > { %6853 = vmatpush2.bf16.msra.mxu1 %v8785_v8  ;;  %v8436_v6 = vcombine.high %v3724_v0, %v3728_v27  ;;  %v3716_v7 = vld [vmem:[#allocation6 + $0x2c8] sm:$0xff]  ;;  %v8435_v9 = vcombine.low %v3724_v0, %v3728_v27 }
 0x299   : > { %6904 = vmatprep.subr.bf16.mxu1 %v8524_v36  ;;  %6814 = vmatmul.mubr.bf16.vlgmr.msra.gmra.mxu0 %v9498_v17  ;;  %v3720_v8 = vld [vmem:[#allocation6 + $0x2e8] sm:$0xff] }
 0x29a   : > { %6864 = vmatpush1.bf16.msra.mxu0 %v8395_v11  ;;  %6895 = vmatprep.mubr.bf16.mxu0 %v9443_v52  ;;  %v8428_v19 = vcombine.high %v3716_v7, %v3720_v8  ;;  %v3708_v10 = vld [vmem:[#allocation6 + $0x288] sm:$0xff] }
 0x29b   : > { %v9501_v14 = vpop.f32.mrf.mxu1  ;;  %6865 = vmatprep.subr.bf16.mxu0 %v8388_v1  ;;  %v3712_v36 = vld [vmem:[#allocation6 + $0x2a8] sm:$0xff]  ;;  %v8427_v1 = vcombine.low %v3716_v7, %v3720_v8 }
 0x29c   : > { %v8420_v16 = vcombine.high %v3708_v10, %v3712_v36  ;;  %v8419_v22 = vcombine.low %v3708_v10, %v3712_v36  ;;  %v3696_v12 = vld [vmem:[#allocation6 + $0x228] sm:$0xff] }
 0x29d   : > { %v9504_v20 = vpop.f32.mrf.mxu1  ;;  %v3940_v32 = vld [vmem:[#allocation6 + $0x9c8] sm:$0xff] }
 0x29e   : > { %6866 = vmatpush1.bf16.msra.mxu0 %v8387_v15  ;;  %v3700_v15 = vld [vmem:[#allocation6 + $0x248] sm:$0xff] }
 0x29f   : > { %v3469_v29 = vpop.f32.mrf.mxu1  ;;  %6867 = vmatprep.subr.bf16.mxu0 %v8380_v18  ;;  %v3704_v18 = vld [vmem:[#allocation6 + $0x268] sm:$0xff] }
 0x2a0   : > { %v8411_v38 = vcombine.low %v3700_v15, %v3704_v18  ;;  %v3944_v35 = vld [vmem:[#allocation6 + $0x9e8] sm:$0xff] }
 0x2a1   : > { %v3470_v25 = vpop.f32.mrf.mxu1  ;;  %v8652_v49 = vcombine.high %v3940_v32, %v3944_v35  ;;  %v8651_v58 = vcombine.low %v3940_v32, %v3944_v35  ;;  %v3924_v47 = vld [vmem:[#allocation6 + $0x948] sm:$0xff] }
 0x2a2   : > { %6868 = vmatpush1.bf16.msra.mxu0 %v8379_v26  ;;  %v8412_v26 = vcombine.high %v3700_v15, %v3704_v18  ;;  %v3692_v25 = vld [vmem:[#allocation6 + $0x208] sm:$0xff] }
 0x2a3   : > { %6869 = vmatprep.subr.bf16.mxu0 %v8372_v24  ;;  %v299_v24 = vld [vmem:[#allocation9 + $0x18] sm:$0xff]  ;;  %v3928_v42 = vld [vmem:[#allocation6 + $0x968] sm:$0xff] }
 0x2a4   : > { %v3920_v0 = vld [vmem:[#allocation6 + $0x928] sm:$0xff]  ;;  %v8635_v7 = vcombine.low %v3924_v47, %v3928_v42 }
 0x2a5   : > { %v3804_v18 = vld [vmem:[#allocation6 + $0x588] sm:$0xff] }
 0x2a6   : > { %6870 = vmatpush1.bf16.msra.mxu0 %v8371_v59  ;;  %v765_v59 = vrot.slane %v299_v24, %v9376_v61  ;;  %v3800_v32 = vld [vmem:[#allocation6 + $0x568] sm:$0xff] }
 0x2a7   : > { %6871 = vmatprep.subr.bf16.mxu0 %v8364_v31  ;;  %v8404_v31 = vcombine.high %v3692_v25, %v3696_v12 }
 0x2a8   : > { %v805_v43 = vrot.slane %v765_v59, %v9376_v61 }
 0x2aa   : > { %6872 = vmatpush1.bf16.msra.mxu0 %v8363_v39  ;;  %v769_v39 = vrot.slane %v299_v24, %v9379_v5  ;;  %v3900_v24 = vld [vmem:[#allocation6 + $0x888] sm:$0xff] }
 0x2ab   : > { %6873 = vmatprep.subr.bf16.mxu0 %v8356_v41  ;;  %v8403_v41 = vcombine.low %v3692_v25, %v3696_v12  ;;  %v3904_v25 = vld [vmem:[#allocation6 + $0x8a8] sm:$0xff] }
 0x2ac   : > { %v809_v30 = vrot.slane %v769_v39, %v9376_v61  ;;  %v8612_v35 = vcombine.high %v3900_v24, %v3904_v25 }
 0x2ae   : > { %6874 = vmatpush1.bf16.msra.mxu0 %v8355_v44  ;;  %v3932_v44 = vld [vmem:[#allocation6 + $0x988] sm:$0xff] }
 0x2af   : > { %6875 = vmatprep.subr.bf16.mxu0 %v8348_v45  ;;  %v3936_v45 = vld [vmem:[#allocation6 + $0x9a8] sm:$0xff] }
 0x2b2   : > { %6876 = vmatpush1.bf16.msra.mxu0 %v8347_v46  ;;  %v3466_v46 = vadd.f32 %v9501_v14, %v805_v43  ;;  %v8636_v14 = vcombine.high %v3924_v47, %v3928_v42  ;;  %v3896_v43 = vld [vmem:[#allocation6 + $0x868] sm:$0xff] }
 0x2b3   : > { %6877 = vmatprep.subr.bf16.mxu0 %v8340_v28  ;;  %v8644_v28 = vcombine.high %v3932_v44, %v3936_v45  ;;  %v3888_v47 = vld [vmem:[#allocation6 + $0x828] sm:$0xff] }
 0x2b4   : > { %v3784_v42 = vld [vmem:[#allocation6 + $0x4e8] sm:$0xff] }
 0x2b6   : > { %6878 = vmatpush1.bf16.msra.mxu0 %v8339_v34  ;;  %v3468_v34 = vadd.f32 %v9504_v20, %v809_v30  ;;  %v3792_v30 = vld [vmem:[#allocation6 + $0x528] sm:$0xff] }
 0x2b7   : > { %6879 = vmatprep.subr.bf16.mxu0 %v8460_v48 }
 0x2ba   : > { %6880 = vmatpush2.bf16.msra.mxu0 %v8459_v54  ;;  %v8643_v54 = vcombine.low %v3932_v44, %v3936_v45  ;;  %v8611_v44 = vcombine.low %v3900_v24, %v3904_v25  ;;  %v3788_v45 = vld [vmem:[#allocation6 + $0x508] sm:$0xff] }
 0x2bb   : > { %6881 = vmatprep.subr.bf16.mxu0 %v8452_v40  ;;  %v8500_v63 = vcombine.high %v3788_v45, %v3792_v30  ;;  %v3880_v24 = vld [vmem:[#allocation6 + $0x7e8] sm:$0xff] }
 0x2be   : > { %6882 = vmatpush2.bf16.msra.mxu0 %v8451_v60 }
 0x2bf   : > { %6883 = vmatprep.subr.bf16.mxu0 %v8444_v62  ;;  %v3916_v62 = vld [vmem:[#allocation6 + $0x908] sm:$0xff] }
 0x2c0   : > { %v8628_v10 = vcombine.high %v3916_v62, %v3920_v0  ;;  %v8627_v15 = vcombine.low %v3916_v62, %v3920_v0  ;;  %v3996_v62 = vld [vmem:[#allocation6 + $0xb88] sm:$0xff] }
 0x2c1   : > { %v4000_v0 = vld [vmem:[#allocation6 + $0xba8] sm:$0xff] }
 0x2c2   : > { %6884 = vmatpush2.bf16.msra.mxu0 %v8443_v2 }
 0x2c3   : > { %6885 = vmatprep.subr.bf16.mxu0 %v8436_v6 }
 0x2c5   : > { %v3506_v11 = vpop.f32.mrf.mxu0 }
 0x2c6   : > { %6886 = vmatpush2.bf16.msra.mxu0 %v8435_v9  ;;  %v3507_v48 = vadd.f32 %v3506_v11, %v3466_v46  ;;  %v3908_v11 = vld [vmem:[#allocation6 + $0x8c8] sm:$0xff] }
 0x2c7   : > { %v3508_v13 = vpop.f32.mrf.mxu0  ;;  %6887 = vmatprep.subr.bf16.mxu0 %v8428_v19 }
 0x2c8   : > { %v3509_v40 = vadd.f32 %v3508_v13, %v3468_v34 }
 0x2c9   : > { %v3510_v4 = vpop.f32.mrf.mxu0 }
 0x2ca   : > { %6888 = vmatpush2.bf16.msra.mxu0 %v8427_v1  ;;  %v3912_v1 = vld [vmem:[#allocation6 + $0x8e8] sm:$0xff] }
 0x2cb   : > { %v3511_v29 = vpop.f32.mrf.mxu0  ;;  %6889 = vmatprep.subr.bf16.mxu0 %v8420_v16  ;;  %v3808_v4 = vld [vmem:[#allocation6 + $0x5a8] sm:$0xff]  ;;  %v8619_v59 = vcombine.low %v3908_v11, %v3912_v1 }
 0x2cc   : > { %v8620_v29 = vcombine.high %v3908_v11, %v3912_v1  ;;  %v8515_v39 = vcombine.low %v3804_v18, %v3808_v4  ;;  %v3756_v11 = vld [vmem:[#allocation6 + $0x408] sm:$0xff] }
 0x2cd   : > { %v3760_v1 = vld [vmem:[#allocation6 + $0x428] sm:$0xff] }
 0x2ce   : > { %6890 = vmatpush2.bf16.msra.mxu0 %v8419_v22 }
 0x2cf   : > { %6891 = vmatprep.subr.bf16.mxu0 %v8412_v26 }
 0x2d2   : > { %6892 = vmatpush2.bf16.msra.mxu0 %v8411_v38  ;;  %v8516_v38 = vcombine.high %v3804_v18, %v3808_v4  ;;  %v3984_v18 = vld [vmem:[#allocation6 + $0xb28] sm:$0xff]  ;;  %v8468_v4 = vcombine.high %v3756_v11, %v3760_v1 }
 0x2d3   : > { %6893 = vmatprep.subr.bf16.mxu0 %v8404_v31  ;;  %v3796_v31 = vld [vmem:[#allocation6 + $0x548] sm:$0xff] }
 0x2d4   : > { %v8507_v46 = vcombine.low %v3796_v31, %v3800_v32 }
 0x2d6   : > { %6894 = vmatpush2.bf16.msra.mxu0 %v8403_v41  ;;  %v3892_v41 = vld [vmem:[#allocation6 + $0x848] sm:$0xff] }
 0x2d7   : > { %6945 = vmatprep.subr.bf16.mxu0 %v8652_v49  ;;  %v8508_v49 = vcombine.high %v3796_v31, %v3800_v32  ;;  %v8603_v3 = vcombine.low %v3892_v41, %v3896_v43  ;;  %v3976_v31 = vld [vmem:[#allocation6 + $0xae8] sm:$0xff] }
 0x2d9   : > { %v3588_v51 = vpop.f32.mrf.mxu0  ;;  %6896 = vmatmul.mubr.bf16.vlgmr.msra.gmra.mxu0 %v9469_v21 }
 0x2da   : > { %6946 = vmatpush1.bf16.msra.mxu0 %v8651_v58  ;;  %6977 = vmatprep.mubr.bf16.mxu0 %v9493_v56  ;;  %v8604_v58 = vcombine.high %v3892_v41, %v3896_v43  ;;  %v3872_v41 = vld [vmem:[#allocation6 + $0x7a8] sm:$0xff] }
 0x2db   : > { %v3547_v53 = vpop.f32.mrf.mxu1  ;;  %v3590_v57 = vpop.f32.mrf.mxu0  ;;  %6947 = vmatprep.subr.bf16.mxu0 %v8644_v28  ;;  %v3884_v28 = vld [vmem:[#allocation6 + $0x808] sm:$0xff] }
 0x2dc   : > { %v3548_v33 = vadd.f32 %v3547_v53, %v3507_v48  ;;  %v8596_v34 = vcombine.high %v3884_v28, %v3888_v47  ;;  %v8499_v48 = vcombine.low %v3788_v45, %v3792_v30  ;;  %v4008_v53 = vld [vmem:[#allocation6 + $0xbe8] sm:$0xff] }
 0x2dd   : > { %v3549_v60 = vpop.f32.mrf.mxu1  ;;  %v3592_v20 = vpop.f32.mrf.mxu0  ;;  %v3968_v45 = vld [vmem:[#allocation6 + $0xaa8] sm:$0xff] }
 0x2de   : > { %v3589_v27 = vadd.f32 %v3588_v51, %v3548_v33  ;;  %v3550_v2 = vadd.f32 %v3549_v60, %v3509_v40  ;;  %6948 = vmatpush1.bf16.msra.mxu0 %v8643_v54  ;;  %v4004_v51 = vld [vmem:[#allocation6 + $0xbc8] sm:$0xff]  ;;  %v8595_v40 = vcombine.low %v3884_v28, %v3888_v47 }
 0x2df   : > { %v3551_v6 = vpop.f32.mrf.mxu1  ;;  %v3593_v19 = vpop.f32.mrf.mxu0  ;;  %6949 = vmatprep.subr.bf16.mxu0 %v8636_v14  ;;  %v3772_v33 = vld [vmem:[#allocation6 + $0x488] sm:$0xff]  ;;  %v8716_v14 = vcombine.high %v4004_v51, %v4008_v53 }
 0x2e0   : > { %vm3601_vm8 = vcmp.gt.f32.partialorder %v3589_v27, 0.0  ;;  %v3609_v8 = vmul.f32 0.2, %v3589_v27  ;;  %v3591_v9 = vadd.f32 %v3590_v57, %v3550_v2  ;;  %v3776_v57 = vld [vmem:[#allocation6 + $0x4a8] sm:$0xff]  ;;  %v8715_v2 = vcombine.low %v4004_v51, %v4008_v53 }
 0x2e1   : > { %v3552_v36 = vpop.f32.mrf.mxu1  ;;  %v3764_v20 = vld [vmem:[#allocation6 + $0x448] sm:$0xff] }
 0x2e2   : > { %vm3602_vm9 = vcmp.gt.f32.partialorder %v3591_v9, 0.0  ;;  %v3610_v13 = vmul.f32 0.2, %v3591_v9  ;;  %v3617_v16 = vsel %vm3601_vm8, %v3589_v27, %v3609_v8  ;;  %6950 = vmatpush1.bf16.msra.mxu0 %v8635_v7  ;;  %v8484_v27 = vcombine.high %v3772_v33, %v3776_v57  ;;  %v3768_v6 = vld [vmem:[#allocation6 + $0x468] sm:$0xff] }
 0x2e3   : > { %6951 = vmatprep.subr.bf16.mxu0 %v8628_v10  ;;  %v9516_v12 = vpack.c.bf16 %v3617_v16, %v3617_v16  ;;  %v8708_v7 = vcombine.high %v3996_v62, %v4000_v0  ;;  %v8483_v8 = vcombine.low %v3772_v33, %v3776_v57  ;;  %v3992_v19 = vld [vmem:[#allocation6 + $0xb68] sm:$0xff]  ;;  %v8476_v10 = vcombine.high %v3764_v20, %v3768_v6 }
 0x2e4   : > { %v3618_v22 = vsel %vm3602_vm9, %v3591_v9, %v3610_v13  ;;  %v3988_v9 = vld [vmem:[#allocation6 + $0xb48] sm:$0xff]  ;;  %v8707_v36 = vcombine.low %v3996_v62, %v4000_v0  ;;  %v8475_v16 = vcombine.low %v3764_v20, %v3768_v6  ;;  %v3689_v20 = vld [vmem:[#allocation6 + $0x1f0] sm:$0xff] }
 0x2e5   : > { %v9514_v26 = vpack.c.bf16 %v3618_v22, %v3618_v22  ;;  %v8700_v13 = vcombine.high %v3988_v9, %v3992_v19  ;;  %v8699_v22 = vcombine.low %v3988_v9, %v3992_v19  ;;  %v3864_v28 = vld [vmem:[#allocation6 + $0x768] sm:$0xff] }
 0x2e6   : > { %6952 = vmatpush1.bf16.msra.mxu0 %v8627_v15  ;;  %v3980_v15 = vld [vmem:[#allocation6 + $0xb08] sm:$0xff] }
 0x2e7   : > { %6854 = vmatprep.mubr.bf16.mxu1 %v9514_v26  ;;  %6953 = vmatprep.subr.bf16.mxu0 %v8620_v29  ;;  %v3876_v29 = vld [vmem:[#allocation6 + $0x7c8] sm:$0xff]  ;;  %v8692_v25 = vcombine.high %v3980_v15, %v3984_v18 }
 0x2e8   : > { %6855 = vmatmul.mubr.bf16.vlgmr.msra.gmra.mxu1 %v9516_v12  ;;  %v8588_v32 = vcombine.high %v3876_v29, %v3880_v24  ;;  %v3856_v51 = vld [vmem:[#allocation6 + $0x728] sm:$0xff] }
 0x2e9   : > { %6905 = vmatpush1.bf16.msra.mxu1 %v8523_v37  ;;  %6936 = vmatprep.mubr.bf16.mxu1 %v9447_v55  ;;  %v3780_v37 = vld [vmem:[#allocation6 + $0x4c8] sm:$0xff] }
 0x2ea   : > { %6906 = vmatprep.subr.bf16.mxu1 %v8516_v38  ;;  %6954 = vmatpush1.bf16.msra.mxu0 %v8619_v59  ;;  %v8492_v54 = vcombine.high %v3780_v37, %v3784_v42  ;;  %v8491_v60 = vcombine.low %v3780_v37, %v3784_v42  ;;  %v8467_v38 = vcombine.low %v3756_v11, %v3760_v1  ;;  %v3972_v59 = vld [vmem:[#allocation6 + $0xac8] sm:$0xff]  ;;  %v3681_v11 = vld [vmem:[#allocation6 + $0x1b0] sm:$0xff] }
 0x2eb   : > { %6955 = vmatprep.subr.bf16.mxu0 %v8612_v35  ;;  %v8691_v35 = vcombine.low %v3980_v15, %v3984_v18  ;;  %v8684_v43 = vcombine.high %v3972_v59, %v3976_v31  ;;  %v3960_v37 = vld [vmem:[#allocation6 + $0xa68] sm:$0xff] }
 0x2ec   : > { %v3952_v33 = vld [vmem:[#allocation6 + $0xa28] sm:$0xff] }
 0x2ed   : > { %6907 = vmatpush1.bf16.msra.mxu1 %v8515_v39  ;;  %v3868_v39 = vld [vmem:[#allocation6 + $0x788] sm:$0xff] }
 0x2ee   : > { %6908 = vmatprep.subr.bf16.mxu1 %v8508_v49  ;;  %6956 = vmatpush1.bf16.msra.mxu0 %v8611_v44  ;;  %v8587_v49 = vcombine.low %v3876_v29, %v3880_v24  ;;  %v3964_v44 = vld [vmem:[#allocation6 + $0xa88] sm:$0xff]  ;;  %v8580_v30 = vcombine.high %v3868_v39, %v3872_v41  ;;  %v3673_v29 = vld [vmem:[#allocation6 + $0x170] sm:$0xff] }
 0x2ef   : > { %6957 = vmatprep.subr.bf16.mxu0 %v8604_v58  ;;  %v8683_v58 = vcombine.low %v3972_v59, %v3976_v31  ;;  %v8676_v47 = vcombine.high %v3964_v44, %v3968_v45  ;;  %v3848_v62 = vld [vmem:[#allocation6 + $0x6e8] sm:$0xff] }
 0x2f0   : > { %v3840_v9 = vld [vmem:[#allocation6 + $0x6a8] sm:$0xff] }
 0x2f1   : > { %6909 = vmatpush1.bf16.msra.mxu1 %v8507_v46  ;;  %v3860_v46 = vld [vmem:[#allocation6 + $0x748] sm:$0xff] }
 0x2f2   : > { %6910 = vmatprep.subr.bf16.mxu1 %v8500_v63  ;;  %6958 = vmatpush1.bf16.msra.mxu0 %v8603_v3  ;;  %v8579_v63 = vcombine.low %v3868_v39, %v3872_v41  ;;  %v3956_v3 = vld [vmem:[#allocation6 + $0xa48] sm:$0xff]  ;;  %v8572_v42 = vcombine.high %v3860_v46, %v3864_v28 }
 0x2f3   : > { %6959 = vmatprep.subr.bf16.mxu0 %v8596_v34  ;;  %v8675_v34 = vcombine.low %v3964_v44, %v3968_v45  ;;  %v8668_v53 = vcombine.high %v3956_v3, %v3960_v37  ;;  %v3832_v15 = vld [vmem:[#allocation6 + $0x668] sm:$0xff]  ;;  %v3661_v44 = vld [vmem:[#allocation6 + $0x110] sm:$0xff] }
 0x2f4   : > { %v3820_v31 = vld [vmem:[#allocation6 + $0x608] sm:$0xff]  ;;  %v3665_v45 = vld [vmem:[#allocation6 + $0x130] sm:$0xff] }
 0x2f5   : > { %6911 = vmatpush1.bf16.msra.mxu1 %v8499_v48  ;;  %v3852_v48 = vld [vmem:[#allocation6 + $0x708] sm:$0xff] }
 0x2f6   : > { %6912 = vmatprep.subr.bf16.mxu1 %v8492_v54  ;;  %6960 = vmatpush1.bf16.msra.mxu0 %v8595_v40  ;;  %v8571_v54 = vcombine.low %v3860_v46, %v3864_v28  ;;  %v3948_v40 = vld [vmem:[#allocation6 + $0xa08] sm:$0xff]  ;;  %v8564_v57 = vcombine.high %v3852_v48, %v3856_v51 }
 0x2f7   : > { %6961 = vmatprep.subr.bf16.mxu0 %v8716_v14  ;;  %v8667_v14 = vcombine.low %v3956_v3, %v3960_v37  ;;  %v8660_v0 = vcombine.high %v3948_v40, %v3952_v33  ;;  %v4072_v3 = vld [vmem:[#allocation6 + $0xde8] sm:$0xff] }
 0x2f9   : > { %6913 = vmatpush1.bf16.msra.mxu1 %v8491_v60  ;;  %v3844_v60 = vld [vmem:[#allocation6 + $0x6c8] sm:$0xff] }
 0x2fa   : > { %6914 = vmatprep.subr.bf16.mxu1 %v8484_v27  ;;  %6962 = vmatpush2.bf16.msra.mxu0 %v8715_v2  ;;  %v8563_v27 = vcombine.low %v3852_v48, %v3856_v51  ;;  %v3685_v2 = vld [vmem:[#allocation6 + $0x1d0] sm:$0xff]  ;;  %v8556_v6 = vcombine.high %v3844_v60, %v3848_v62 }
 0x2fb   : > { %6963 = vmatprep.subr.bf16.mxu0 %v8708_v7  ;;  %v8659_v7 = vcombine.low %v3948_v40, %v3952_v33  ;;  %v8398_v19 = vcombine.high %v3685_v2, %v3689_v20  ;;  %v3653_v51 = vld [vmem:[#allocation6 + $0xd0] sm:$0xff]  ;;  %v8373_v40 = vcombine.low %v3661_v44, %v3665_v45  ;;  %v4060_v33 = vld [vmem:[#allocation6 + $0xd88] sm:$0xff] }
 0x2fd   : > { %6915 = vmatpush1.bf16.msra.mxu1 %v8483_v8  ;;  %v3836_v8 = vld [vmem:[#allocation6 + $0x688] sm:$0xff] }
 0x2fe   : > { %6916 = vmatprep.subr.bf16.mxu1 %v8476_v10  ;;  %6964 = vmatpush2.bf16.msra.mxu0 %v8707_v36  ;;  %v8555_v10 = vcombine.low %v3844_v60, %v3848_v62  ;;  %v3677_v36 = vld [vmem:[#allocation6 + $0x190] sm:$0xff]  ;;  %v8548_v1 = vcombine.high %v3836_v8, %v3840_v9 }
 0x2ff   : > { %6965 = vmatprep.subr.bf16.mxu0 %v8700_v13  ;;  %v8397_v13 = vcombine.low %v3685_v2, %v3689_v20  ;;  %v8390_v18 = vcombine.high %v3677_v36, %v3681_v11  ;;  %v8389_v59 = vcombine.low %v3677_v36, %v3681_v11  ;;  %v3645_v62 = vld [vmem:[#allocation6 + $0x90] sm:$0xff]  ;;  %v4052_v20 = vld [vmem:[#allocation6 + $0xd48] sm:$0xff] }
 0x300   : > { %v4044_v11 = vld [vmem:[#allocation6 + $0xd08] sm:$0xff] }
 0x301   : > { %6917 = vmatpush1.bf16.msra.mxu1 %v8475_v16  ;;  %v3828_v16 = vld [vmem:[#allocation6 + $0x648] sm:$0xff] }
 0x302   : > { %6918 = vmatprep.subr.bf16.mxu1 %v8468_v4  ;;  %6966 = vmatpush2.bf16.msra.mxu0 %v8699_v22  ;;  %v8547_v4 = vcombine.low %v3836_v8, %v3840_v9  ;;  %v3669_v22 = vld [vmem:[#allocation6 + $0x150] sm:$0xff] }
 0x303   : > { %6967 = vmatprep.subr.bf16.mxu0 %v8692_v25  ;;  %v8540_v25 = vcombine.high %v3828_v16, %v3832_v15  ;;  %v8382_v41 = vcombine.high %v3669_v22, %v3673_v29  ;;  %v3637_v9 = vld [vmem:[#allocation6 + $0x50] sm:$0xff] }
 0x305   : > { %6919 = vmatpush1.bf16.msra.mxu1 %v8467_v38 }
 0x306   : > { %6920 = vmatprep.subr.bf16.mxu1 %v8588_v32  ;;  %6968 = vmatpush2.bf16.msra.mxu0 %v8691_v35  ;;  %v3824_v32 = vld [vmem:[#allocation6 + $0x628] sm:$0xff] }
 0x307   : > { %6969 = vmatprep.subr.bf16.mxu0 %v8684_v43  ;;  %v8532_v46 = vcombine.high %v3820_v31, %v3824_v32  ;;  %v8531_v48 = vcombine.low %v3820_v31, %v3824_v32  ;;  %v3753_v31 = vld [vmem:[#allocation6 + $0x3f0] sm:$0xff] }
 0x309   : > { %6921 = vmatpush2.bf16.msra.mxu1 %v8587_v49  ;;  %v8539_v49 = vcombine.low %v3828_v16, %v3832_v15  ;;  %v3629_v15 = vld [vmem:[#allocation6 + $0x10] sm:$0xff] }
 0x30a   : > { %6922 = vmatprep.subr.bf16.mxu1 %v8580_v30  ;;  %6970 = vmatpush2.bf16.msra.mxu0 %v8683_v58 }
 0x30b   : > { %6971 = vmatprep.subr.bf16.mxu0 %v8676_v47  ;;  %v8381_v47 = vcombine.low %v3669_v22, %v3673_v29  ;;  %v4036_v29 = vld [vmem:[#allocation6 + $0xcc8] sm:$0xff] }
 0x30d   : > { %6923 = vmatpush2.bf16.msra.mxu1 %v8579_v63  ;;  %v4068_v63 = vld [vmem:[#allocation6 + $0xdc8] sm:$0xff] }
 0x30e   : > { %6924 = vmatprep.subr.bf16.mxu1 %v8572_v42  ;;  %6972 = vmatpush2.bf16.msra.mxu0 %v8675_v34  ;;  %v8374_v42 = vcombine.high %v3661_v44, %v3665_v45  ;;  %v8779_v60 = vcombine.low %v4068_v63, %v4072_v3  ;;  %v3741_v45 = vld [vmem:[#allocation6 + $0x390] sm:$0xff] }
 0x30f   : > { %6973 = vmatprep.subr.bf16.mxu0 %v8668_v53  ;;  %v3657_v53 = vld [vmem:[#allocation6 + $0xf0] sm:$0xff] }
 0x310   : > { %v8365_v2 = vcombine.low %v3653_v51, %v3657_v53 }
 0x311   : > { %6925 = vmatpush2.bf16.msra.mxu1 %v8571_v54  ;;  %v8780_v54 = vcombine.high %v4068_v63, %v4072_v3  ;;  %v4024_v63 = vld [vmem:[#allocation6 + $0xc68] sm:$0xff] }
 0x312   : > { %6926 = vmatprep.subr.bf16.mxu1 %v8564_v57  ;;  %6974 = vmatpush2.bf16.msra.mxu0 %v8667_v14  ;;  %v4064_v57 = vld [vmem:[#allocation6 + $0xda8] sm:$0xff]  ;;  %v8366_v14 = vcombine.high %v3653_v51, %v3657_v53 }
 0x313   : > { %6975 = vmatprep.subr.bf16.mxu0 %v8660_v0  ;;  %v3649_v0 = vld [vmem:[#allocation6 + $0xb0] sm:$0xff]  ;;  %v8771_v8 = vcombine.low %v4060_v33, %v4064_v57  ;;  %v4012_v53 = vld [vmem:[#allocation6 + $0xc08] sm:$0xff] }
 0x314   : > { %v8357_v36 = vcombine.low %v3645_v62, %v3649_v0 }
 0x315   : > { %6927 = vmatpush2.bf16.msra.mxu1 %v8563_v27  ;;  %v8772_v27 = vcombine.high %v4060_v33, %v4064_v57  ;;  %v3725_v57 = vld [vmem:[#allocation6 + $0x310] sm:$0xff] }
 0x316   : > { %6928 = vmatprep.subr.bf16.mxu1 %v8556_v6  ;;  %6976 = vmatpush2.bf16.msra.mxu0 %v8659_v7  ;;  %v4056_v6 = vld [vmem:[#allocation6 + $0xd68] sm:$0xff]  ;;  %v8358_v7 = vcombine.high %v3645_v62, %v3649_v0 }
 0x317   : > { %7027 = vmatprep.subr.bf16.mxu0 %v8398_v19  ;;  %v3641_v19 = vld [vmem:[#allocation6 + $0x70] sm:$0xff]  ;;  %v8763_v16 = vcombine.low %v4052_v20, %v4056_v6  ;;  %v4132_v0 = vld [vmem:[#allocation6 + $0xfc8] sm:$0xff] }
 0x318   : > { %v8349_v22 = vcombine.low %v3637_v9, %v3641_v19 }
 0x319   : > { %6929 = vmatpush2.bf16.msra.mxu1 %v8555_v10  ;;  %v6733_v24 = vpop.f32.mrf.mxu0  ;;  %6978 = vmatmul.mubr.bf16.vlgmr.msra.gmra.mxu0 %v9498_v17  ;;  %v8764_v10 = vcombine.high %v4052_v20, %v4056_v6  ;;  %v3717_v6 = vld [vmem:[#allocation6 + $0x2d0] sm:$0xff] }
 0x31a   : > { %6930 = vmatprep.subr.bf16.mxu1 %v8548_v1  ;;  %7028 = vmatpush1.bf16.msra.mxu0 %v8397_v13  ;;  %v4048_v1 = vld [vmem:[#allocation6 + $0xd28] sm:$0xff]  ;;  %v8350_v13 = vcombine.high %v3637_v9, %v3641_v19 }
 0x31b   : > { %v6774_v38 = vpop.f32.mrf.mxu1  ;;  %7059 = vmatprep.mubr.bf16.mxu0 %v9443_v52  ;;  %v6735_v39 = vpop.f32.mrf.mxu0  ;;  %7029 = vmatprep.subr.bf16.mxu0 %v8390_v18  ;;  %v3633_v18 = vld [vmem:[#allocation6 + $0x30] sm:$0xff]  ;;  %v4124_v19 = vld [vmem:[#allocation6 + $0xf88] sm:$0xff] }
 0x31c   : > { %v9526_v35 = vadd.f32 %v6774_v38, %v6733_v24  ;;  %v4040_v24 = vld [vmem:[#allocation6 + $0xce8] sm:$0xff]  ;;  %v8755_v38 = vcombine.low %v4044_v11, %v4048_v1 }
 0x31d   : > { %6931 = vmatpush2.bf16.msra.mxu1 %v8547_v4  ;;  %v6776_v43 = vpop.f32.mrf.mxu1  ;;  %v6737_v58 = vpop.f32.mrf.mxu0  ;;  %v8756_v4 = vcombine.high %v4044_v11, %v4048_v1  ;;  %v8748_v32 = vcombine.high %v4036_v29, %v4040_v24  ;;  %v8747_v44 = vcombine.low %v4036_v29, %v4040_v24  ;;  %v3709_v1 = vld [vmem:[#allocation6 + $0x290] sm:$0xff] }
 0x31e   : > { %v9528_v30 = vadd.f32 %v6776_v43, %v6735_v39  ;;  %6932 = vmatprep.subr.bf16.mxu1 %v8540_v25  ;;  %7030 = vmatpush1.bf16.msra.mxu0 %v8389_v59  ;;  %v8342_v25 = vcombine.high %v3629_v15, %v3633_v18  ;;  %v3749_v59 = vld [vmem:[#allocation6 + $0x3d0] sm:$0xff]  ;;  %v8341_v39 = vcombine.low %v3629_v15, %v3633_v18  ;;  %v4032_v43 = vld [vmem:[#allocation6 + $0xca8] sm:$0xff] }
 0x31f   : > { %v6778_v28 = vpop.f32.mrf.mxu1  ;;  %v6738_v37 = vpop.f32.mrf.mxu0  ;;  %7031 = vmatprep.subr.bf16.mxu0 %v8382_v41  ;;  %v4028_v41 = vld [vmem:[#allocation6 + $0xc88] sm:$0xff]  ;;  %v3745_v58 = vld [vmem:[#allocation6 + $0x3b0] sm:$0xff] }
 0x320   : > { %v8461_v28 = vcombine.low %v3749_v59, %v3753_v31  ;;  %v8454_v3 = vcombine.high %v3741_v45, %v3745_v58  ;;  %v8739_v37 = vcombine.low %v4028_v41, %v4032_v43  ;;  %v8453_v51 = vcombine.low %v3741_v45, %v3745_v58  ;;  %v4116_v18 = vld [vmem:[#allocation6 + $0xf48] sm:$0xff]  ;;  %v3701_v24 = vld [vmem:[#allocation6 + $0x250] sm:$0xff] }
 0x321   : > { %6933 = vmatpush2.bf16.msra.mxu1 %v8539_v49  ;;  %v6779_v34 = vpop.f32.mrf.mxu1  ;;  %v8462_v49 = vcombine.high %v3749_v59, %v3753_v31  ;;  %v4108_v31 = vld [vmem:[#allocation6 + $0xf08] sm:$0xff] }
 0x322   : > { %6934 = vmatprep.subr.bf16.mxu1 %v8532_v46  ;;  %7032 = vmatpush1.bf16.msra.mxu0 %v8381_v47  ;;  %v8740_v46 = vcombine.high %v4028_v41, %v4032_v43  ;;  %v4020_v47 = vld [vmem:[#allocation6 + $0xc48] sm:$0xff]  ;;  %v3737_v34 = vld [vmem:[#allocation6 + $0x370] sm:$0xff] }
 0x323   : > { %7033 = vmatprep.subr.bf16.mxu0 %v8374_v42  ;;  %v3733_v42 = vld [vmem:[#allocation6 + $0x350] sm:$0xff]  ;;  %v8731_v33 = vcombine.low %v4020_v47, %v4024_v63  ;;  %v4100_v58 = vld [vmem:[#allocation6 + $0xec8] sm:$0xff] }
 0x324   : > { %v8445_v62 = vcombine.low %v3733_v42, %v3737_v34  ;;  %v3693_v43 = vld [vmem:[#allocation6 + $0x210] sm:$0xff] }
 0x325   : > { %6935 = vmatpush2.bf16.msra.mxu1 %v8531_v48  ;;  %v8732_v48 = vcombine.high %v4020_v47, %v4024_v63  ;;  %v3941_v63 = vld [vmem:[#allocation6 + $0x9d0] sm:$0xff] }
 0x326   : > { %6986 = vmatprep.subr.bf16.mxu1 %v8780_v54  ;;  %7034 = vmatpush1.bf16.msra.mxu0 %v8373_v40  ;;  %v4016_v54 = vld [vmem:[#allocation6 + $0xc28] sm:$0xff]  ;;  %v8446_v40 = vcombine.high %v3733_v42, %v3737_v34 }
 0x327   : > { %7035 = vmatprep.subr.bf16.mxu0 %v8366_v14  ;;  %v3729_v14 = vld [vmem:[#allocation6 + $0x330] sm:$0xff]  ;;  %v8723_v20 = vcombine.low %v4012_v53, %v4016_v54  ;;  %v4092_v34 = vld [vmem:[#allocation6 + $0xe88] sm:$0xff] }
 0x328   : > { %6937 = vmatmul.mubr.bf16.vlgmr.msra.gmra.mxu1 %v9471_v23  ;;  %v8437_v9 = vcombine.low %v3725_v57, %v3729_v14 }
 0x329   : > { %6987 = vmatpush1.bf16.msra.mxu1 %v8779_v60  ;;  %7018 = vmatprep.mubr.bf16.mxu1 %v9514_v26  ;;  %v8724_v60 = vcombine.high %v4012_v53, %v4016_v54  ;;  %v3933_v54 = vld [vmem:[#allocation6 + $0x990] sm:$0xff] }
 0x32a   : > { %6988 = vmatprep.subr.bf16.mxu1 %v8772_v27  ;;  %7036 = vmatpush1.bf16.msra.mxu0 %v8365_v2  ;;  %v4136_v27 = vld [vmem:[#allocation6 + $0xfe8] sm:$0xff]  ;;  %v8438_v2 = vcombine.high %v3725_v57, %v3729_v14 }
 0x32b   : > { %7037 = vmatprep.subr.bf16.mxu0 %v8358_v7  ;;  %v3721_v7 = vld [vmem:[#allocation6 + $0x2f0] sm:$0xff]  ;;  %v8843_v11 = vcombine.low %v4132_v0, %v4136_v27  ;;  %v4084_v14 = vld [vmem:[#allocation6 + $0xe48] sm:$0xff] }
 0x32c   : > { %v8429_v15 = vcombine.low %v3717_v6, %v3721_v7 }
 0x32d   : > { %6989 = vmatpush1.bf16.msra.mxu1 %v8771_v8  ;;  %v8844_v8 = vcombine.high %v4132_v0, %v4136_v27  ;;  %v3925_v27 = vld [vmem:[#allocation6 + $0x950] sm:$0xff] }
 0x32e   : > { %6990 = vmatprep.subr.bf16.mxu1 %v8764_v10  ;;  %7038 = vmatpush1.bf16.msra.mxu0 %v8357_v36  ;;  %v4128_v10 = vld [vmem:[#allocation6 + $0xfa8] sm:$0xff]  ;;  %v8430_v36 = vcombine.high %v3717_v6, %v3721_v7 }
 0x32f   : > { %7039 = vmatprep.subr.bf16.mxu0 %v8350_v13  ;;  %v3713_v13 = vld [vmem:[#allocation6 + $0x2b0] sm:$0xff]  ;;  %v8835_v29 = vcombine.low %v4124_v19, %v4128_v10 }
 0x330   : > { %v8421_v59 = vcombine.low %v3709_v1, %v3713_v13 }
 0x331   : > { %6991 = vmatpush1.bf16.msra.mxu1 %v8763_v16  ;;  %v8836_v16 = vcombine.high %v4124_v19, %v4128_v10  ;;  %v4080_v19 = vld [vmem:[#allocation6 + $0xe28] sm:$0xff] }
 0x332   : > { %6992 = vmatprep.subr.bf16.mxu1 %v8756_v4  ;;  %7040 = vmatpush1.bf16.msra.mxu0 %v8349_v22  ;;  %v4120_v4 = vld [vmem:[#allocation6 + $0xf68] sm:$0xff]  ;;  %v8422_v22 = vcombine.high %v3709_v1, %v3713_v13  ;;  %v3917_v13 = vld [vmem:[#allocation6 + $0x910] sm:$0xff] }
 0x333   : > { %7041 = vmatprep.subr.bf16.mxu0 %v8342_v25  ;;  %v3705_v25 = vld [vmem:[#allocation6 + $0x270] sm:$0xff]  ;;  %v8827_v41 = vcombine.low %v4116_v18, %v4120_v4 }
 0x334   : > { %v8413_v45 = vcombine.low %v3701_v24, %v3705_v25 }
 0x335   : > { %6993 = vmatpush1.bf16.msra.mxu1 %v8755_v38  ;;  %v8828_v38 = vcombine.high %v4116_v18, %v4120_v4  ;;  %v3813_v4 = vld [vmem:[#allocation6 + $0x5d0] sm:$0xff] }
 0x336   : > { %6994 = vmatprep.subr.bf16.mxu1 %v8748_v32  ;;  %7042 = vmatpush1.bf16.msra.mxu0 %v8341_v39  ;;  %v4112_v32 = vld [vmem:[#allocation6 + $0xf28] sm:$0xff]  ;;  %v8414_v39 = vcombine.high %v3701_v24, %v3705_v25 }
 0x337   : > { %7043 = vmatprep.subr.bf16.mxu0 %v8462_v49  ;;  %v3697_v49 = vld [vmem:[#allocation6 + $0x230] sm:$0xff]  ;;  %v8819_v47 = vcombine.low %v4108_v31, %v4112_v32 }
 0x338   : > { %v8405_v42 = vcombine.low %v3693_v43, %v3697_v49 }
 0x339   : > { %6995 = vmatpush1.bf16.msra.mxu1 %v8747_v44  ;;  %v8820_v44 = vcombine.high %v4108_v31, %v4112_v32  ;;  %v3805_v32 = vld [vmem:[#allocation6 + $0x590] sm:$0xff] }
 0x33a   : > { %6996 = vmatprep.subr.bf16.mxu1 %v8740_v46  ;;  %7044 = vmatpush2.bf16.msra.mxu0 %v8461_v28  ;;  %v4104_v46 = vld [vmem:[#allocation6 + $0xee8] sm:$0xff]  ;;  %v8406_v28 = vcombine.high %v3693_v43, %v3697_v49  ;;  %v3901_v49 = vld [vmem:[#allocation6 + $0x890] sm:$0xff] }
 0x33b   : > { %7045 = vmatprep.subr.bf16.mxu0 %v8454_v3  ;;  %v3945_v3 = vld [vmem:[#allocation6 + $0x9f0] sm:$0xff]  ;;  %v8811_v53 = vcombine.low %v4100_v58, %v4104_v46 }
 0x33c   : > { %v8653_v57 = vcombine.low %v3941_v63, %v3945_v3 }
 0x33d   : > { %6997 = vmatpush1.bf16.msra.mxu1 %v8739_v37  ;;  %v8812_v37 = vcombine.high %v4100_v58, %v4104_v46  ;;  %v3797_v46 = vld [vmem:[#allocation6 + $0x550] sm:$0xff] }
 0x33e   : > { %6998 = vmatprep.subr.bf16.mxu1 %v8732_v48  ;;  %7046 = vmatpush2.bf16.msra.mxu0 %v8453_v51  ;;  %v4096_v48 = vld [vmem:[#allocation6 + $0xea8] sm:$0xff]  ;;  %v8654_v51 = vcombine.high %v3941_v63, %v3945_v3  ;;  %v3893_v3 = vld [vmem:[#allocation6 + $0x850] sm:$0xff] }
 0x33f   : > { %7047 = vmatprep.subr.bf16.mxu0 %v8446_v40  ;;  %v3937_v40 = vld [vmem:[#allocation6 + $0x9b0] sm:$0xff]  ;;  %v8803_v0 = vcombine.low %v4092_v34, %v4096_v48 }
 0x341   : > { %6999 = vmatpush1.bf16.msra.mxu1 %v8731_v33  ;;  %v8804_v33 = vcombine.high %v4092_v34, %v4096_v48  ;;  %v3789_v48 = vld [vmem:[#allocation6 + $0x510] sm:$0xff] }
 0x342   : > { %7000 = vmatprep.subr.bf16.mxu1 %v8724_v60  ;;  %7048 = vmatpush2.bf16.msra.mxu0 %v8445_v62  ;;  %v4088_v60 = vld [vmem:[#allocation6 + $0xe68] sm:$0xff]  ;;  %v8646_v62 = vcombine.high %v3933_v54, %v3937_v40 }
 0x343   : > { %7049 = vmatprep.subr.bf16.mxu0 %v8438_v2  ;;  %v3929_v2 = vld [vmem:[#allocation6 + $0x970] sm:$0xff]  ;;  %v8796_v6 = vcombine.high %v4084_v14, %v4088_v60  ;;  %v8795_v1 = vcombine.low %v4084_v14, %v4088_v60 }
 0x344   : > { %v8637_v18 = vcombine.low %v3925_v27, %v3929_v2  ;;  %v3781_v60 = vld [vmem:[#allocation6 + $0x4d0] sm:$0xff] }
 0x345   : > { %7001 = vmatpush1.bf16.msra.mxu1 %v8723_v20 }
 0x346   : > { %7002 = vmatprep.subr.bf16.mxu1 %v8844_v8  ;;  %7050 = vmatpush2.bf16.msra.mxu0 %v8437_v9  ;;  %v8645_v8 = vcombine.low %v3933_v54, %v3937_v40  ;;  %v4076_v9 = vld [vmem:[#allocation6 + $0xe08] sm:$0xff]  ;;  %v3885_v40 = vld [vmem:[#allocation6 + $0x810] sm:$0xff] }
 0x347   : > { %7051 = vmatprep.subr.bf16.mxu0 %v8430_v36  ;;  %v8638_v36 = vcombine.high %v3925_v27, %v3929_v2  ;;  %v8787_v25 = vcombine.low %v4076_v9, %v4080_v19  ;;  %v4005_v2 = vld [vmem:[#allocation6 + $0xbd0] sm:$0xff] }
 0x349   : > { %7003 = vmatpush2.bf16.msra.mxu1 %v8843_v11 }
 0x34a   : > { %7004 = vmatprep.subr.bf16.mxu1 %v8836_v16  ;;  %7052 = vmatpush2.bf16.msra.mxu0 %v8429_v15  ;;  %v3921_v16 = vld [vmem:[#allocation6 + $0x930] sm:$0xff] }
 0x34b   : > { %7053 = vmatprep.subr.bf16.mxu0 %v8422_v22  ;;  %v3817_v22 = vld [vmem:[#allocation6 + $0x5f0] sm:$0xff]  ;;  %v8630_v24 = vcombine.high %v3917_v13, %v3921_v16  ;;  %v8629_v31 = vcombine.low %v3917_v13, %v3921_v16 }
 0x34c   : > { %v8525_v43 = vcombine.low %v3813_v4, %v3817_v22  ;;  %v4001_v13 = vld [vmem:[#allocation6 + $0xbb0] sm:$0xff] }
 0x34d   : > { %7005 = vmatpush2.bf16.msra.mxu1 %v8835_v29 }
 0x34e   : > { %7006 = vmatprep.subr.bf16.mxu1 %v8828_v38  ;;  %7054 = vmatpush2.bf16.msra.mxu0 %v8421_v59  ;;  %v3909_v38 = vld [vmem:[#allocation6 + $0x8d0] sm:$0xff] }
 0x34f   : > { %7055 = vmatprep.subr.bf16.mxu0 %v8414_v39  ;;  %v3913_v59 = vld [vmem:[#allocation6 + $0x8f0] sm:$0xff] }
 0x350   : > { %v3809_v39 = vld [vmem:[#allocation6 + $0x5b0] sm:$0xff]  ;;  %v8621_v58 = vcombine.low %v3909_v38, %v3913_v59 }
 0x351   : > { %7007 = vmatpush2.bf16.msra.mxu1 %v8827_v41  ;;  %v8622_v41 = vcombine.high %v3909_v38, %v3913_v59  ;;  %v8517_v63 = vcombine.low %v3805_v32, %v3809_v39  ;;  %v3757_v59 = vld [vmem:[#allocation6 + $0x410] sm:$0xff] }
 0x352   : > { %7008 = vmatprep.subr.bf16.mxu1 %v8820_v44  ;;  %7056 = vmatpush2.bf16.msra.mxu0 %v8413_v45  ;;  %v3905_v44 = vld [vmem:[#allocation6 + $0x8b0] sm:$0xff]  ;;  %v8518_v45 = vcombine.high %v3805_v32, %v3809_v39 }
 0x353   : > { %7057 = vmatprep.subr.bf16.mxu0 %v8406_v28  ;;  %v3801_v28 = vld [vmem:[#allocation6 + $0x570] sm:$0xff]  ;;  %v8613_v34 = vcombine.low %v3901_v49, %v3905_v44 }
 0x354   : > { %v8509_v54 = vcombine.low %v3797_v46, %v3801_v28  ;;  %v3981_v39 = vld [vmem:[#allocation6 + $0xb10] sm:$0xff] }
 0x355   : > { %7009 = vmatpush2.bf16.msra.mxu1 %v8819_v47  ;;  %v8614_v47 = vcombine.high %v3901_v49, %v3905_v44  ;;  %v3877_v44 = vld [vmem:[#allocation6 + $0x7d0] sm:$0xff] }
 0x356   : > { %7010 = vmatprep.subr.bf16.mxu1 %v8812_v37  ;;  %7058 = vmatpush2.bf16.msra.mxu0 %v8405_v42  ;;  %v3897_v37 = vld [vmem:[#allocation6 + $0x870] sm:$0xff]  ;;  %v8510_v42 = vcombine.high %v3797_v46, %v3801_v28 }
 0x357   : > { %7109 = vmatprep.subr.bf16.mxu0 %v8654_v51  ;;  %v3793_v51 = vld [vmem:[#allocation6 + $0x530] sm:$0xff]  ;;  %v8605_v14 = vcombine.low %v3893_v3, %v3897_v37 }
 0x358   : > { %v8501_v27 = vcombine.low %v3789_v48, %v3793_v51  ;;  %v3973_v28 = vld [vmem:[#allocation6 + $0xad0] sm:$0xff] }
 0x359   : > { %7011 = vmatpush2.bf16.msra.mxu1 %v8811_v53  ;;  %v6815_v20 = vpop.f32.mrf.mxu0  ;;  %7060 = vmatmul.mubr.bf16.vlgmr.msra.gmra.mxu0 %v9469_v21  ;;  %v8606_v53 = vcombine.high %v3893_v3, %v3897_v37  ;;  %v3869_v37 = vld [vmem:[#allocation6 + $0x790] sm:$0xff] }
 0x35a   : > { %7012 = vmatprep.subr.bf16.mxu1 %v8804_v33  ;;  %v9534_v7 = vadd.f32 %v6815_v20, %v9526_v35  ;;  %7110 = vmatpush1.bf16.msra.mxu0 %v8653_v57  ;;  %v8788_v35 = vcombine.high %v4076_v9, %v4080_v19  ;;  %v3889_v33 = vld [vmem:[#allocation6 + $0x830] sm:$0xff]  ;;  %v8502_v57 = vcombine.high %v3789_v48, %v3793_v51 }
 0x35b   : > { %7141 = vmatprep.mubr.bf16.mxu0 %v9493_v56  ;;  %v6817_v10 = vpop.f32.mrf.mxu0  ;;  %7111 = vmatprep.subr.bf16.mxu0 %v8646_v62  ;;  %v3785_v62 = vld [vmem:[#allocation6 + $0x4f0] sm:$0xff] }
 0x35c   : > { %v9538_v11 = vadd.f32 %v6817_v10, %v9528_v30  ;;  %v8526_v30 = vcombine.high %v3813_v4, %v3817_v22  ;;  %v4009_v20 = vld [vmem:[#allocation6 + $0xbf0] sm:$0xff] }
 0x35d   : > { %7013 = vmatpush2.bf16.msra.mxu1 %v8803_v0  ;;  %v6819_v15 = vpop.f32.mrf.mxu0  ;;  %v8598_v0 = vcombine.high %v3885_v40, %v3889_v33  ;;  %v3773_v9 = vld [vmem:[#allocation6 + $0x490] sm:$0xff]  ;;  %v8718_v10 = vcombine.high %v4005_v2, %v4009_v20 }
 0x35e   : > { %7014 = vmatprep.subr.bf16.mxu1 %v8796_v6  ;;  %7112 = vmatpush1.bf16.msra.mxu0 %v8645_v8  ;;  %v8494_v6 = vcombine.high %v3781_v60, %v3785_v62  ;;  %v8597_v8 = vcombine.low %v3885_v40, %v3889_v33  ;;  %v3777_v19 = vld [vmem:[#allocation6 + $0x4b0] sm:$0xff]  ;;  %v8717_v15 = vcombine.low %v4005_v2, %v4009_v20 }
 0x35f   : > { %v6820_v29 = vpop.f32.mrf.mxu0  ;;  %7113 = vmatprep.subr.bf16.mxu0 %v8638_v36  ;;  %v8493_v36 = vcombine.low %v3781_v60, %v3785_v62  ;;  %v8486_v16 = vcombine.high %v3773_v9, %v3777_v19  ;;  %v8485_v22 = vcombine.low %v3773_v9, %v3777_v19  ;;  %v3965_v51 = vld [vmem:[#allocation6 + $0xa90] sm:$0xff] }
 0x360   : > { %v3989_v29 = vld [vmem:[#allocation6 + $0xb50] sm:$0xff] }
 0x361   : > { %7015 = vmatpush2.bf16.msra.mxu1 %v8795_v1  ;;  %v3997_v1 = vld [vmem:[#allocation6 + $0xb90] sm:$0xff] }
 0x362   : > { %7016 = vmatprep.subr.bf16.mxu1 %v8788_v35  ;;  %7114 = vmatpush1.bf16.msra.mxu0 %v8637_v18  ;;  %v3765_v35 = vld [vmem:[#allocation6 + $0x450] sm:$0xff]  ;;  %v8710_v4 = vcombine.high %v3997_v1, %v4001_v13  ;;  %v8709_v38 = vcombine.low %v3997_v1, %v4001_v13 }
 0x363   : > { %7115 = vmatprep.subr.bf16.mxu0 %v8630_v24  ;;  %v3769_v18 = vld [vmem:[#allocation6 + $0x470] sm:$0xff] }
 0x364   : > { %v3993_v24 = vld [vmem:[#allocation6 + $0xb70] sm:$0xff]  ;;  %v8477_v32 = vcombine.low %v3765_v35, %v3769_v18 }
 0x365   : > { %7017 = vmatpush2.bf16.msra.mxu1 %v8787_v25  ;;  %v8478_v25 = vcombine.high %v3765_v35, %v3769_v18  ;;  %v8701_v49 = vcombine.low %v3989_v29, %v3993_v24  ;;  %v3861_v33 = vld [vmem:[#allocation6 + $0x750] sm:$0xff]  ;;  %v3686_v18 = vld [vmem:[#allocation6 + $0x1d8] sm:$0xff] }
 0x366   : > { %7068 = vmatprep.subr.bf16.mxu1 %v8526_v30  ;;  %7116 = vmatpush1.bf16.msra.mxu0 %v8629_v31  ;;  %v3761_v30 = vld [vmem:[#allocation6 + $0x430] sm:$0xff]  ;;  %v8702_v31 = vcombine.high %v3989_v29, %v3993_v24 }
 0x367   : > { %7117 = vmatprep.subr.bf16.mxu0 %v8622_v41  ;;  %v3985_v41 = vld [vmem:[#allocation6 + $0xb30] sm:$0xff]  ;;  %v8469_v46 = vcombine.low %v3757_v59, %v3761_v30 }
 0x368   : > { %7019 = vmatmul.mubr.bf16.vlgmr.msra.gmra.mxu1 %v9516_v12  ;;  %v8693_v3 = vcombine.low %v3981_v39, %v3985_v41  ;;  %v3957_v62 = vld [vmem:[#allocation6 + $0xa50] sm:$0xff] }
 0x369   : > { %7069 = vmatpush1.bf16.msra.mxu1 %v8525_v43  ;;  %7100 = vmatprep.mubr.bf16.mxu1 %v9447_v55  ;;  %v8470_v43 = vcombine.high %v3757_v59, %v3761_v30  ;;  %v3853_v20 = vld [vmem:[#allocation6 + $0x710] sm:$0xff]  ;;  %v3678_v30 = vld [vmem:[#allocation6 + $0x198] sm:$0xff] }
 0x36a   : > { %7070 = vmatprep.subr.bf16.mxu1 %v8518_v45  ;;  %7118 = vmatpush1.bf16.msra.mxu0 %v8621_v58  ;;  %v3881_v45 = vld [vmem:[#allocation6 + $0x7f0] sm:$0xff]  ;;  %v8694_v58 = vcombine.high %v3981_v39, %v3985_v41 }
 0x36b   : > { %7119 = vmatprep.subr.bf16.mxu0 %v8614_v47  ;;  %v3977_v47 = vld [vmem:[#allocation6 + $0xaf0] sm:$0xff]  ;;  %v8589_v48 = vcombine.low %v3877_v44, %v3881_v45 }
 0x36c   : > { %v8685_v40 = vcombine.low %v3973_v28, %v3977_v47  ;;  %v3949_v19 = vld [vmem:[#allocation6 + $0xa10] sm:$0xff] }
 0x36d   : > { %7071 = vmatpush1.bf16.msra.mxu1 %v8517_v63  ;;  %v8590_v63 = vcombine.high %v3877_v44, %v3881_v45  ;;  %v3845_v13 = vld [vmem:[#allocation6 + $0x6d0] sm:$0xff]  ;;  %v3670_v45 = vld [vmem:[#allocation6 + $0x158] sm:$0xff] }
 0x36e   : > { %7072 = vmatprep.subr.bf16.mxu1 %v8510_v42  ;;  %7120 = vmatpush1.bf16.msra.mxu0 %v8613_v34  ;;  %v3873_v42 = vld [vmem:[#allocation6 + $0x7b0] sm:$0xff]  ;;  %v8686_v34 = vcombine.high %v3973_v28, %v3977_v47 }
 0x36f   : > { %7121 = vmatprep.subr.bf16.mxu0 %v8606_v53  ;;  %v3969_v53 = vld [vmem:[#allocation6 + $0xab0] sm:$0xff]  ;;  %v8581_v60 = vcombine.low %v3869_v37, %v3873_v42 }
 0x370   : > { %v8677_v2 = vcombine.low %v3965_v51, %v3969_v53  ;;  %v3837_v24 = vld [vmem:[#allocation6 + $0x690] sm:$0xff] }
 0x371   : > { %7073 = vmatpush1.bf16.msra.mxu1 %v8509_v54  ;;  %v8582_v54 = vcombine.high %v3869_v37, %v3873_v42  ;;  %v3829_v41 = vld [vmem:[#allocation6 + $0x650] sm:$0xff] }
 0x372   : > { %7074 = vmatprep.subr.bf16.mxu1 %v8502_v57  ;;  %7122 = vmatpush1.bf16.msra.mxu0 %v8605_v14  ;;  %v3865_v57 = vld [vmem:[#allocation6 + $0x770] sm:$0xff]  ;;  %v8678_v14 = vcombine.high %v3965_v51, %v3969_v53  ;;  %v3666_v51 = vld [vmem:[#allocation6 + $0x138] sm:$0xff] }
 0x373   : > { %7123 = vmatprep.subr.bf16.mxu0 %v8598_v0  ;;  %v3961_v0 = vld [vmem:[#allocation6 + $0xa70] sm:$0xff]  ;;  %v8573_v9 = vcombine.low %v3861_v33, %v3865_v57 }
 0x374   : > { %v8669_v1 = vcombine.low %v3957_v62, %v3961_v0 }
 0x375   : > { %7075 = vmatpush1.bf16.msra.mxu1 %v8501_v27  ;;  %v8574_v27 = vcombine.high %v3861_v33, %v3865_v57  ;;  %v4069_v33 = vld [vmem:[#allocation6 + $0xdd0] sm:$0xff] }
 0x376   : > { %7076 = vmatprep.subr.bf16.mxu1 %v8494_v6  ;;  %7124 = vmatpush1.bf16.msra.mxu0 %v8597_v8  ;;  %v3857_v6 = vld [vmem:[#allocation6 + $0x730] sm:$0xff]  ;;  %v8670_v8 = vcombine.high %v3957_v62, %v3961_v0  ;;  %v3654_v62 = vld [vmem:[#allocation6 + $0xd8] sm:$0xff] }
 0x377   : > { %7125 = vmatprep.subr.bf16.mxu0 %v8718_v10  ;;  %v3953_v10 = vld [vmem:[#allocation6 + $0xa30] sm:$0xff]  ;;  %v8565_v35 = vcombine.low %v3853_v20, %v3857_v6  ;;  %v3658_v0 = vld [vmem:[#allocation6 + $0xf8] sm:$0xff] }
 0x378   : > { %v8661_v29 = vcombine.low %v3949_v19, %v3953_v10  ;;  %v4073_v57 = vld [vmem:[#allocation6 + $0xdf0] sm:$0xff] }
 0x379   : > { %7077 = vmatpush1.bf16.msra.mxu1 %v8493_v36  ;;  %v8566_v36 = vcombine.high %v3853_v20, %v3857_v6  ;;  %v4061_v20 = vld [vmem:[#allocation6 + $0xd90] sm:$0xff] }
 0x37a   : > { %7078 = vmatprep.subr.bf16.mxu1 %v8486_v16  ;;  %7126 = vmatpush2.bf16.msra.mxu0 %v8717_v15  ;;  %v3849_v16 = vld [vmem:[#allocation6 + $0x6f0] sm:$0xff]  ;;  %v8662_v15 = vcombine.high %v3949_v19, %v3953_v10  ;;  %v3646_v19 = vld [vmem:[#allocation6 + $0x98] sm:$0xff] }
 0x37b   : > { %7127 = vmatprep.subr.bf16.mxu0 %v8710_v4  ;;  %v3690_v4 = vld [vmem:[#allocation6 + $0x1f8] sm:$0xff]  ;;  %v8557_v59 = vcombine.low %v3845_v13, %v3849_v16  ;;  %v4065_v6 = vld [vmem:[#allocation6 + $0xdb0] sm:$0xff] }
 0x37c   : > { %v8399_v39 = vcombine.low %v3686_v18, %v3690_v4  ;;  %v3650_v10 = vld [vmem:[#allocation6 + $0xb8] sm:$0xff] }
 0x37d   : > { %7079 = vmatpush1.bf16.msra.mxu1 %v8485_v22  ;;  %v8558_v22 = vcombine.high %v3845_v13, %v3849_v16  ;;  %v4053_v13 = vld [vmem:[#allocation6 + $0xd50] sm:$0xff] }
 0x37e   : > { %7080 = vmatprep.subr.bf16.mxu1 %v8478_v25  ;;  %7128 = vmatpush2.bf16.msra.mxu0 %v8709_v38  ;;  %v3841_v25 = vld [vmem:[#allocation6 + $0x6b0] sm:$0xff]  ;;  %v8400_v38 = vcombine.high %v3686_v18, %v3690_v4  ;;  %v8773_v4 = vcombine.low %v4061_v20, %v4065_v6 }
 0x37f   : > { %7129 = vmatprep.subr.bf16.mxu0 %v8702_v31  ;;  %v3682_v31 = vld [vmem:[#allocation6 + $0x1b8] sm:$0xff]  ;;  %v8549_v44 = vcombine.low %v3837_v24, %v3841_v25  ;;  %v4057_v16 = vld [vmem:[#allocation6 + $0xd70] sm:$0xff] }
 0x380   : > { %v8391_v47 = vcombine.low %v3678_v30, %v3682_v31 }
 0x381   : > { %7081 = vmatpush1.bf16.msra.mxu1 %v8477_v32  ;;  %v8550_v32 = vcombine.high %v3837_v24, %v3841_v25  ;;  %v8766_v25 = vcombine.high %v4053_v13, %v4057_v16 }
 0x382   : > { %7082 = vmatprep.subr.bf16.mxu1 %v8470_v43  ;;  %7130 = vmatpush2.bf16.msra.mxu0 %v8701_v49  ;;  %v3833_v43 = vld [vmem:[#allocation6 + $0x670] sm:$0xff]  ;;  %v8392_v49 = vcombine.high %v3678_v30, %v3682_v31 }
 0x383   : > { %7131 = vmatprep.subr.bf16.mxu0 %v8694_v58  ;;  %v3674_v58 = vld [vmem:[#allocation6 + $0x178] sm:$0xff]  ;;  %v8542_v28 = vcombine.high %v3829_v41, %v3833_v43  ;;  %v4045_v31 = vld [vmem:[#allocation6 + $0xd10] sm:$0xff] }
 0x384   : > { %v8384_v42 = vcombine.high %v3670_v45, %v3674_v58 }
 0x385   : > { %7083 = vmatpush1.bf16.msra.mxu1 %v8469_v46 }
 0x386   : > { %7084 = vmatprep.subr.bf16.mxu1 %v8590_v63  ;;  %7132 = vmatpush2.bf16.msra.mxu0 %v8693_v3  ;;  %v3821_v63 = vld [vmem:[#allocation6 + $0x610] sm:$0xff] }
 0x387   : > { %7133 = vmatprep.subr.bf16.mxu0 %v8686_v34  ;;  %v3825_v3 = vld [vmem:[#allocation6 + $0x630] sm:$0xff]  ;;  %v8541_v34 = vcombine.low %v3829_v41, %v3833_v43  ;;  %v8765_v41 = vcombine.low %v4053_v13, %v4057_v16 }
 0x389   : > { %7085 = vmatpush2.bf16.msra.mxu1 %v8589_v48  ;;  %v3662_v48 = vld [vmem:[#allocation6 + $0x118] sm:$0xff] }
 0x38a   : > { %7086 = vmatprep.subr.bf16.mxu1 %v8582_v54  ;;  %7134 = vmatpush2.bf16.msra.mxu0 %v8685_v40  ;;  %v8534_v54 = vcombine.high %v3821_v63, %v3825_v3  ;;  %v8383_v40 = vcombine.low %v3670_v45, %v3674_v58 }
 0x38b   : > { %7135 = vmatprep.subr.bf16.mxu0 %v8678_v14 }
 0x38d   : > { %7087 = vmatpush2.bf16.msra.mxu1 %v8581_v60  ;;  %v8533_v60 = vcombine.low %v3821_v63, %v3825_v3 }
 0x38e   : > { %7088 = vmatprep.subr.bf16.mxu1 %v8574_v27  ;;  %7136 = vmatpush2.bf16.msra.mxu0 %v8677_v2  ;;  %v8782_v27 = vcombine.high %v4069_v33, %v4073_v57  ;;  %v8375_v2 = vcombine.low %v3662_v48, %v3666_v51 }
 0x38f   : > { %7137 = vmatprep.subr.bf16.mxu0 %v8670_v8  ;;  %v8368_v8 = vcombine.high %v3654_v62, %v3658_v0 }
 0x391   : > { %7089 = vmatpush2.bf16.msra.mxu1 %v8573_v9  ;;  %v8781_v9 = vcombine.low %v4069_v33, %v4073_v57 }
 0x392   : > { %7090 = vmatprep.subr.bf16.mxu1 %v8566_v36  ;;  %7138 = vmatpush2.bf16.msra.mxu0 %v8669_v1  ;;  %v8774_v36 = vcombine.high %v4061_v20, %v4065_v6  ;;  %v8367_v1 = vcombine.low %v3654_v62, %v3658_v0  ;;  %v3750_v62 = vld [vmem:[#allocation6 + $0x3d8] sm:$0xff] }
 0x393   : > { %7139 = vmatprep.subr.bf16.mxu0 %v8662_v15  ;;  %v3754_v0 = vld [vmem:[#allocation6 + $0x3f8] sm:$0xff] }
 0x395   : > { %7091 = vmatpush2.bf16.msra.mxu1 %v8565_v35  ;;  %v8360_v35 = vcombine.high %v3646_v19, %v3650_v10 }
 0x396   : > { %7092 = vmatprep.subr.bf16.mxu1 %v8558_v22  ;;  %7140 = vmatpush2.bf16.msra.mxu0 %v8661_v29  ;;  %v3638_v22 = vld [vmem:[#allocation6 + $0x58] sm:$0xff] }
 0x397   : > { %7191 = vmatprep.subr.bf16.mxu0 %v8400_v38  ;;  %v3642_v29 = vld [vmem:[#allocation6 + $0x78] sm:$0xff] }
 0x398   : > { %v8352_v43 = vcombine.high %v3638_v22, %v3642_v29  ;;  %v8351_v3 = vcombine.low %v3638_v22, %v3642_v29  ;;  %v3746_v22 = vld [vmem:[#allocation6 + $0x3b8] sm:$0xff] }
 0x399   : > { %7093 = vmatpush2.bf16.msra.mxu1 %v8557_v59  ;;  %v9542_v46 = vpop.f32.mrf.mxu0  ;;  %7142 = vmatmul.mubr.bf16.vlgmr.msra.gmra.mxu0 %v9498_v17 }
 0x39a   : > { %7094 = vmatprep.subr.bf16.mxu1 %v8550_v32  ;;  %7192 = vmatpush1.bf16.msra.mxu0 %v8399_v39  ;;  %v4049_v32 = vld [vmem:[#allocation6 + $0xd30] sm:$0xff] }
 0x39b   : > { %7223 = vmatprep.mubr.bf16.mxu0 %v9443_v52  ;;  %v9546_v37 = vpop.f32.mrf.mxu0  ;;  %7193 = vmatprep.subr.bf16.mxu0 %v8392_v49  ;;  %v8376_v52 = vcombine.high %v3662_v48, %v3666_v51  ;;  %v8758_v63 = vcombine.high %v4045_v31, %v4049_v32 }
 0x39d   : > { %7095 = vmatpush2.bf16.msra.mxu1 %v8549_v44  ;;  %v6901_v53 = vpop.f32.mrf.mxu0 }
 0x39e   : > { %7096 = vmatprep.subr.bf16.mxu1 %v8542_v28  ;;  %7194 = vmatpush1.bf16.msra.mxu0 %v8391_v47  ;;  %v3630_v28 = vld [vmem:[#allocation6 + $0x18] sm:$0xff]  ;;  %v4037_v53 = vld [vmem:[#allocation6 + $0xcd0] sm:$0xff] }
 0x39f   : > { %v6902_v14 = vpop.f32.mrf.mxu0  ;;  %7195 = vmatprep.subr.bf16.mxu0 %v8384_v42 }
 0x3a1   : > { %7097 = vmatpush2.bf16.msra.mxu1 %v8541_v34 }
 0x3a2   : > { %7098 = vmatprep.subr.bf16.mxu1 %v8534_v54  ;;  %7196 = vmatpush1.bf16.msra.mxu0 %v8383_v40  ;;  %v4041_v54 = vld [vmem:[#allocation6 + $0xcf0] sm:$0xff]  ;;  %v8757_v40 = vcombine.low %v4045_v31, %v4049_v32 }
 0x3a3   : > { %7197 = vmatprep.subr.bf16.mxu0 %v8376_v52  ;;  %v4021_v31 = vld [vmem:[#allocation6 + $0xc50] sm:$0xff] }
 0x3a4   : > { %v4025_v32 = vld [vmem:[#allocation6 + $0xc70] sm:$0xff] }
 0x3a5   : > { %7099 = vmatpush2.bf16.msra.mxu1 %v8533_v60 }
 0x3a6   : > { %7150 = vmatprep.subr.bf16.mxu1 %v8782_v27  ;;  %7198 = vmatpush1.bf16.msra.mxu0 %v8375_v2  ;;  %v8750_v27 = vcombine.high %v4037_v53, %v4041_v54 }
 0x3a7   : > { %7199 = vmatprep.subr.bf16.mxu0 %v8368_v8 }
 0x3a8   : > { %7101 = vmatmul.mubr.bf16.vlgmr.msra.gmra.mxu1 %v9471_v23  ;;  %v6856_v15 = vpop.f32.mrf.mxu1 }
 0x3a9   : > { %v9550_v18 = vadd.f32 %v6856_v15, %v9534_v7  ;;  %7151 = vmatpush1.bf16.msra.mxu1 %v8781_v9  ;;  %7182 = vmatprep.mubr.bf16.mxu1 %v9514_v26  ;;  %v8359_v7 = vcombine.low %v3646_v19, %v3650_v10  ;;  %v4029_v19 = vld [vmem:[#allocation6 + $0xc90] sm:$0xff] }
 0x3aa   : > { %v6858_v24 = vpop.f32.mrf.mxu1  ;;  %7152 = vmatprep.subr.bf16.mxu1 %v8774_v36  ;;  %7200 = vmatpush1.bf16.msra.mxu0 %v8367_v1  ;;  %v4033_v10 = vld [vmem:[#allocation6 + $0xcb0] sm:$0xff]  ;;  %v8749_v36 = vcombine.low %v4037_v53, %v4041_v54  ;;  %v8464_v1 = vcombine.high %v3750_v62, %v3754_v0  ;;  %v8733_v54 = vcombine.low %v4021_v31, %v4025_v32 }
 0x3ab   : > { %v7355_v38 = vrot.slane %v9550_v18, 4  ;;  %v7412_v59 = vmul.f32 %v9550_v18, %v9550_v18  ;;  %v9557_v30 = vadd.f32 %v6858_v24, %v9538_v11  ;;  %7201 = vmatprep.subr.bf16.mxu0 %v8360_v35  ;;  %v3634_v11 = vld [vmem:[#allocation6 + $0x38] sm:$0xff]  ;;  %v8742_v29 = vcombine.high %v4029_v19, %v4033_v10 }
 0x3ac   : > { %v6860_v39 = vpop.f32.mrf.mxu1  ;;  %v8344_v33 = vcombine.high %v3630_v28, %v3634_v11  ;;  %v8343_v2 = vcombine.low %v3630_v28, %v3634_v11  ;;  %v8463_v24 = vcombine.low %v3750_v62, %v3754_v0  ;;  %v8734_v11 = vcombine.high %v4021_v31, %v4025_v32  ;;  %v4133_v62 = vld [vmem:[#allocation6 + $0xfd0] sm:$0xff]  ;;  %v8966_v32 = vld [vmem:[#allocation9] sm:$0xff] }
 0x3ad   : > { %v7356_v49 = vadd.f32 %v7355_v38, %v9550_v18  ;;  %v7420_v44 = vrot.slane %v7412_v59, 4  ;;  %v7361_v45 = vrot.slane %v9557_v30, 4  ;;  %v7413_v58 = vmul.f32 %v9557_v30, %v9557_v30  ;;  %7153 = vmatpush1.bf16.msra.mxu1 %v8773_v4  ;;  %v3742_v4 = vld [vmem:[#allocation6 + $0x398] sm:$0xff]  ;;  %v4137_v0 = vld [vmem:[#allocation6 + $0xff0] sm:$0xff] }
 0x3ae   : > { %v6861_v47 = vpop.f32.mrf.mxu1  ;;  %7154 = vmatprep.subr.bf16.mxu1 %v8766_v25  ;;  %7202 = vmatpush1.bf16.msra.mxu0 %v8359_v7  ;;  %v8456_v39 = vcombine.high %v3742_v4, %v3746_v22 }
 0x3af   : > { %v7357_v42 = vrot.slane %v7356_v49, 2  ;;  %v7421_v34 = vadd.f32 %v7420_v44, %v7412_v59  ;;  %v7362_v48 = vadd.f32 %v7361_v45, %v9557_v30  ;;  %v7426_v51 = vrot.slane %v7413_v58, 4  ;;  %7203 = vmatprep.subr.bf16.mxu0 %v8352_v43  ;;  %v3734_v45 = vld [vmem:[#allocation6 + $0x358] sm:$0xff] }
 0x3b0   : > { %v8741_v44 = vcombine.low %v4029_v19, %v4033_v10  ;;  %v8846_v19 = vcombine.high %v4133_v62, %v4137_v0 }
 0x3b1   : > { %v7358_v57 = vadd.f32 %v7357_v42, %v7356_v49  ;;  %v7422_v14 = vrot.slane %v7421_v34, 2  ;;  %v7363_v52 = vrot.slane %v7362_v48, 2  ;;  %v7427_v60 = vadd.f32 %v7426_v51, %v7413_v58  ;;  %7155 = vmatpush1.bf16.msra.mxu1 %v8765_v41  ;;  %v3738_v58 = vld [vmem:[#allocation6 + $0x378] sm:$0xff]  ;;  %v4013_v42 = vld [vmem:[#allocation6 + $0xc10] sm:$0xff] }
 0x3b2   : > { %7156 = vmatprep.subr.bf16.mxu1 %v8758_v63  ;;  %7204 = vmatpush1.bf16.msra.mxu0 %v8351_v3  ;;  %v8455_v3 = vcombine.low %v3742_v4, %v3746_v22  ;;  %v8448_v51 = vcombine.high %v3734_v45, %v3738_v58  ;;  %v3714_v4 = vld [vmem:[#allocation6 + $0x2b8] sm:$0xff] }
 0x3b3   : > { %v7359_v20 = vrot.slane %v7358_v57, 1  ;;  %v7423_v6 = vadd.f32 %v7422_v14, %v7421_v34  ;;  %v7364_v8 = vadd.f32 %v7363_v52, %v7362_v48  ;;  %v7428_v9 = vrot.slane %v7427_v60, 2  ;;  %7205 = vmatprep.subr.bf16.mxu0 %v8344_v33  ;;  %v4017_v34 = vld [vmem:[#allocation6 + $0xc30] sm:$0xff]  ;;  %v3730_v33 = vld [vmem:[#allocation6 + $0x338] sm:$0xff] }
 0x3b4   : > { %v8726_v14 = vcombine.high %v4013_v42, %v4017_v34 }
 0x3b5   : > { %v7360_v13 = vadd.f32 %v7359_v20, %v7358_v57  ;;  %v7424_v16 = vrot.slane %v7423_v6, 1  ;;  %v7365_v15 = vrot.slane %v7364_v8, 1  ;;  %v7429_v35 = vadd.f32 %v7428_v9, %v7427_v60  ;;  %7157 = vmatpush1.bf16.msra.mxu1 %v8757_v40  ;;  %v3726_v40 = vld [vmem:[#allocation6 + $0x318] sm:$0xff] }
 0x3b6   : > { %7158 = vmatprep.subr.bf16.mxu1 %v8750_v27  ;;  %7206 = vmatpush1.bf16.msra.mxu0 %v8343_v2  ;;  %v8447_v60 = vcombine.low %v3734_v45, %v3738_v58  ;;  %v8440_v2 = vcombine.high %v3726_v40, %v3730_v33  ;;  %v8725_v20 = vcombine.low %v4013_v42, %v4017_v34  ;;  %v9583_v45 = vsub.s32 6, %v9373_v50 }
 0x3b7   : > { %v9564_v25 = vmul.f32 0.125, %v7360_v13  ;;  %v7425_v38 = vadd.f32 %v7424_v16, %v7423_v6  ;;  %v7366_v59 = vadd.f32 %v7365_v15, %v7364_v8  ;;  %v7430_v7 = vrot.slane %v7429_v35, 1  ;;  %7207 = vmatprep.subr.bf16.mxu0 %v8464_v1  ;;  %v3718_v6 = vld [vmem:[#allocation6 + $0x2d8] sm:$0xff]  ;;  %v4129_v1 = vld [vmem:[#allocation6 + $0xfb0] sm:$0xff] }
 0x3b8   : > { %v3722_v8 = vld [vmem:[#allocation6 + $0x2f8] sm:$0xff]  ;;  %v8439_v10 = vcombine.low %v3726_v40, %v3730_v33  ;;  %v9573_v16 = vsub.s32 1, %v9373_v50  ;;  %v8845_v15 = vcombine.low %v4133_v62, %v4137_v0  ;;  %v7619_v33 = vrot.slane %v8966_v32, %v9583_v45  ;;  %v4101_v62 = vld [vmem:[#allocation6 + $0xed0] sm:$0xff] }
 0x3b9   : > { %v7468_v41 = vmul.f32 0.125, %v7425_v38  ;;  %v7476_v43 = vmul.f32 %v9564_v25, %v9564_v25  ;;  %v9568_v49 = vmul.f32 0.125, %v7366_v59  ;;  %7159 = vmatpush1.bf16.msra.mxu1 %v8749_v36  ;;  %v7431_v28 = vadd.f32 %v7430_v7, %v7429_v35  ;;  %v4125_v36 = vld [vmem:[#allocation6 + $0xf90] sm:$0xff]  ;;  %v3710_v35 = vld [vmem:[#allocation6 + $0x298] sm:$0xff] }
 0x3ba   : > { %7160 = vmatprep.subr.bf16.mxu1 %v8742_v29  ;;  %7208 = vmatpush2.bf16.msra.mxu0 %v8463_v24  ;;  %v8432_v13 = vcombine.high %v3718_v6, %v3722_v8  ;;  %v8838_v22 = vcombine.high %v4125_v36, %v4129_v1  ;;  %v9576_v29 = vsub.s32 2, %v9373_v50  ;;  %v8431_v24 = vcombine.low %v3718_v6, %v3722_v8  ;;  %v4117_v38 = vld [vmem:[#allocation6 + $0xf50] sm:$0xff]  ;;  %v3942_v8 = vld [vmem:[#allocation6 + $0x9d8] sm:$0xff] }
 0x3bb   : > { %v7484_v47 = vsub.f32 %v7468_v41, %v7476_v43  ;;  %v7477_v63 = vmul.f32 %v9568_v49, %v9568_v49  ;;  %v7469_v48 = vmul.f32 0.125, %v7431_v28  ;;  %7209 = vmatprep.subr.bf16.mxu0 %v8456_v39  ;;  %v4121_v59 = vld [vmem:[#allocation6 + $0xf70] sm:$0xff]  ;;  %v9579_v7 = vsub.s32 5, %v9373_v50  ;;  %v3702_v43 = vld [vmem:[#allocation6 + $0x258] sm:$0xff] }
 0x3bc   : > { %v8424_v31 = vcombine.high %v3710_v35, %v3714_v4  ;;  %v7535_v39 = vrot.slane %v8966_v32, %v9573_v16  ;;  %v8837_v41 = vcombine.low %v4125_v36, %v4129_v1  ;;  %v8830_v58 = vcombine.high %v4117_v38, %v4121_v59  ;;  %v4105_v0 = vld [vmem:[#allocation6 + $0xef0] sm:$0xff] }
 0x3bd   : > { %v7492_v53 = vmax.f32 %v7484_v47, 0.0  ;;  %7161 = vmatpush1.bf16.msra.mxu1 %v8741_v44  ;;  %v7485_v57 = vsub.f32 %v7469_v48, %v7477_v63  ;;  %v3706_v44 = vld [vmem:[#allocation6 + $0x278] sm:$0xff]  ;;  %v7615_v28 = vrot.slane %v8966_v32, %v9576_v29  ;;  %v4109_v47 = vld [vmem:[#allocation6 + $0xf10] sm:$0xff]  ;;  %v7500_v34 = vsub.f32 %v9550_v18, %v9564_v25 }
 0x3be   : > { %7162 = vmatprep.subr.bf16.mxu1 %v8734_v11  ;;  %7210 = vmatpush2.bf16.msra.mxu0 %v8455_v3  ;;  %v8423_v11 = vcombine.low %v3710_v35, %v3714_v4  ;;  %v4113_v63 = vld [vmem:[#allocation6 + $0xf30] sm:$0xff]  ;;  %v7539_v3 = vrot.slane %v8966_v32, %v9579_v7  ;;  %v8416_v42 = vcombine.high %v3702_v43, %v3706_v44  ;;  %v9596_v4 = vld [vmem:[#allocation7] sm:$0xff] }
 0x3bf   : > { %v7508_v52 = vadd.f32 1e-05, %v7492_v53  ;;  %v7493_v27 = vmax.f32 %v7485_v57, 0.0  ;;  %7211 = vmatprep.subr.bf16.mxu0 %v8448_v51  ;;  %v7575_v48 = vrot.slane %v7535_v39, %v9573_v16  ;;  %v8829_v51 = vcombine.low %v4117_v38, %v4121_v59  ;;  %v3694_v53 = vld [vmem:[#allocation6 + $0x218] sm:$0xff] }
 0x3c0   : > { %v8822_v57 = vcombine.high %v4109_v47, %v4113_v63  ;;  %v7501_v18 = vsub.f32 %v9557_v30, %v9568_v49  ;;  %v7579_v25 = vrot.slane %v7539_v3, %v9573_v16  ;;  %v8821_v6 = vcombine.low %v4109_v47, %v4113_v63  ;;  %v4097_v30 = vld [vmem:[#allocation6 + $0xeb0] sm:$0xff]  ;;  %v3934_v38 = vld [vmem:[#allocation6 + $0x998] sm:$0xff] }
 0x3c1   : > { %8946 = vrsqrt.f32 %v7508_v52  ;;  %7163 = vmatpush1.bf16.msra.mxu1 %v8733_v54  ;;  %v7509_v9 = vadd.f32 1e-05, %v7493_v27  ;;  %v3698_v54 = vld [vmem:[#allocation6 + $0x238] sm:$0xff]  ;;  %v7655_v52 = vrot.slane %v7615_v28, %v9576_v29  ;;  %v8814_v36 = vcombine.high %v4101_v62, %v4105_v0 }
 0x3c2   : > { %7164 = vmatprep.subr.bf16.mxu1 %v8726_v14  ;;  %7212 = vmatpush2.bf16.msra.mxu0 %v8447_v60  ;;  %v8415_v60 = vcombine.low %v3702_v43, %v3706_v44  ;;  %v8408_v27 = vcombine.high %v3694_v53, %v3698_v54  ;;  %v3938_v59 = vld [vmem:[#allocation6 + $0x9b8] sm:$0xff]  ;;  %v4089_v43 = vld [vmem:[#allocation6 + $0xe70] sm:$0xff]  ;;  %v7721_v44 = vrot.slane %v9596_v4, %v9376_v61 }
 0x3c3   : > { %8948 = vrsqrt.f32 %v7509_v9  ;;  %7213 = vmatprep.subr.bf16.mxu0 %v8440_v2  ;;  %v3946_v9 = vld [vmem:[#allocation6 + $0x9f8] sm:$0xff]  ;;  %v8647_v61 = vcombine.low %v3934_v38, %v3938_v59 }
 0x3c4   : > { %v8656_v35 = vcombine.high %v3942_v8, %v3946_v9  ;;  %v8655_v39 = vcombine.low %v3942_v8, %v3946_v9  ;;  %v3926_v3 = vld [vmem:[#allocation6 + $0x958] sm:$0xff] }
 0x3c5   : > { %7165 = vmatpush1.bf16.msra.mxu1 %v8725_v20  ;;  %v3910_v8 = vld [vmem:[#allocation6 + $0x8d8] sm:$0xff] }
 0x3c6   : > { %7166 = vmatprep.subr.bf16.mxu1 %v8846_v19  ;;  %7214 = vmatpush2.bf16.msra.mxu0 %v8439_v10  ;;  %v7659_v10 = vrot.slane %v7619_v33, %v9576_v29  ;;  %v3914_v9 = vld [vmem:[#allocation6 + $0x8f8] sm:$0xff] }
 0x3c7   : > { %7215 = vmatprep.subr.bf16.mxu0 %v8432_v13  ;;  %v8407_v13 = vcombine.low %v3694_v53, %v3698_v54  ;;  %v4077_v53 = vld [vmem:[#allocation6 + $0xe10] sm:$0xff] }
 0x3c8   : > { %v4081_v54 = vld [vmem:[#allocation6 + $0xe30] sm:$0xff] }
 0x3c9   : > { %7167 = vmatpush2.bf16.msra.mxu1 %v8845_v15  ;;  %v4093_v15 = vld [vmem:[#allocation6 + $0xe90] sm:$0xff] }
 0x3ca   : > { %7168 = vmatprep.subr.bf16.mxu1 %v8838_v22  ;;  %7216 = vmatpush2.bf16.msra.mxu0 %v8431_v24  ;;  %v8813_v24 = vcombine.low %v4101_v62, %v4105_v0  ;;  %v8806_v32 = vcombine.high %v4093_v15, %v4097_v30  ;;  %v8805_v63 = vcombine.low %v4093_v15, %v4097_v30  ;;  %v3922_v62 = vld [vmem:[#allocation6 + $0x938] sm:$0xff] }
 0x3cb   : > { %7217 = vmatprep.subr.bf16.mxu0 %v8424_v31  ;;  %v3902_v30 = vld [vmem:[#allocation6 + $0x898] sm:$0xff] }
 0x3cd   : > { %7169 = vmatpush2.bf16.msra.mxu1 %v8837_v41  ;;  %v4085_v41 = vld [vmem:[#allocation6 + $0xe50] sm:$0xff] }
 0x3ce   : > { %v8947_v40 = vpop.eup %8946  ;;  %7170 = vmatprep.subr.bf16.mxu1 %v8830_v58  ;;  %7218 = vmatpush2.bf16.msra.mxu0 %v8423_v11  ;;  %v7725_v58 = vrot.slane %v9596_v4, %v9573_v16  ;;  %v8648_v11 = vcombine.high %v3934_v38, %v3938_v59  ;;  %v3802_v38 = vld [vmem:[#allocation6 + $0x578] sm:$0xff] }
 0x3cf   : > { %v7524_v14 = vmul.f32 %v8947_v40, %v7500_v34  ;;  %7219 = vmatprep.subr.bf16.mxu0 %v8416_v42  ;;  %v3930_v42 = vld [vmem:[#allocation6 + $0x978] sm:$0xff] }
 0x3d0   : > { %v8949_v2 = vpop.eup %8948 }
 0x3d1   : > { %v7604_v20 = vmul.f32 %v7575_v48, %v7524_v14  ;;  %7171 = vmatpush2.bf16.msra.mxu1 %v8829_v51  ;;  %v7525_v19 = vmul.f32 %v8949_v2, %v7501_v18  ;;  %v8798_v48 = vcombine.high %v4085_v41, %v4089_v43  ;;  %v8640_v14 = vcombine.high %v3926_v3, %v3930_v42 }
 0x3d2   : > { %7172 = vmatprep.subr.bf16.mxu1 %v8822_v57  ;;  %7220 = vmatpush2.bf16.msra.mxu0 %v8415_v60  ;;  %v3918_v60 = vld [vmem:[#allocation6 + $0x918] sm:$0xff]  ;;  %v8790_v18 = vcombine.high %v4077_v53, %v4081_v54 }
 0x3d3   : > { %v7684_v1 = vadd.f32 %v7655_v52, %v7604_v20  ;;  %v7605_v49 = vmul.f32 %v7579_v25, %v7525_v19  ;;  %7221 = vmatprep.subr.bf16.mxu0 %v8408_v27  ;;  %v8797_v52 = vcombine.low %v4085_v41, %v4089_v43  ;;  %v3814_v25 = vld [vmem:[#allocation6 + $0x5d8] sm:$0xff]  ;;  %v8632_v20 = vcombine.high %v3918_v60, %v3922_v62 }
 0x3d4   : > { %v3818_v27 = vld [vmem:[#allocation6 + $0x5f8] sm:$0xff] }
 0x3d5   : > { %v7700_v22 = vmul.f32 0.2, %v7684_v1  ;;  %7173 = vmatpush2.bf16.msra.mxu1 %v8821_v6  ;;  %vm7692_vm10 = vcmp.gt.f32.partialorder %v7684_v1, 0.0  ;;  %v7685_v31 = vadd.f32 %v7659_v10, %v7605_v49  ;;  %v8789_v6 = vcombine.low %v4077_v53, %v4081_v54  ;;  %v3906_v49 = vld [vmem:[#allocation6 + $0x8b8] sm:$0xff] }
 0x3d6   : > { %7174 = vmatprep.subr.bf16.mxu1 %v8814_v36  ;;  %7222 = vmatpush2.bf16.msra.mxu0 %v8407_v13  ;;  %v8528_v19 = vcombine.high %v3814_v25, %v3818_v27  ;;  %v8631_v10 = vcombine.low %v3918_v60, %v3922_v62  ;;  %v3806_v36 = vld [vmem:[#allocation6 + $0x598] sm:$0xff]  ;;  %v8624_v13 = vcombine.high %v3910_v8, %v3914_v9 }
 0x3d7   : > { %v7701_v28 = vmul.f32 0.2, %v7685_v31  ;;  %7273 = vmatprep.subr.bf16.mxu0 %v8656_v35  ;;  %vm7693_vm11 = vcmp.gt.f32.partialorder %v7685_v31, 0.0  ;;  %v7708_v47 = vsel %vm7692_vm10, %v7684_v1, %v7700_v22  ;;  %v3810_v1 = vld [vmem:[#allocation6 + $0x5b8] sm:$0xff]  ;;  %v8527_v15 = vcombine.low %v3814_v25, %v3818_v27 }
 0x3d8   : > { %v7758_v40 = vmul.f32 %v7721_v44, %v7708_v47  ;;  %v8520_v35 = vcombine.high %v3806_v36, %v3810_v1  ;;  %v8623_v22 = vcombine.low %v3910_v8, %v3914_v9  ;;  %v3894_v41 = vld [vmem:[#allocation6 + $0x858] sm:$0xff] }
 0x3d9   : > { %7175 = vmatpush2.bf16.msra.mxu1 %v8813_v24  ;;  %v9602_v34 = vpop.f32.mrf.mxu0  ;;  %7224 = vmatmul.mubr.bf16.vlgmr.msra.gmra.mxu0 %v9469_v21  ;;  %v7709_v51 = vsel %vm7693_vm11, %v7685_v31, %v7701_v28  ;;  %v3798_v24 = vld [vmem:[#allocation6 + $0x558] sm:$0xff]  ;;  %v8616_v31 = vcombine.high %v3902_v30, %v3906_v49 }
 0x3da   : > { %7176 = vmatprep.subr.bf16.mxu1 %v8806_v32  ;;  %7274 = vmatpush1.bf16.msra.mxu0 %v8655_v39  ;;  %v7759_v33 = vmul.f32 %v7725_v58, %v7709_v51  ;;  %v8519_v39 = vcombine.low %v3806_v36, %v3810_v1  ;;  %v3898_v43 = vld [vmem:[#allocation6 + $0x878] sm:$0xff]  ;;  %v8512_v58 = vcombine.high %v3798_v24, %v3802_v38 }
 0x3db   : > { %7305 = vmatprep.mubr.bf16.mxu0 %v9493_v56  ;;  %v9606_v57 = vpop.f32.mrf.mxu0  ;;  %7275 = vmatprep.subr.bf16.mxu0 %v8648_v11  ;;  %v8639_v56 = vcombine.low %v3926_v3, %v3930_v42  ;;  %v8615_v11 = vcombine.low %v3902_v30, %v3906_v49  ;;  %v3790_v47 = vld [vmem:[#allocation6 + $0x518] sm:$0xff]  ;;  %v8607_v54 = vcombine.low %v3894_v41, %v3898_v43 }
 0x3dc   : > { %v9608_v0 = vadd.f32 %v7759_v33, %v7758_v40  ;;  %v3890_v51 = vld [vmem:[#allocation6 + $0x838] sm:$0xff] }
 0x3dd   : > { %7177 = vmatpush2.bf16.msra.mxu1 %v8805_v63  ;;  %v6983_v21 = vpop.f32.mrf.mxu0  ;;  %v3794_v63 = vld [vmem:[#allocation6 + $0x538] sm:$0xff] }
 0x3de   : > { %7178 = vmatprep.subr.bf16.mxu1 %v8798_v48  ;;  %7276 = vmatpush1.bf16.msra.mxu0 %v8647_v61  ;;  %v3886_v48 = vld [vmem:[#allocation6 + $0x818] sm:$0xff] }
 0x3df   : > { %v6984_v2 = vpop.f32.mrf.mxu0  ;;  %7277 = vmatprep.subr.bf16.mxu0 %v8640_v14  ;;  %v3782_v40 = vld [vmem:[#allocation6 + $0x4d8] sm:$0xff]  ;;  %v8503_v14 = vcombine.low %v3790_v47, %v3794_v63  ;;  %v8599_v21 = vcombine.low %v3886_v48, %v3890_v51 }
 0x3e0   : > { %v3786_v33 = vld [vmem:[#allocation6 + $0x4f8] sm:$0xff] }
 0x3e1   : > { %7179 = vmatpush2.bf16.msra.mxu1 %v8797_v52  ;;  %v4006_v52 = vld [vmem:[#allocation6 + $0xbd8] sm:$0xff]  ;;  %v8496_v62 = vcombine.high %v3782_v40, %v3786_v33  ;;  %v8495_v25 = vcombine.low %v3782_v40, %v3786_v33 }
 0x3e2   : > { %7180 = vmatprep.subr.bf16.mxu1 %v8790_v18  ;;  %7278 = vmatpush1.bf16.msra.mxu0 %v8639_v56  ;;  %v4010_v60 = vld [vmem:[#allocation6 + $0xbf8] sm:$0xff] }
 0x3e3   : > { %7279 = vmatprep.subr.bf16.mxu0 %v8632_v20  ;;  %v3774_v18 = vld [vmem:[#allocation6 + $0x498] sm:$0xff]  ;;  %v8720_v56 = vcombine.high %v4006_v52, %v4010_v60 }
 0x3e4   : > { %v3998_v27 = vld [vmem:[#allocation6 + $0xb98] sm:$0xff] }
 0x3e5   : > { %7181 = vmatpush2.bf16.msra.mxu1 %v8789_v6  ;;  %v4002_v2 = vld [vmem:[#allocation6 + $0xbb8] sm:$0xff]  ;;  %v8719_v6 = vcombine.low %v4006_v52, %v4010_v60 }
 0x3e6   : > { %7232 = vmatprep.subr.bf16.mxu1 %v8528_v19  ;;  %7280 = vmatpush1.bf16.msra.mxu0 %v8631_v10  ;;  %v3766_v8 = vld [vmem:[#allocation6 + $0x458] sm:$0xff]  ;;  %v8712_v19 = vcombine.high %v3998_v27, %v4002_v2 }
 0x3e7   : > { %7281 = vmatprep.subr.bf16.mxu0 %v8624_v13  ;;  %v3770_v9 = vld [vmem:[#allocation6 + $0x478] sm:$0xff] }
 0x3e8   : > { %v6938_v59 = vpop.f32.mrf.mxu1  ;;  %7183 = vmatmul.mubr.bf16.vlgmr.msra.gmra.mxu1 %v9516_v12  ;;  %v3990_v36 = vld [vmem:[#allocation6 + $0xb58] sm:$0xff]  ;;  %v8480_v13 = vcombine.high %v3766_v8, %v3770_v9 }
 0x3e9   : > { %v6939_v32 = vadd.f32 %v6938_v59, %v9542_v46  ;;  %7233 = vmatpush1.bf16.msra.mxu1 %v8527_v15  ;;  %7264 = vmatprep.mubr.bf16.mxu1 %v9447_v55  ;;  %v8608_v46 = vcombine.high %v3894_v41, %v3898_v43  ;;  %v8511_v55 = vcombine.low %v3798_v24, %v3802_v38  ;;  %v3994_v1 = vld [vmem:[#allocation6 + $0xb78] sm:$0xff] }
 0x3ea   : > { %v6940_v44 = vpop.f32.mrf.mxu1  ;;  %7234 = vmatprep.subr.bf16.mxu1 %v8520_v35  ;;  %7282 = vmatpush1.bf16.msra.mxu0 %v8623_v22  ;;  %v8711_v15 = vcombine.low %v3998_v27, %v4002_v2  ;;  %v3758_v30 = vld [vmem:[#allocation6 + $0x418] sm:$0xff]  ;;  %v8704_v35 = vcombine.high %v3990_v36, %v3994_v1  ;;  %v8479_v22 = vcombine.low %v3766_v8, %v3770_v9 }
 0x3eb   : > { %v6941_v28 = vadd.f32 %v6940_v44, %v9546_v37  ;;  %v9615_v3 = vadd.f32 %v9602_v34, %v6939_v32  ;;  %7283 = vmatprep.subr.bf16.mxu0 %v8616_v31  ;;  %v8504_v37 = vcombine.high %v3790_v47, %v3794_v63  ;;  %v8600_v34 = vcombine.high %v3886_v48, %v3890_v51  ;;  %v3762_v49 = vld [vmem:[#allocation6 + $0x438] sm:$0xff] }
 0x3ec   : > { %v6942_v42 = vpop.f32.mrf.mxu1  ;;  %v3982_v24 = vld [vmem:[#allocation6 + $0xb18] sm:$0xff]  ;;  %v8472_v59 = vcombine.high %v3758_v30, %v3762_v49  ;;  %v8703_v31 = vcombine.low %v3990_v36, %v3994_v1  ;;  %v8471_v43 = vcombine.low %v3758_v30, %v3762_v49 }
 0x3ed   : > { %7235 = vmatpush1.bf16.msra.mxu1 %v8519_v39  ;;  %v9618_v61 = vadd.f32 %v9606_v57, %v6941_v28  ;;  %v3778_v57 = vld [vmem:[#allocation6 + $0x4b8] sm:$0xff] }
 0x3ee   : > { %v6943_v53 = vpop.f32.mrf.mxu1  ;;  %7236 = vmatprep.subr.bf16.mxu1 %v8512_v58  ;;  %7284 = vmatpush1.bf16.msra.mxu0 %v8615_v11  ;;  %v8488_v20 = vcombine.high %v3774_v18, %v3778_v57  ;;  %v8487_v10 = vcombine.low %v3774_v18, %v3778_v57  ;;  %v3986_v38 = vld [vmem:[#allocation6 + $0xb38] sm:$0xff] }
 0x3ef   : > { %7285 = vmatprep.subr.bf16.mxu0 %v8608_v46  ;;  %v3878_v32 = vld [vmem:[#allocation6 + $0x7d8] sm:$0xff]  ;;  %v8696_v41 = vcombine.high %v3982_v24, %v3986_v38  ;;  %v8695_v11 = vcombine.low %v3982_v24, %v3986_v38 }
 0x3f0   : > { %v3882_v39 = vld [vmem:[#allocation6 + $0x7f8] sm:$0xff] }
 0x3f1   : > { %7237 = vmatpush1.bf16.msra.mxu1 %v8511_v55  ;;  %v3974_v44 = vld [vmem:[#allocation6 + $0xad8] sm:$0xff]  ;;  %v8592_v28 = vcombine.high %v3878_v32, %v3882_v39  ;;  %v8591_v46 = vcombine.low %v3878_v32, %v3882_v39 }
 0x3f2   : > { %7238 = vmatprep.subr.bf16.mxu1 %v8504_v37  ;;  %7286 = vmatpush1.bf16.msra.mxu0 %v8607_v54  ;;  %v3978_v58 = vld [vmem:[#allocation6 + $0xaf8] sm:$0xff] }
 0x3f3   : > { %7287 = vmatprep.subr.bf16.mxu0 %v8600_v34  ;;  %v3870_v47 = vld [vmem:[#allocation6 + $0x798] sm:$0xff]  ;;  %v8688_v42 = vcombine.high %v3974_v44, %v3978_v58  ;;  %v8687_v53 = vcombine.low %v3974_v44, %v3978_v58 }
 0x3f4   : > { %v3874_v63 = vld [vmem:[#allocation6 + $0x7b8] sm:$0xff] }
 0x3f5   : > { %7239 = vmatpush1.bf16.msra.mxu1 %v8503_v14  ;;  %v3966_v55 = vld [vmem:[#allocation6 + $0xa98] sm:$0xff]  ;;  %v8584_v51 = vcombine.high %v3870_v47, %v3874_v63  ;;  %v8583_v33 = vcombine.low %v3870_v47, %v3874_v63 }
 0x3f6   : > { %7240 = vmatprep.subr.bf16.mxu1 %v8496_v62  ;;  %7288 = vmatpush1.bf16.msra.mxu0 %v8599_v21  ;;  %v3970_v48 = vld [vmem:[#allocation6 + $0xab8] sm:$0xff] }
 0x3f7   : > { %7289 = vmatprep.subr.bf16.mxu0 %v8720_v56  ;;  %v3862_v37 = vld [vmem:[#allocation6 + $0x758] sm:$0xff]  ;;  %v8680_v40 = vcombine.high %v3966_v55, %v3970_v48  ;;  %v8679_v60 = vcombine.low %v3966_v55, %v3970_v48 }
 0x3f8   : > { %v3866_v54 = vld [vmem:[#allocation6 + $0x778] sm:$0xff] }
 0x3f9   : > { %7241 = vmatpush1.bf16.msra.mxu1 %v8495_v25  ;;  %v3958_v34 = vld [vmem:[#allocation6 + $0xa58] sm:$0xff]  ;;  %v8576_v52 = vcombine.high %v3862_v37, %v3866_v54  ;;  %v8575_v57 = vcombine.low %v3862_v37, %v3866_v54 }
 0x3fa   : > { %7242 = vmatprep.subr.bf16.mxu1 %v8488_v20  ;;  %7290 = vmatpush2.bf16.msra.mxu0 %v8719_v6  ;;  %v3962_v14 = vld [vmem:[#allocation6 + $0xa78] sm:$0xff] }
 0x3fb   : > { %7291 = vmatprep.subr.bf16.mxu0 %v8712_v19  ;;  %v3854_v62 = vld [vmem:[#allocation6 + $0x718] sm:$0xff]  ;;  %v8672_v18 = vcombine.high %v3958_v34, %v3962_v14  ;;  %v8671_v2 = vcombine.low %v3958_v34, %v3962_v14 }
 0x3fc   : > { %v3858_v21 = vld [vmem:[#allocation6 + $0x738] sm:$0xff] }
 0x3fd   : > { %7243 = vmatpush1.bf16.msra.mxu1 %v8487_v10  ;;  %v3950_v56 = vld [vmem:[#allocation6 + $0xa18] sm:$0xff]  ;;  %v8568_v27 = vcombine.high %v3854_v62, %v3858_v21  ;;  %v8567_v9 = vcombine.low %v3854_v62, %v3858_v21 }
 0x3fe   : > { %7244 = vmatprep.subr.bf16.mxu1 %v8480_v13  ;;  %7292 = vmatpush2.bf16.msra.mxu0 %v8711_v15  ;;  %v3954_v25 = vld [vmem:[#allocation6 + $0xa38] sm:$0xff] }
 0x3ff   : > { %7293 = vmatprep.subr.bf16.mxu0 %v8704_v35  ;;  %v3846_v20 = vld [vmem:[#allocation6 + $0x6d8] sm:$0xff]  ;;  %v8664_v8 = vcombine.high %v3950_v56, %v3954_v25  ;;  %v8663_v10 = vcombine.low %v3950_v56, %v3954_v25 }
 0x400   : > { %v3850_v6 = vld [vmem:[#allocation6 + $0x6f8] sm:$0xff] }
 0x401   : > { %7245 = vmatpush1.bf16.msra.mxu1 %v8479_v22  ;;  %v8560_v19 = vcombine.high %v3846_v20, %v3850_v6  ;;  %v3838_v36 = vld [vmem:[#allocation6 + $0x698] sm:$0xff]  ;;  %v8559_v13 = vcombine.low %v3846_v20, %v3850_v6 }
 0x402   : > { %7246 = vmatprep.subr.bf16.mxu1 %v8472_v59  ;;  %7294 = vmatpush2.bf16.msra.mxu0 %v8703_v31  ;;  %v3842_v1 = vld [vmem:[#allocation6 + $0x6b8] sm:$0xff] }
 0x403   : > { %7295 = vmatprep.subr.bf16.mxu0 %v8696_v41  ;;  %v8552_v15 = vcombine.high %v3838_v36, %v3842_v1  ;;  %v3830_v30 = vld [vmem:[#allocation6 + $0x658] sm:$0xff]  ;;  %v8551_v35 = vcombine.low %v3838_v36, %v3842_v1 }
 0x404   : > { %v3834_v49 = vld [vmem:[#allocation6 + $0x678] sm:$0xff] }
 0x405   : > { %7247 = vmatpush1.bf16.msra.mxu1 %v8471_v43  ;;  %v8544_v24 = vcombine.high %v3830_v30, %v3834_v49  ;;  %v3822_v38 = vld [vmem:[#allocation6 + $0x618] sm:$0xff]  ;;  %v8543_v32 = vcombine.low %v3830_v30, %v3834_v49 }
 0x406   : > { %7248 = vmatprep.subr.bf16.mxu1 %v8592_v28  ;;  %7296 = vmatpush2.bf16.msra.mxu0 %v8695_v11  ;;  %v3826_v59 = vld [vmem:[#allocation6 + $0x638] sm:$0xff] }
 0x407   : > { %7297 = vmatprep.subr.bf16.mxu0 %v8688_v42  ;;  %v8536_v41 = vcombine.high %v3822_v38, %v3826_v59  ;;  %v4070_v43 = vld [vmem:[#allocation6 + $0xdd8] sm:$0xff]  ;;  %v8535_v28 = vcombine.low %v3822_v38, %v3826_v59 }
 0x408   : > { %v4074_v44 = vld [vmem:[#allocation6 + $0xdf8] sm:$0xff] }
 0x409   : > { %7249 = vmatpush2.bf16.msra.mxu1 %v8591_v46  ;;  %v8784_v11 = vcombine.high %v4070_v43, %v4074_v44  ;;  %v4062_v47 = vld [vmem:[#allocation6 + $0xd98] sm:$0xff] }
 0x40a   : > { %7250 = vmatprep.subr.bf16.mxu1 %v8584_v51  ;;  %7298 = vmatpush2.bf16.msra.mxu0 %v8687_v53  ;;  %v4066_v63 = vld [vmem:[#allocation6 + $0xdb8] sm:$0xff] }
 0x40b   : > { %7299 = vmatprep.subr.bf16.mxu0 %v8680_v40  ;;  %v8776_v42 = vcombine.high %v4062_v47, %v4066_v63  ;;  %v4054_v46 = vld [vmem:[#allocation6 + $0xd58] sm:$0xff]  ;;  %v8775_v53 = vcombine.low %v4062_v47, %v4066_v63 }
 0x40c   : > { %v4058_v55 = vld [vmem:[#allocation6 + $0xd78] sm:$0xff] }
 0x40d   : > { %7251 = vmatpush2.bf16.msra.mxu1 %v8583_v33  ;;  %v8768_v54 = vcombine.high %v4054_v46, %v4058_v55  ;;  %v4046_v14 = vld [vmem:[#allocation6 + $0xd18] sm:$0xff] }
 0x40e   : > { %7252 = vmatprep.subr.bf16.mxu1 %v8576_v52  ;;  %7300 = vmatpush2.bf16.msra.mxu0 %v8679_v60  ;;  %v4042_v20 = vld [vmem:[#allocation6 + $0xcf8] sm:$0xff] }
 0x40f   : > { %7301 = vmatprep.subr.bf16.mxu0 %v8672_v18  ;;  %v4030_v49 = vld [vmem:[#allocation6 + $0xc98] sm:$0xff] }
 0x410   : > { %v4026_v47 = vld [vmem:[#allocation6 + $0xc78] sm:$0xff] }
 0x411   : > { %7253 = vmatpush2.bf16.msra.mxu1 %v8575_v57 }
 0x412   : > { %7254 = vmatprep.subr.bf16.mxu1 %v8568_v27  ;;  %7302 = vmatpush2.bf16.msra.mxu0 %v8671_v2  ;;  %v4038_v2 = vld [vmem:[#allocation6 + $0xcd8] sm:$0xff] }
 0x413   : > { %7303 = vmatprep.subr.bf16.mxu0 %v8664_v8  ;;  %v8752_v36 = vcombine.high %v4038_v2, %v4042_v20 }
 0x415   : > { %7255 = vmatpush2.bf16.msra.mxu1 %v8567_v9 }
 0x416   : > { %7256 = vmatprep.subr.bf16.mxu1 %v8560_v19  ;;  %7304 = vmatpush2.bf16.msra.mxu0 %v8663_v10 }
 0x419   : > { %7257 = vmatpush2.bf16.msra.mxu1 %v8559_v13  ;;  %v9620_v22 = vpop.f32.mrf.mxu0  ;;  %7306 = vmatmul.mubr.bf16.vlgmr.msra.gmra.mxu0 %v9498_v17  ;;  %v8783_v17 = vcombine.low %v4070_v43, %v4074_v44 }
 0x41a   : > { %7258 = vmatprep.subr.bf16.mxu1 %v8552_v15 }
 0x41b   : > { %v9623_v31 = vpop.f32.mrf.mxu0 }
 0x41d   : > { %7259 = vmatpush2.bf16.msra.mxu1 %v8551_v35  ;;  %v7065_v39 = vpop.f32.mrf.mxu0  ;;  %v4034_v35 = vld [vmem:[#allocation6 + $0xcb8] sm:$0xff] }
 0x41e   : > { %7260 = vmatprep.subr.bf16.mxu1 %v8544_v24  ;;  %v8751_v24 = vcombine.low %v4038_v2, %v4042_v20  ;;  %v4118_v20 = vld [vmem:[#allocation6 + $0xf58] sm:$0xff] }
 0x41f   : > { %v7066_v58 = vpop.f32.mrf.mxu0 }
 0x421   : > { %7261 = vmatpush2.bf16.msra.mxu1 %v8543_v32 }
 0x422   : > { %7262 = vmatprep.subr.bf16.mxu1 %v8536_v41  ;;  %v8744_v41 = vcombine.high %v4030_v49, %v4034_v35 }
 0x425   : > { %7263 = vmatpush2.bf16.msra.mxu1 %v8535_v28 }
 0x426   : > { %7314 = vmatprep.subr.bf16.mxu1 %v8784_v11  ;;  %v4022_v11 = vld [vmem:[#allocation6 + $0xc58] sm:$0xff] }
 0x428   : > { %v7020_v48 = vpop.f32.mrf.mxu1  ;;  %7265 = vmatmul.mubr.bf16.vlgmr.msra.gmra.mxu1 %v9471_v23  ;;  %v4050_v23 = vld [vmem:[#allocation6 + $0xd38] sm:$0xff] }
 0x429   : > { %v9627_v51 = vadd.f32 %v7020_v48, %v9615_v3  ;;  %7315 = vmatpush1.bf16.msra.mxu1 %v8783_v17  ;;  %7346 = vmatprep.mubr.bf16.mxu1 %v9514_v26  ;;  %v8767_v3 = vcombine.low %v4054_v46, %v4058_v55  ;;  %v8760_v57 = vcombine.high %v4046_v14, %v4050_v23 }
 0x42a   : > { %v7022_v37 = vpop.f32.mrf.mxu1  ;;  %7316 = vmatprep.subr.bf16.mxu1 %v8776_v42  ;;  %v8759_v6 = vcombine.low %v4046_v14, %v4050_v23  ;;  %v8743_v46 = vcombine.low %v4030_v49, %v4034_v35  ;;  %v8736_v48 = vcombine.high %v4022_v11, %v4026_v47  ;;  %v8735_v23 = vcombine.low %v4022_v11, %v4026_v47 }
 0x42b   : > { %v7367_v40 = vrot.slane %v9627_v51, 4  ;;  %v7414_v33 = vmul.f32 %v9627_v51, %v9627_v51  ;;  %v9634_v34 = vadd.f32 %v7022_v37, %v9618_v61 }
 0x42c   : > { %v7024_v52 = vpop.f32.mrf.mxu1 }
 0x42d   : > { %v7368_v60 = vadd.f32 %v7367_v40, %v9627_v51  ;;  %v7432_v62 = vrot.slane %v7414_v33, 4  ;;  %v7373_v26 = vrot.slane %v9634_v34, 4  ;;  %v7415_v21 = vmul.f32 %v9634_v34, %v9634_v34  ;;  %7317 = vmatpush1.bf16.msra.mxu1 %v8775_v53  ;;  %v4018_v40 = vld [vmem:[#allocation6 + $0xc38] sm:$0xff] }
 0x42e   : > { %v7025_v18 = vpop.f32.mrf.mxu1  ;;  %7318 = vmatprep.subr.bf16.mxu1 %v8768_v54  ;;  %v4014_v54 = vld [vmem:[#allocation6 + $0xc18] sm:$0xff] }
 0x42f   : > { %v7369_v56 = vrot.slane %v7368_v60, 2  ;;  %v7433_v25 = vadd.f32 %v7432_v62, %v7414_v33  ;;  %v7374_v61 = vadd.f32 %v7373_v26, %v9634_v34  ;;  %v7438_v27 = vrot.slane %v7415_v21, 4  ;;  %v4134_v62 = vld [vmem:[#allocation6 + $0xfd8] sm:$0xff] }
 0x430   : > { %v4138_v26 = vld [vmem:[#allocation6 + $0xff8] sm:$0xff]  ;;  %v8727_v18 = vcombine.low %v4014_v54, %v4018_v40 }
 0x431   : > { %v7370_v8 = vadd.f32 %v7369_v56, %v7368_v60  ;;  %v7434_v9 = vrot.slane %v7433_v25, 2  ;;  %v7375_v19 = vrot.slane %v7374_v61, 2  ;;  %v7439_v10 = vadd.f32 %v7438_v27, %v7415_v21  ;;  %7319 = vmatpush1.bf16.msra.mxu1 %v8767_v3 }
 0x432   : > { %7320 = vmatprep.subr.bf16.mxu1 %v8760_v57  ;;  %v8728_v3 = vcombine.high %v4014_v54, %v4018_v40  ;;  %v8848_v56 = vcombine.high %v4134_v62, %v4138_v26  ;;  %v8847_v27 = vcombine.low %v4134_v62, %v4138_v26 }
 0x433   : > { %v7371_v1 = vrot.slane %v7370_v8, 1  ;;  %v7435_v13 = vadd.f32 %v7434_v9, %v7433_v25  ;;  %v7376_v15 = vadd.f32 %v7375_v19, %v7374_v61  ;;  %v7440_v30 = vrot.slane %v7439_v10, 2  ;;  %v4126_v25 = vld [vmem:[#allocation6 + $0xf98] sm:$0xff] }
 0x434   : > { %v4130_v61 = vld [vmem:[#allocation6 + $0xfb8] sm:$0xff] }
 0x435   : > { %v7372_v38 = vadd.f32 %v7371_v1, %v7370_v8  ;;  %v7436_v59 = vrot.slane %v7435_v13, 1  ;;  %v7377_v32 = vrot.slane %v7376_v15, 1  ;;  %v7441_v39 = vadd.f32 %v7440_v30, %v7439_v10  ;;  %7321 = vmatpush1.bf16.msra.mxu1 %v8759_v6  ;;  %v4122_v6 = vld [vmem:[#allocation6 + $0xf78] sm:$0xff]  ;;  %v8967_v8 = vld [vmem:[#allocation9 + $0x8] sm:$0xff] }
 0x436   : > { %7322 = vmatprep.subr.bf16.mxu1 %v8752_v36  ;;  %v8840_v2 = vcombine.high %v4126_v25, %v4130_v61  ;;  %v7543_v9 = vrot.slane %v8967_v8, %v9573_v16  ;;  %v8839_v19 = vcombine.low %v4126_v25, %v4130_v61  ;;  %v8832_v10 = vcombine.high %v4118_v20, %v4122_v6  ;;  %v4110_v1 = vld [vmem:[#allocation6 + $0xf18] sm:$0xff] }
 0x437   : > { %v9641_v43 = vmul.f32 0.125, %v7372_v38  ;;  %v7437_v44 = vadd.f32 %v7436_v59, %v7435_v13  ;;  %v7378_v58 = vadd.f32 %v7377_v32, %v7376_v15  ;;  %v7442_v28 = vrot.slane %v7441_v39, 1  ;;  %v4114_v13 = vld [vmem:[#allocation6 + $0xf38] sm:$0xff] }
 0x438   : > { %v7623_v36 = vrot.slane %v8967_v8, %v9576_v29  ;;  %v7547_v15 = vrot.slane %v8967_v8, %v9579_v7  ;;  %v7583_v49 = vrot.slane %v7543_v9, %v9573_v16  ;;  %v8831_v35 = vcombine.low %v4118_v20, %v4122_v6  ;;  %v4078_v25 = vld [vmem:[#allocation6 + $0xe18] sm:$0xff] }
 0x439   : > { %v7470_v63 = vmul.f32 0.125, %v7437_v44  ;;  %v7478_v17 = vmul.f32 %v9641_v43, %v9641_v43  ;;  %v9645_v42 = vmul.f32 0.125, %v7378_v58  ;;  %7323 = vmatpush1.bf16.msra.mxu1 %v8751_v24  ;;  %v7443_v55 = vadd.f32 %v7442_v28, %v7441_v39  ;;  %v4106_v44 = vld [vmem:[#allocation6 + $0xef8] sm:$0xff] }
 0x43a   : > { %7324 = vmatprep.subr.bf16.mxu1 %v8744_v41  ;;  %v7502_v30 = vsub.f32 %v9627_v51, %v9641_v43  ;;  %v7627_v38 = vrot.slane %v8967_v8, %v9583_v45  ;;  %v8824_v59 = vcombine.high %v4110_v1, %v4114_v13  ;;  %v7663_v39 = vrot.slane %v7623_v36, %v9576_v29  ;;  %v4102_v41 = vld [vmem:[#allocation6 + $0xed8] sm:$0xff] }
 0x43b   : > { %v7486_v53 = vsub.f32 %v7470_v63, %v7478_v17  ;;  %v7479_v37 = vmul.f32 %v9645_v42, %v9645_v42  ;;  %v7471_v33 = vmul.f32 0.125, %v7443_v55  ;;  %v7503_v58 = vsub.f32 %v9634_v34, %v9645_v42  ;;  %v4094_v55 = vld [vmem:[#allocation6 + $0xe98] sm:$0xff] }
 0x43c   : > { %v7587_v28 = vrot.slane %v7547_v15, %v9573_v16  ;;  %v8823_v11 = vcombine.low %v4110_v1, %v4114_v13  ;;  %v7667_v63 = vrot.slane %v7627_v38, %v9576_v29  ;;  %v8816_v17 = vcombine.high %v4102_v41, %v4106_v44  ;;  %v4082_v61 = vld [vmem:[#allocation6 + $0xe38] sm:$0xff] }
 0x43d   : > { %v7494_v14 = vmax.f32 %v7486_v53, 0.0  ;;  %7325 = vmatpush1.bf16.msra.mxu1 %v8743_v46  ;;  %v7487_v52 = vsub.f32 %v7471_v33, %v7479_v37  ;;  %v7732_v53 = vsub.s32 3, %v9373_v50  ;;  %v7729_v34 = vrot.slane %v9596_v4, %v9576_v29 }
 0x43e   : > { %7326 = vmatprep.subr.bf16.mxu1 %v8736_v48  ;;  %v4098_v48 = vld [vmem:[#allocation6 + $0xeb8] sm:$0xff]  ;;  %v8815_v42 = vcombine.low %v4102_v41, %v4106_v44  ;;  %v8792_v9 = vcombine.high %v4078_v25, %v4082_v61 }
 0x43f   : > { %v7510_v60 = vadd.f32 1e-05, %v7494_v14  ;;  %v7495_v21 = vmax.f32 %v7487_v52, 0.0  ;;  %v8808_v33 = vcombine.high %v4094_v55, %v4098_v48  ;;  %v4086_v14 = vld [vmem:[#allocation6 + $0xe58] sm:$0xff]  ;;  %v8807_v26 = vcombine.low %v4094_v55, %v4098_v48 }
 0x441   : > { %8950 = vrsqrt.f32 %v7510_v60  ;;  %7327 = vmatpush1.bf16.msra.mxu1 %v8735_v23  ;;  %v7511_v57 = vadd.f32 1e-05, %v7495_v21  ;;  %v4090_v23 = vld [vmem:[#allocation6 + $0xe78] sm:$0xff] }
 0x442   : > { %7328 = vmatprep.subr.bf16.mxu1 %v8728_v3  ;;  %v7733_v3 = vrot.slane %v9596_v4, %v7732_v53  ;;  %v8799_v20 = vcombine.low %v4086_v14, %v4090_v23 }
 0x443   : > { %8952 = vrsqrt.f32 %v7511_v57 }
 0x445   : > { %7329 = vmatpush1.bf16.msra.mxu1 %v8727_v18  ;;  %v8800_v18 = vcombine.high %v4086_v14, %v4090_v23 }
 0x446   : > { %7330 = vmatprep.subr.bf16.mxu1 %v8848_v56 }
 0x449   : > { %7331 = vmatpush2.bf16.msra.mxu1 %v8847_v27 }
 0x44a   : > { %7332 = vmatprep.subr.bf16.mxu1 %v8840_v2 }
 0x44d   : > { %7333 = vmatpush2.bf16.msra.mxu1 %v8839_v19 }
 0x44e   : > { %v8951_v24 = vpop.eup %8950  ;;  %7334 = vmatprep.subr.bf16.mxu1 %v8832_v10  ;;  %v8791_v10 = vcombine.low %v4078_v25, %v4082_v61 }
 0x44f   : > { %v7526_v32 = vmul.f32 %v8951_v24, %v7502_v30 }
 0x450   : > { %v8953_v51 = vpop.eup %8952 }
 0x451   : > { %v7606_v43 = vmul.f32 %v7583_v49, %v7526_v32  ;;  %7335 = vmatpush2.bf16.msra.mxu1 %v8831_v35  ;;  %v7527_v47 = vmul.f32 %v8953_v51, %v7503_v58 }
 0x452   : > { %7336 = vmatprep.subr.bf16.mxu1 %v8824_v59 }
 0x453   : > { %v7686_v46 = vadd.f32 %v7663_v39, %v7606_v43  ;;  %v7607_v37 = vmul.f32 %v7587_v28, %v7527_v47 }
 0x455   : > { %7337 = vmatpush2.bf16.msra.mxu1 %v8823_v11  ;;  %vm7694_vm12 = vcmp.gt.f32.partialorder %v7686_v46, 0.0  ;;  %v7702_v54 = vmul.f32 0.2, %v7686_v46  ;;  %v7687_v40 = vadd.f32 %v7667_v63, %v7607_v37 }
 0x456   : > { %7338 = vmatprep.subr.bf16.mxu1 %v8816_v17 }
 0x457   : > { %v7710_v52 = vsel %vm7694_vm12, %v7686_v46, %v7702_v54  ;;  %vm7695_vm13 = vcmp.gt.f32.partialorder %v7687_v40, 0.0  ;;  %v7703_v60 = vmul.f32 0.2, %v7687_v40 }
 0x458   : > { %v7760_v62 = vmul.f32 %v7729_v34, %v7710_v52 }
 0x459   : > { %7339 = vmatpush2.bf16.msra.mxu1 %v8815_v42  ;;  %v7143_v21 = vpop.f32.mrf.mxu0  ;;  %v7711_v57 = vsel %vm7695_vm13, %v7687_v40, %v7703_v60 }
 0x45a   : > { %7340 = vmatprep.subr.bf16.mxu1 %v8808_v33  ;;  %v7767_v56 = vadd.f32 %v9608_v0, %v7760_v62  ;;  %v7761_v27 = vmul.f32 %v7733_v3, %v7711_v57 }
 0x45b   : > { %v7145_v2 = vpop.f32.mrf.mxu0 }
 0x45c   : > { %v9668_v6 = vadd.f32 %v7767_v56, %v7761_v27 }
 0x45d   : > { %7341 = vmatpush2.bf16.msra.mxu1 %v8807_v26  ;;  %v7147_v8 = vpop.f32.mrf.mxu0 }
 0x45e   : > { %7342 = vmatprep.subr.bf16.mxu1 %v8800_v18 }
 0x45f   : > { %v7148_v19 = vpop.f32.mrf.mxu0 }
 0x461   : > { %7343 = vmatpush2.bf16.msra.mxu1 %v8799_v20 }
 0x462   : > { %7344 = vmatprep.subr.bf16.mxu1 %v8792_v9 }
 0x465   : > { %7345 = vmatpush2.bf16.msra.mxu1 %v8791_v10 }
 0x468   : > { %v7102_v36 = vpop.f32.mrf.mxu1  ;;  %7347 = vmatmul.mubr.bf16.vlgmr.msra.gmra.mxu1 %v9516_v12 }
 0x469   : > { %v7103_v0 = vadd.f32 %v7102_v36, %v9620_v22 }
 0x46a   : > { %v7104_v1 = vpop.f32.mrf.mxu1 }
 0x46b   : > { %v7105_v13 = vadd.f32 %v7104_v1, %v9623_v31  ;;  %v7144_v15 = vadd.f32 %v7143_v21, %v7103_v0  ;;  %v8968_v0 = vld [vmem:[#allocation9 + $0x10] sm:$0xff] }
 0x46c   : > { %v7106_v30 = vpop.f32.mrf.mxu1  ;;  %v7551_v1 = vrot.slane %v8968_v0, %v9573_v16 }
 0x46d   : > { %v7146_v49 = vadd.f32 %v7145_v2, %v7105_v13  ;;  %v7631_v13 = vrot.slane %v8968_v0, %v9576_v29 }
 0x46e   : > { %v7107_v35 = vpop.f32.mrf.mxu1 }
 0x499   : > { %v9673_v24 = vpop.f32.mrf.mxu0 }
 0x49b   : > { %v9675_v38 = vpop.f32.mrf.mxu0 }
 0x49d   : > { %v7229_v59 = vpop.f32.mrf.mxu0 }
 0x49e   : > { %v7635_v59 = vrot.slane %v8968_v0, %v9583_v45 }
 0x49f   : > { %v7230_v32 = vpop.f32.mrf.mxu0 }
 0x4a8   : > { %v7184_v39 = vpop.f32.mrf.mxu1 }
 0x4a9   : > { %v7185_v41 = vadd.f32 %v7184_v39, %v7144_v15  ;;  %v7555_v15 = vrot.slane %v8968_v0, %v9579_v7  ;;  %v7671_v39 = vrot.slane %v7631_v13, %v9576_v29 }
 0x4aa   : > { %v7186_v44 = vpop.f32.mrf.mxu1 }
 0x4ab   : > { %v7379_v58 = vrot.slane %v7185_v41, 4  ;;  %v7416_v12 = vmul.f32 %v7185_v41, %v7185_v41  ;;  %v7187_v28 = vadd.f32 %v7186_v44, %v7146_v49  ;;  %v7591_v49 = vrot.slane %v7551_v1, %v9573_v16 }
 0x4ac   : > { %v7188_v22 = vpop.f32.mrf.mxu1 }
 0x4ad   : > { %v7380_v51 = vadd.f32 %v7379_v58, %v7185_v41  ;;  %v7444_v43 = vrot.slane %v7416_v12, 4  ;;  %v7385_v31 = vrot.slane %v7187_v28, 4  ;;  %v7417_v11 = vmul.f32 %v7187_v28, %v7187_v28 }
 0x4ae   : > { %v7189_v47 = vpop.f32.mrf.mxu1  ;;  %v7595_v58 = vrot.slane %v7555_v15, %v9573_v16 }
 0x4af   : > { %v7381_v63 = vrot.slane %v7380_v51, 2  ;;  %v7445_v17 = vadd.f32 %v7444_v43, %v7416_v12  ;;  %v7386_v46 = vadd.f32 %v7385_v31, %v7187_v28  ;;  %v7450_v55 = vrot.slane %v7417_v11, 4 }
 0x4b0   : > { %v7675_v43 = vrot.slane %v7635_v59, %v9576_v29 }
 0x4b1   : > { %v7382_v48 = vadd.f32 %v7381_v63, %v7380_v51  ;;  %v7446_v37 = vrot.slane %v7445_v17, 2  ;;  %v7387_v34 = vrot.slane %v7386_v46, 2  ;;  %v7451_v42 = vadd.f32 %v7450_v55, %v7417_v11 }
 0x4b3   : > { %v7383_v54 = vrot.slane %v7382_v48, 1  ;;  %v7447_v40 = vadd.f32 %v7446_v37, %v7445_v17  ;;  %v7388_v33 = vadd.f32 %v7387_v34, %v7386_v46  ;;  %v7452_v14 = vrot.slane %v7451_v42, 2 }
 0x4b4   : > { %v7741_v46 = vrot.slane %v9596_v4, %v9579_v7 }
 0x4b5   : > { %v7384_v23 = vadd.f32 %v7383_v54, %v7382_v48  ;;  %v7448_v52 = vrot.slane %v7447_v40, 1  ;;  %v7389_v3 = vrot.slane %v7388_v33, 1  ;;  %v7453_v60 = vadd.f32 %v7452_v14, %v7451_v42 }
 0x4b7   : > { %v7408_v62 = vmul.f32 0.125, %v7384_v23  ;;  %v7449_v26 = vadd.f32 %v7448_v52, %v7447_v40  ;;  %v7390_v21 = vadd.f32 %v7389_v3, %v7388_v33  ;;  %v7454_v18 = vrot.slane %v7453_v60, 1 }
 0x4b9   : > { %v7472_v57 = vmul.f32 0.125, %v7449_v26  ;;  %v7480_v56 = vmul.f32 %v7408_v62, %v7408_v62  ;;  %v7409_v25 = vmul.f32 0.125, %v7390_v21  ;;  %v7455_v61 = vadd.f32 %v7454_v18, %v7453_v60 }
 0x4ba   : > { %v7504_v30 = vsub.f32 %v7185_v41, %v7408_v62  ;;  %v7737_v41 = vrot.slane %v9596_v4, %v9379_v5 }
 0x4bb   : > { %v7488_v27 = vsub.f32 %v7472_v57, %v7480_v56  ;;  %v7481_v2 = vmul.f32 %v7409_v25, %v7409_v25  ;;  %v7473_v20 = vmul.f32 0.125, %v7455_v61  ;;  %v7505_v44 = vsub.f32 %v7187_v28, %v7409_v25 }
 0x4bd   : > { %v7496_v8 = vmax.f32 %v7488_v27, 0.0  ;;  %v7489_v9 = vsub.f32 %v7473_v20, %v7481_v2 }
 0x4bf   : > { %v7512_v19 = vadd.f32 1e-05, %v7496_v8  ;;  %v7497_v10 = vmax.f32 %v7489_v9, 0.0 }
 0x4c1   : > { %8954 = vrsqrt.f32 %v7512_v19  ;;  %v7513_v36 = vadd.f32 1e-05, %v7497_v10 }
 0x4c3   : > { %8956 = vrsqrt.f32 %v7513_v36 }
 0x4ce   : > { %v8955_v35 = vpop.eup %8954 }
 0x4cf   : > { %v7528_v32 = vmul.f32 %v8955_v35, %v7504_v30 }
 0x4d0   : > { %v8957_v12 = vpop.eup %8956 }
 0x4d1   : > { %v7608_v22 = vmul.f32 %v7591_v49, %v7528_v32  ;;  %v7529_v51 = vmul.f32 %v8957_v12, %v7505_v44 }
 0x4d3   : > { %v7688_v31 = vadd.f32 %v7671_v39, %v7608_v22  ;;  %v7609_v11 = vmul.f32 %v7595_v58, %v7529_v51 }
 0x4d5   : > { %vm7696_vm14 = vcmp.gt.f32.partialorder %v7688_v31, 0.0  ;;  %v7704_v47 = vmul.f32 0.2, %v7688_v31  ;;  %v7689_v63 = vadd.f32 %v7675_v43, %v7609_v11 }
 0x4d7   : > { %v7712_v17 = vsel %vm7696_vm14, %v7688_v31, %v7704_v47  ;;  %vm7697_vm15 = vcmp.gt.f32.partialorder %v7689_v63, 0.0  ;;  %v7705_v28 = vmul.f32 0.2, %v7689_v63 }
 0x4d8   : > { %v7762_v55 = vmul.f32 %v7737_v41, %v7712_v17 }
 0x4d9   : > { %v7307_v48 = vpop.f32.mrf.mxu0  ;;  %v7713_v37 = vsel %vm7697_vm15, %v7689_v63, %v7705_v28 }
 0x4da   : > { %v7769_v34 = vadd.f32 %v9668_v6, %v7762_v55  ;;  %v7763_v42 = vmul.f32 %v7741_v46, %v7713_v37 }
 0x4db   : > { %v7309_v54 = vpop.f32.mrf.mxu0 }
 0x4dc   : > { %v9690_v40 = vadd.f32 %v7769_v34, %v7763_v42  ;;  %v8969_v34 = vld [vmem:[#allocation9 + $0x18] sm:$0xff] }
 0x4dd   : > { %v7311_v33 = vpop.f32.mrf.mxu0  ;;  %v7559_v42 = vrot.slane %v8969_v34, %v9573_v16 }
 0x4de   : > { %v7563_v33 = vrot.slane %v8969_v34, %v9579_v7  ;;  %v7748_v7 = vsub.s32 7, %v9373_v50 }
 0x4df   : > { %v7312_v5 = vpop.f32.mrf.mxu0 }
 0x4e8   : > { %v7266_v14 = vpop.f32.mrf.mxu1 }
 0x4e9   : > { %v7267_v60 = vadd.f32 %v7266_v14, %v9673_v24  ;;  %v7599_v14 = vrot.slane %v7559_v42, %v9573_v16 }
 0x4ea   : > { %v7268_v23 = vpop.f32.mrf.mxu1 }
 0x4eb   : > { %v7269_v4 = vadd.f32 %v7268_v23, %v9675_v38  ;;  %v7308_v62 = vadd.f32 %v7307_v48, %v7267_v60 }
 0x4ec   : > { %v7270_v52 = vpop.f32.mrf.mxu1 }
 0x4ed   : > { %v7310_v18 = vadd.f32 %v7309_v54, %v7269_v4  ;;  %v7639_v54 = vrot.slane %v8969_v34, %v9576_v29  ;;  %v7643_v52 = vrot.slane %v8969_v34, %v9583_v45 }
 0x4ee   : > { %v7271_v3 = vpop.f32.mrf.mxu1 }
 0x4ef   : > { %v7679_v60 = vrot.slane %v7639_v54, %v9576_v29 }
 0x528   : > { %v7348_v26 = vpop.f32.mrf.mxu1 }
 0x529   : > { %v7349_v21 = vadd.f32 %v7348_v26, %v7308_v62  ;;  %v7603_v62 = vrot.slane %v7563_v33, %v9573_v16 }
 0x52a   : > { %v7350_v57 = vpop.f32.mrf.mxu1 }
 0x52b   : > { %v7391_v6 = vrot.slane %v7349_v21, 4  ;;  %v7418_v56 = vmul.f32 %v7349_v21, %v7349_v21  ;;  %v7351_v25 = vadd.f32 %v7350_v57, %v7310_v18 }
 0x52c   : > { %v7352_v61 = vpop.f32.mrf.mxu1 }
 0x52d   : > { %v7392_v27 = vadd.f32 %v7391_v6, %v7349_v21  ;;  %v7456_v2 = vrot.slane %v7418_v56, 4  ;;  %v7397_v20 = vrot.slane %v7351_v25, 4  ;;  %v7419_v8 = vmul.f32 %v7351_v25, %v7351_v25  ;;  %v8970_v61 = vld [vmem:[#allocation7] sm:$0xff] }
 0x52e   : > { %v7353_v9 = vpop.f32.mrf.mxu1  ;;  %v7683_v6 = vrot.slane %v7643_v52, %v9576_v29 }
 0x52f   : > { %v7393_v19 = vrot.slane %v7392_v27, 2  ;;  %v7457_v10 = vadd.f32 %v7456_v2, %v7418_v56  ;;  %v7398_v36 = vadd.f32 %v7397_v20, %v7351_v25  ;;  %v7462_v24 = vrot.slane %v7419_v8, 4 }
 0x530   : > { %v7749_v9 = vrot.slane %v8970_v61, %v7748_v7 }
 0x531   : > { %v7394_v0 = vadd.f32 %v7393_v19, %v7392_v27  ;;  %v7458_v38 = vrot.slane %v7457_v10, 2  ;;  %v7399_v1 = vrot.slane %v7398_v36, 2  ;;  %v7463_v13 = vadd.f32 %v7462_v24, %v7419_v8  ;;  %v8971_v24 = vld [vmem:[#allocation9] sm:$0xff] }
 0x532   : > { %v7745_v27 = vrot.slane %v8970_v61, %v9583_v45  ;;  %v7778_v45 = vrot.slane %v8971_v24, %v7732_v53 }
 0x533   : > { %v7395_v15 = vrot.slane %v7394_v0, 1  ;;  %v7459_v30 = vadd.f32 %v7458_v38, %v7457_v10  ;;  %v7400_v49 = vadd.f32 %v7399_v1, %v7398_v36  ;;  %v7464_v35 = vrot.slane %v7463_v13, 2 }
 0x535   : > { %v7396_v59 = vadd.f32 %v7395_v15, %v7394_v0  ;;  %v7460_v32 = vrot.slane %v7459_v30, 1  ;;  %v7401_v39 = vrot.slane %v7400_v49, 1  ;;  %v7465_v44 = vadd.f32 %v7464_v35, %v7463_v13 }
 0x537   : > { %v7410_v58 = vmul.f32 0.125, %v7396_v59  ;;  %v7461_v12 = vadd.f32 %v7460_v32, %v7459_v30  ;;  %v7402_v22 = vadd.f32 %v7401_v39, %v7400_v49  ;;  %v7466_v51 = vrot.slane %v7465_v44, 1 }
 0x539   : > { %v7474_v43 = vmul.f32 0.125, %v7461_v12  ;;  %v7482_v31 = vmul.f32 %v7410_v58, %v7410_v58  ;;  %v7411_v11 = vmul.f32 0.125, %v7402_v22  ;;  %v7467_v41 = vadd.f32 %v7466_v51, %v7465_v44 }
 0x53a   : > { %v7506_v5 = vsub.f32 %v7349_v21, %v7410_v58 }
 0x53b   : > { %v7490_v47 = vsub.f32 %v7474_v43, %v7482_v31  ;;  %v7483_v63 = vmul.f32 %v7411_v11, %v7411_v11  ;;  %v7475_v17 = vmul.f32 0.125, %v7467_v41  ;;  %v7507_v4 = vsub.f32 %v7351_v25, %v7411_v11 }
 0x53d   : > { %v7498_v46 = vmax.f32 %v7490_v47, 0.0  ;;  %v7491_v28 = vsub.f32 %v7475_v17, %v7483_v63 }
 0x53f   : > { %v7514_v55 = vadd.f32 1e-05, %v7498_v46  ;;  %v7499_v48 = vmax.f32 %v7491_v28, 0.0 }
 0x541   : > { %8958 = vrsqrt.f32 %v7514_v55  ;;  %v7515_v37 = vadd.f32 1e-05, %v7499_v48 }
 0x543   : > { %8960 = vrsqrt.f32 %v7515_v37 }
 0x54e   : > { %v8959_v23 = vpop.eup %8958 }
 0x54f   : > { %v7530_v3 = vmul.f32 %v8959_v23, %v7506_v5 }
 0x550   : > { %v8961_v26 = vpop.eup %8960 }
 0x551   : > { %v7610_v18 = vmul.f32 %v7599_v14, %v7530_v3  ;;  %v7531_v57 = vmul.f32 %v8961_v26, %v7507_v4 }
 0x553   : > { %v7690_v56 = vadd.f32 %v7679_v60, %v7610_v18  ;;  %v7611_v21 = vmul.f32 %v7603_v62, %v7531_v57 }
 0x555   : > { %vm7698_vm0 = vcmp.gt.f32.partialorder %v7690_v56, 0.0  ;;  %v7706_v2 = vmul.f32 0.2, %v7690_v56  ;;  %v7691_v20 = vadd.f32 %v7683_v6, %v7611_v21 }
 0x557   : > { %v7714_v8 = vsel %vm7698_vm0, %v7690_v56, %v7706_v2  ;;  %vm7699_vm1 = vcmp.gt.f32.partialorder %v7691_v20, 0.0  ;;  %v7707_v16 = vmul.f32 0.2, %v7691_v20 }
 0x558   : > { %v7764_v25 = vmul.f32 %v7745_v27, %v7714_v8 }
 0x559   : > { %v7715_v19 = vsel %vm7699_vm1, %v7691_v20, %v7707_v16 }
 0x55a   : > { %v7771_v29 = vadd.f32 %v9690_v40, %v7764_v25  ;;  %v7765_v10 = vmul.f32 %v7749_v9, %v7715_v19 }
 0x55c   : > { %v7772_v36 = vadd.f32 %v7771_v29, %v7765_v10 }
 0x55e   : > { %7773 = vadd.xlane.f32.xlu0 %v7772_v36 }
 0x5e7   : > { %v7774_v0 = vpop.xlane.xlu0 %7773 }
 0x5e8   : > { %v7779_v38 = vadd.f32 %v7778_v45, %v7774_v0 }
 0x5ea   : > { %v8849_v1 = vmul.f32 -1.442695, %v7779_v38 }
 0x5ec   : > { %8962 = vpow2.f32 %v8849_v1 }
 0x5f9   : > { %v8963_v13 = vpop.eup %8962 }
 0x5fa   : > { %v7783_v15 = vadd.f32 1.0, %v8963_v13 }
 0x5fc   : > { %8964 = vrcp.f32 %v7783_v15 }
 0x609   : > { %v8965_v40 = vpop.eup %8964 }
 0x60a   : > { %7787 = vst.msk [vmem:[%s294_s18] sm:$0xff] %vm7786_vm2, %v8965_v40 }
 0x60b PF: > { %p17_p2 = scmp.ge.s32.totalorder %s9266_s29, 4   ;;  %s9744_s18 = smov %s9138_s19 }
 0x60c   : > { %s9745_s19 = smov %s9142_s20  ;;  %s9746_s20 = smov %s9278_s6 }
 0x60d   : > { %s9747_s21 = smov %s9266_s29  ;;  %19 = sbr.rel (!%p17_p2) target bundleno = 5 (0x5), region = 96 }
 0x612   :  { %7807 = vsyncpa [#allocation3], 1 }
 0x613   :  { %7809 = vsyncpa [#allocation3 + $0x1], 1 }
 0x614   :  { %7810 = vsyncpa [#allocation5], 1 }
 0x615   :  { %7811 = vsyncpa [#allocation8], 1 }

</bundles_post_ra>
